<compile_context>
chip_gen: v6e
topology: v6e:2x2x1
jax: 0.10.0
libtpu: 0.0.40
codegen_flags: <defaults>
</compile_context>

<pallas_src>
import functools

import jax
import jax.numpy as jnp
from jax.experimental import pallas as pl
from jax.experimental.pallas import tpu as pltpu

C = 32           # num_channels of FirstLayer / Block
L = 6            # num_labels
NUM_BLOCKS = 3
PR = 2           # zero-pad image rows added above/below each image in the flat layout


def _round_up(v, m):
    return (v + m - 1) // m * m


# ---------------------------------------------------------------------------
# Fused ErnNet forward kernel (B_N batch images per grid step)
# ---------------------------------------------------------------------------
def _ernnet_kernel(mask_ref, patch_ref, wfl_ref, bfl_ref, w1s_ref, b1s_ref,
                   w2c_ref, b2s_ref, fcw_ref, fcb_ref, out_ref,
                   a_ref, s_ref, *, B_N, P, Q, RW, G):
    PQ = P * Q
    SEG = (P + 2 * PR) * RW           # flat rows per image (incl. zero pad bands)
    ROWS = B_N * SEG                  # flat rows per grid step
    VIEW = ROWS - 2 * G               # rows for which the 3x3 conv is evaluated
                                      # (covers every real pixel row; G >= RW+1 keeps
                                      #  all shifted tap reads in bounds)

    mask = mask_ref[...]              # (ROWS, C): 1.0 on real pixel rows/cols else 0.0

    # ---- FirstLayer: im2col conv3x3(1->C) as ONE MXU dot + 2x2 maxpool + bias/relu ----
    # Patch rows are ordered (image, pool-position, out-pixel); max over the 4 pool
    # positions commutes with the shared per-channel BN bias add + relu.
    pat = patch_ref[...].reshape(B_N * 4 * PQ, 9)
    y4 = jnp.dot(pat, wfl_ref[...], preferred_element_type=jnp.float32)     # (B_N*4*PQ, C)
    y4 = y4.reshape(B_N, 4, PQ, C)
    pooled = jnp.maximum(jnp.maximum(y4[:, 0], y4[:, 1]),
                         jnp.maximum(y4[:, 2], y4[:, 3]))                   # (B_N, PQ, C)
    pooled = jnp.maximum(pooled + bfl_ref[...], 0.0)

    # ---- Stage into the zero-padded flat layout with ONE aligned contiguous store ----
    # Segment layout per image: PR zero rows | P rows of [Q real cols | RW-Q zero cols] | PR zero rows.
    pooled = pooled.reshape(B_N, P, Q, C)
    zc = jnp.zeros((B_N, P, RW - Q, C), jnp.float32)        # right pad columns
    zr = jnp.zeros((B_N, PR, RW, C), jnp.float32)           # top/bottom pad rows
    staged = jnp.concatenate(
        [zr, jnp.concatenate([pooled, zc], axis=2), zr], axis=1)            # (B_N, P+2PR, RW, C)
    a_ref[...] = staged.reshape(ROWS, C)

    # ---- 3 residual blocks ----
    #   t = relu(bn1(conv1x1(a)));  y = relu(bn2(conv3x3(t)));  a = a + y
    # conv3x3 = one deep (VIEW, 9*C) x (9*C, C) dot over lane-concatenated shifted taps.
    offs = [dh * RW + dw for dh in (-1, 0, 1) for dw in (-1, 0, 1)]
    for b in range(NUM_BLOCKS):
        a_full = a_ref[...]                                                 # (ROWS, C)
        t1 = jnp.maximum(
            jnp.dot(a_full, w1s_ref[b], preferred_element_type=jnp.float32) + b1s_ref[b],
            0.0)
        s_ref[...] = t1 * mask        # single aligned full store; pad rows/cols -> 0

        cat = jnp.concatenate(
            [s_ref[G + off:G + off + VIEW, :] for off in offs], axis=-1)    # (VIEW, 9*C)
        y2 = jnp.maximum(
            jnp.dot(cat, w2c_ref[b], preferred_element_type=jnp.float32) + b2s_ref[b],
            0.0)

        # residual add (mask keeps pad rows/cols exactly zero; rows outside [G, ROWS-G)
        # are pad bands that stay zero from the initial store)
        a_ref[G:G + VIEW, :] = a_full[G:G + VIEW, :] + y2 * mask[G:G + VIEW, :]

    # ---- AdaptiveAvgPool2d((1,1)) + Linear (fc then per-image mean; identical, linear) ----
    rows = jnp.dot(a_ref[...], fcw_ref[...], preferred_element_type=jnp.float32)   # (ROWS, L)
    per_img = jnp.sum(rows.reshape(B_N, SEG, L), axis=1) * (1.0 / PQ)               # (B_N, L)
    out_ref[0] = per_img + fcb_ref[...]


def _pick_batch_tile(n):
    # >= 2 grid steps (when n >= 2) so dimension_semantics=("parallel",) feeds both
    # TensorCores on v7x; cap the per-step tile (VMEM stays small at any cap).
    target = max(1, min(32, n // 2))
    for t in range(target, 0, -1):
        if n % t == 0:
            return t
    return 1


def ernnet_forward(x_nchw, params):
    x = x_nchw.astype(jnp.float32)
    N, CIN, H, W = x.shape
    assert CIN == 1 and H % 2 == 0 and W % 2 == 0
    P, Q = H // 2, W // 2             # post-pool spatial dims (8, 8 for 16x16 input)
    RW = _round_up(Q + 2, 8)          # 8-aligned flat row stride (Q real + >=2 zero cols)
    G = _round_up(RW + 1, 8)          # guard rows skipped by the 3x3 conv at buffer ends
    SEG = (P + 2 * PR) * RW
    B_N = _pick_batch_tile(N)
    GRID = N // B_N
    ROWS = B_N * SEG
    PQ = P * Q

    # im2col patches grouped by 2x2-maxpool position: (N, 4, P*Q, 9)
    x2 = x[:, 0]
    xpad = jnp.pad(x2, ((0, 0), (1, 1), (1, 1)))
    taps = [xpad[:, kh:kh + H, kw:kw + W] for kh in range(3) for kw in range(3)]
    pf = jnp.stack(taps, axis=-1).reshape(N, P, 2, Q, 2, 9)
    patches = jnp.transpose(pf, (0, 2, 4, 1, 3, 5)).reshape(N, 4, PQ, 9)

    # 1.0 on real pixel positions of the flat padded layout, 0.0 on pad rows/cols.
    seg_r = jnp.arange(SEG, dtype=jnp.int32)
    rowi, col = seg_r // RW, seg_r % RW
    real = (rowi >= PR) & (rowi < PR + P) & (col < Q)
    mask = jnp.broadcast_to(jnp.tile(real, B_N)[:, None], (ROWS, C)).astype(jnp.float32)

    kernel = functools.partial(_ernnet_kernel, B_N=B_N, P=P, Q=Q, RW=RW, G=G)
    out = pl.pallas_call(
        kernel,
        out_shape=jax.ShapeDtypeStruct((GRID, B_N, L), jnp.float32),
        grid_spec=pltpu.PrefetchScalarGridSpec(
            num_scalar_prefetch=0,
            grid=(GRID,),
            in_specs=[
                pl.BlockSpec((ROWS, C), lambda n: (0, 0)),                  # mask
                pl.BlockSpec((B_N, 4, PQ, 9), lambda n: (n, 0, 0, 0)),      # first-layer im2col patches
                pl.BlockSpec((9, C), lambda n: (0, 0)),                     # first-layer conv w (BN folded)
                pl.BlockSpec((1, C), lambda n: (0, 0)),                     # first-layer bias
                pl.BlockSpec((NUM_BLOCKS, C, C), lambda n: (0, 0, 0)),      # conv1x1 weights
                pl.BlockSpec((NUM_BLOCKS, 1, C), lambda n: (0, 0, 0)),      # conv1x1 biases
                pl.BlockSpec((NUM_BLOCKS, 9 * C, C), lambda n: (0, 0, 0)),  # conv3x3 weights (taps stacked on cin)
                pl.BlockSpec((NUM_BLOCKS, 1, C), lambda n: (0, 0, 0)),      # conv3x3 biases
                pl.BlockSpec((C, L), lambda n: (0, 0)),                     # fc weight
                pl.BlockSpec((1, L), lambda n: (0, 0)),                     # fc bias
            ],
            out_specs=pl.BlockSpec((1, B_N, L), lambda n: (n, 0, 0)),
            scratch_shapes=[
                pltpu.VMEM((ROWS, C), jnp.float32),   # block activation a (pad rows zero)
                pltpu.VMEM((ROWS, C), jnp.float32),   # staged relu(bn1(conv1x1)) for 3x3 taps
            ],
        ),
        compiler_params=pltpu.CompilerParams(dimension_semantics=("parallel",)),
    )(mask, patches, params['fl_w'], params['fl_b'], params['w1s'], params['b1s'],
      params['w2c'], params['b2s'], params['fc_w'], params['fc_b'])
    return out.reshape(N, L)


# ---------------------------------------------------------------------------
# Parameter construction (deterministic, synthetic) with eval-mode BN folded in.
# Torch layout mapping (transposes needed to load real torch weights):
#   first conv (Cout,1,3,3)   -> (9, Cout)            [tap = kh*3+kw]
#   conv1x1    (Cout,Cin,1,1) -> (Cin, Cout)
#   conv3x3    (Cout,Cin,3,3) -> (9*Cin, Cout)        [row = tap*Cin + cin]
#   fc         (L, C)         -> (C, L)
# ---------------------------------------------------------------------------
def _make_conv_bn(key, w_shape, eps=1e-5):
    k = jax.random.split(key, 6)
    w = 0.1 * jax.random.normal(k[0], w_shape, jnp.float32)
    conv_bias = 0.1 * jax.random.normal(k[1], (C,), jnp.float32)
    gamma = 1.0 + 0.05 * jax.random.normal(k[2], (C,), jnp.float32)
    beta = 0.05 * jax.random.normal(k[3], (C,), jnp.float32)
    running_mean = 0.05 * jax.random.normal(k[4], (C,), jnp.float32)
    running_var = 0.9 + 0.2 * jax.random.uniform(k[5], (C,), jnp.float32)
    s = gamma / jnp.sqrt(running_var + eps)                  # per-cout scale
    w_f = (w * s).astype(jnp.float32)                        # cout is the last axis of w
    b_f = (beta + (conv_bias - running_mean) * s).reshape(1, C).astype(jnp.float32)
    return w_f, b_f


def init_params(key):
    keys = jax.random.split(key, 9)
    p = {}
    p['fl_w'], p['fl_b'] = _make_conv_bn(keys[0], (9, C))            # [tap, cout]
    w1s, b1s, w2s, b2s = [], [], [], []
    for b in range(NUM_BLOCKS):
        k1, k2 = jax.random.split(keys[1 + b])
        w1, b1 = _make_conv_bn(k1, (C, C))                           # [cin, cout]
        w2, b2 = _make_conv_bn(k2, (9, C, C))                        # [tap, cin, cout]
        w1s.append(w1); b1s.append(b1)
        w2s.append(w2.reshape(9 * C, C)); b2s.append(b2)             # taps stacked along cin
    p['w1s'] = jnp.stack(w1s)                                        # (3, C, C)
    p['b1s'] = jnp.stack(b1s)                                        # (3, 1, C)
    p['w2c'] = jnp.stack(w2s)                                        # (3, 9*C, C)
    p['b2s'] = jnp.stack(b2s)                                        # (3, 1, C)
    p['fc_w'] = 0.1 * jax.random.normal(keys[7], (C, L), jnp.float32)
    p['fc_b'] = (0.1 * jax.random.normal(keys[8], (L,), jnp.float32)).reshape(1, L)
    return p


if __name__ == "__main__":
    key = jax.random.PRNGKey(0)
    k_x, k_p = jax.random.split(key)
    # ErnNet expects single-channel images (conv1: Conv2d(1, 32, ...)); NCHW input.
    x = jax.random.normal(k_x, (2, 1, 16, 16), dtype=jnp.float32)
    params = init_params(k_p)

    logits = jax.jit(ernnet_forward)(x, params)
    logits = jax.block_until_ready(logits)

    assert logits.shape == (2, L), logits.shape
    assert bool(jnp.all(jnp.isfinite(logits)))
    print("KERNEL_OK")
</pallas_src>

<mosaic_0001>
module attributes {stable_mosaic.version = 11 : i64} {
  func.func @_ernnet_kernel(%arg0: i32, %arg1: memref<192x32xf32, #tpu.memory_space<vmem>>, %arg2: memref<1x4x64x9xf32, #tpu.memory_space<vmem>>, %arg3: memref<9x32xf32, #tpu.memory_space<vmem>>, %arg4: memref<1x32xf32, #tpu.memory_space<vmem>>, %arg5: memref<3x32x32xf32, #tpu.memory_space<vmem>>, %arg6: memref<3x1x32xf32, #tpu.memory_space<vmem>>, %arg7: memref<3x288x32xf32, #tpu.memory_space<vmem>>, %arg8: memref<3x1x32xf32, #tpu.memory_space<vmem>>, %arg9: memref<32x6xf32, #tpu.memory_space<vmem>>, %arg10: memref<1x6xf32, #tpu.memory_space<vmem>>, %arg11: memref<1x1x6xf32, #tpu.memory_space<vmem>>, %arg12: memref<192x32xf32, #tpu.memory_space<vmem>>, %arg13: memref<192x32xf32, #tpu.memory_space<vmem>>) attributes {dimension_semantics = [#tpu.dimension_semantics<parallel>], iteration_bounds = array<i64: 2>, scalar_prefetch = 0 : i64, scratch_operands = 2 : i64, tpu.core_type = #tpu.core_type<tc>, window_params = [{pipeline_mode = #tpu.pipeline_mode<synchronous>, transform_indices = @transform_0, window_bounds = array<i64: 192, 32>}, {transform_indices = @transform_1, window_bounds = array<i64: 1, 4, 64, 9>}, {pipeline_mode = #tpu.pipeline_mode<synchronous>, transform_indices = @transform_2, window_bounds = array<i64: 9, 32>}, {pipeline_mode = #tpu.pipeline_mode<synchronous>, transform_indices = @transform_3, window_bounds = array<i64: 1, 32>}, {pipeline_mode = #tpu.pipeline_mode<synchronous>, transform_indices = @transform_4, window_bounds = array<i64: 3, 32, 32>}, {pipeline_mode = #tpu.pipeline_mode<synchronous>, transform_indices = @transform_5, window_bounds = array<i64: 3, 1, 32>}, {pipeline_mode = #tpu.pipeline_mode<synchronous>, transform_indices = @transform_6, window_bounds = array<i64: 3, 288, 32>}, {pipeline_mode = #tpu.pipeline_mode<synchronous>, transform_indices = @transform_7, window_bounds = array<i64: 3, 1, 32>}, {pipeline_mode = #tpu.pipeline_mode<synchronous>, transform_indices = @transform_8, window_bounds = array<i64: 32, 6>}, {pipeline_mode = #tpu.pipeline_mode<synchronous>, transform_indices = @transform_9, window_bounds = array<i64: 1, 6>}, {transform_indices = @transform_10, window_bounds = array<i64: 1, 1, 6>}]} {
    %c0 = arith.constant 0 : index
    %c0_0 = arith.constant 0 : index
    %0 = vector.load %arg1[%c0, %c0_0] : memref<192x32xf32, #tpu.memory_space<vmem>>, vector<192x32xf32>
    %c0_1 = arith.constant 0 : index
    %c0_2 = arith.constant 0 : index
    %c0_3 = arith.constant 0 : index
    %c0_4 = arith.constant 0 : index
    %1 = vector.load %arg2[%c0_1, %c0_2, %c0_3, %c0_4] : memref<1x4x64x9xf32, #tpu.memory_space<vmem>>, vector<1x4x64x9xf32>
    %2 = vector.shape_cast %1 : vector<1x4x64x9xf32> to vector<256x9xf32>
    %c0_5 = arith.constant 0 : index
    %c0_6 = arith.constant 0 : index
    %3 = vector.load %arg3[%c0_5, %c0_6] : memref<9x32xf32, #tpu.memory_space<vmem>>, vector<9x32xf32>
    %cst = arith.constant dense<0.000000e+00> : vector<256x32xf32>
    %4 = tpu.matmul %2, %3, %cst {dimension_numbers = #tpu.dot_dimension_numbers<[1], [0], [0], [1], [0, 0, 1, 1], [], []>} : vector<256x9xf32>, vector<9x32xf32>, vector<256x32xf32> -> vector<256x32xf32>
    %5 = vector.shape_cast %4 : vector<256x32xf32> to vector<1x4x64x32xf32>
    %6 = vector.extract_strided_slice %5 {offsets = [0, 0, 0, 0], sizes = [1, 1, 64, 32], strides = [1, 1, 1, 1]} : vector<1x4x64x32xf32> to vector<1x1x64x32xf32>
    %7 = vector.shape_cast %6 : vector<1x1x64x32xf32> to vector<1x64x32xf32>
    %8 = vector.extract_strided_slice %5 {offsets = [0, 1, 0, 0], sizes = [1, 1, 64, 32], strides = [1, 1, 1, 1]} : vector<1x4x64x32xf32> to vector<1x1x64x32xf32>
    %9 = vector.shape_cast %8 : vector<1x1x64x32xf32> to vector<1x64x32xf32>
    %10 = arith.maximumf %7, %9 : vector<1x64x32xf32>
    %11 = vector.extract_strided_slice %5 {offsets = [0, 2, 0, 0], sizes = [1, 1, 64, 32], strides = [1, 1, 1, 1]} : vector<1x4x64x32xf32> to vector<1x1x64x32xf32>
    %12 = vector.shape_cast %11 : vector<1x1x64x32xf32> to vector<1x64x32xf32>
    %13 = vector.extract_strided_slice %5 {offsets = [0, 3, 0, 0], sizes = [1, 1, 64, 32], strides = [1, 1, 1, 1]} : vector<1x4x64x32xf32> to vector<1x1x64x32xf32>
    %14 = vector.shape_cast %13 : vector<1x1x64x32xf32> to vector<1x64x32xf32>
    %15 = arith.maximumf %12, %14 : vector<1x64x32xf32>
    %16 = arith.maximumf %10, %15 : vector<1x64x32xf32>
    %c0_7 = arith.constant 0 : index
    %c0_8 = arith.constant 0 : index
    %17 = vector.load %arg4[%c0_7, %c0_8] : memref<1x32xf32, #tpu.memory_space<vmem>>, vector<1x32xf32>
    %18 = vector.shape_cast %17 : vector<1x32xf32> to vector<1x1x32xf32>
    %19 = vector.broadcast %18 : vector<1x1x32xf32> to vector<1x64x32xf32>
    %20 = arith.addf %16, %19 : vector<1x64x32xf32>
    %cst_9 = arith.constant 0.000000e+00 : f32
    %21 = vector.broadcast %cst_9 : f32 to vector<1x64x32xf32>
    %22 = arith.maximumf %20, %21 : vector<1x64x32xf32>
    %23 = vector.shape_cast %22 : vector<1x64x32xf32> to vector<1x8x8x32xf32>
    %cst_10 = arith.constant 0.000000e+00 : f32
    %24 = vector.broadcast %cst_10 : f32 to vector<1x8x8x32xf32>
    %cst_11 = arith.constant 0.000000e+00 : f32
    %25 = vector.broadcast %cst_11 : f32 to vector<1x2x16x32xf32>
    %26 = tpu.concatenate %23, %24 in 2 : vector<1x8x8x32xf32>, vector<1x8x8x32xf32> -> vector<1x8x16x32xf32>
    %27 = tpu.concatenate %25, %26, %25 in 1 : vector<1x2x16x32xf32>, vector<1x8x16x32xf32>, vector<1x2x16x32xf32> -> vector<1x12x16x32xf32>
    %28 = vector.shape_cast %27 : vector<1x12x16x32xf32> to vector<192x32xf32>
    %c0_12 = arith.constant 0 : index
    %c0_13 = arith.constant 0 : index
    %29 = vector.load %arg12[%c0_12, %c0_13] : memref<192x32xf32, #tpu.memory_space<vmem>>, vector<192x32xf32>
    tpu.vector_store %arg12[%c0_12, %c0_13], %28 {strides = array<i32>} : memref<192x32xf32, #tpu.memory_space<vmem>>, vector<192x32xf32>,
    %c0_14 = arith.constant 0 : index
    %c0_15 = arith.constant 0 : index
    %30 = vector.load %arg12[%c0_14, %c0_15] : memref<192x32xf32, #tpu.memory_space<vmem>>, vector<192x32xf32>
    %c0_16 = arith.constant 0 : index
    %c0_17 = arith.constant 0 : index
    %c0_18 = arith.constant 0 : index
    %31 = vector.load %arg5[%c0_16, %c0_17, %c0_18] : memref<3x32x32xf32, #tpu.memory_space<vmem>>, vector<1x32x32xf32>
    %32 = vector.shape_cast %31 : vector<1x32x32xf32> to vector<32x32xf32>
    %cst_19 = arith.constant dense<0.000000e+00> : vector<192x32xf32>
    %33 = tpu.matmul %30, %32, %cst_19 {dimension_numbers = #tpu.dot_dimension_numbers<[1], [0], [0], [1], [0, 0, 1, 1], [], []>} : vector<192x32xf32>, vector<32x32xf32>, vector<192x32xf32> -> vector<192x32xf32>
    %c0_20 = arith.constant 0 : index
    %c0_21 = arith.constant 0 : index
    %c0_22 = arith.constant 0 : index
    %34 = vector.load %arg6[%c0_20, %c0_21, %c0_22] : memref<3x1x32xf32, #tpu.memory_space<vmem>>, vector<1x1x32xf32>
    %35 = vector.shape_cast %34 : vector<1x1x32xf32> to vector<1x32xf32>
    %36 = vector.broadcast %35 : vector<1x32xf32> to vector<192x32xf32>
    %37 = arith.addf %33, %36 : vector<192x32xf32>
    %cst_23 = arith.constant 0.000000e+00 : f32
    %38 = vector.broadcast %cst_23 : f32 to vector<192x32xf32>
    %39 = arith.maximumf %37, %38 : vector<192x32xf32>
    %40 = arith.mulf %39, %0 : vector<192x32xf32>
    %c0_24 = arith.constant 0 : index
    %c0_25 = arith.constant 0 : index
    %41 = vector.load %arg13[%c0_24, %c0_25] : memref<192x32xf32, #tpu.memory_space<vmem>>, vector<192x32xf32>
    tpu.vector_store %arg13[%c0_24, %c0_25], %40 {strides = array<i32>} : memref<192x32xf32, #tpu.memory_space<vmem>>, vector<192x32xf32>,
    %c7 = arith.constant 7 : index
    %c0_26 = arith.constant 0 : index
    %42 = vector.load %arg13[%c7, %c0_26] : memref<192x32xf32, #tpu.memory_space<vmem>>, vector<144x32xf32>
    %c8 = arith.constant 8 : index
    %c0_27 = arith.constant 0 : index
    %43 = vector.load %arg13[%c8, %c0_27] : memref<192x32xf32, #tpu.memory_space<vmem>>, vector<144x32xf32>
    %c9 = arith.constant 9 : index
    %c0_28 = arith.constant 0 : index
    %44 = vector.load %arg13[%c9, %c0_28] : memref<192x32xf32, #tpu.memory_space<vmem>>, vector<144x32xf32>
    %c23 = arith.constant 23 : index
    %c0_29 = arith.constant 0 : index
    %45 = vector.load %arg13[%c23, %c0_29] : memref<192x32xf32, #tpu.memory_space<vmem>>, vector<144x32xf32>
    %c24 = arith.constant 24 : index
    %c0_30 = arith.constant 0 : index
    %46 = vector.load %arg13[%c24, %c0_30] : memref<192x32xf32, #tpu.memory_space<vmem>>, vector<144x32xf32>
    %c25 = arith.constant 25 : index
    %c0_31 = arith.constant 0 : index
    %47 = vector.load %arg13[%c25, %c0_31] : memref<192x32xf32, #tpu.memory_space<vmem>>, vector<144x32xf32>
    %c39 = arith.constant 39 : index
    %c0_32 = arith.constant 0 : index
    %48 = vector.load %arg13[%c39, %c0_32] : memref<192x32xf32, #tpu.memory_space<vmem>>, vector<144x32xf32>
    %c40 = arith.constant 40 : index
    %c0_33 = arith.constant 0 : index
    %49 = vector.load %arg13[%c40, %c0_33] : memref<192x32xf32, #tpu.memory_space<vmem>>, vector<144x32xf32>
    %c41 = arith.constant 41 : index
    %c0_34 = arith.constant 0 : index
    %50 = vector.load %arg13[%c41, %c0_34] : memref<192x32xf32, #tpu.memory_space<vmem>>, vector<144x32xf32>
    %51 = tpu.concatenate %42, %43, %44, %45, %46, %47, %48, %49, %50 in 1 : vector<144x32xf32>, vector<144x32xf32>, vector<144x32xf32>, vector<144x32xf32>, vector<144x32xf32>, vector<144x32xf32>, vector<144x32xf32>, vector<144x32xf32>, vector<144x32xf32> -> vector<144x288xf32>
    %c0_35 = arith.constant 0 : index
    %c0_36 = arith.constant 0 : index
    %c0_37 = arith.constant 0 : index
    %52 = vector.load %arg7[%c0_35, %c0_36, %c0_37] : memref<3x288x32xf32, #tpu.memory_space<vmem>>, vector<1x288x32xf32>
    %53 = vector.shape_cast %52 : vector<1x288x32xf32> to vector<288x32xf32>
    %cst_38 = arith.constant dense<0.000000e+00> : vector<144x32xf32>
    %54 = tpu.matmul %51, %53, %cst_38 {dimension_numbers = #tpu.dot_dimension_numbers<[1], [0], [0], [1], [0, 0, 1, 1], [], []>} : vector<144x288xf32>, vector<288x32xf32>, vector<144x32xf32> -> vector<144x32xf32>
    %c0_39 = arith.constant 0 : index
    %c0_40 = arith.constant 0 : index
    %c0_41 = arith.constant 0 : index
    %55 = vector.load %arg8[%c0_39, %c0_40, %c0_41] : memref<3x1x32xf32, #tpu.memory_space<vmem>>, vector<1x1x32xf32>
    %56 = vector.shape_cast %55 : vector<1x1x32xf32> to vector<1x32xf32>
    %57 = vector.broadcast %56 : vector<1x32xf32> to vector<144x32xf32>
    %58 = arith.addf %54, %57 : vector<144x32xf32>
    %cst_42 = arith.constant 0.000000e+00 : f32
    %59 = vector.broadcast %cst_42 : f32 to vector<144x32xf32>
    %60 = arith.maximumf %58, %59 : vector<144x32xf32>
    %61 = vector.extract_strided_slice %30 {offsets = [24, 0], sizes = [144, 32], strides = [1, 1]} : vector<192x32xf32> to vector<144x32xf32>
    %62 = vector.extract_strided_slice %0 {offsets = [24, 0], sizes = [144, 32], strides = [1, 1]} : vector<192x32xf32> to vector<144x32xf32>
    %63 = arith.mulf %60, %62 : vector<144x32xf32>
    %64 = arith.addf %61, %63 : vector<144x32xf32>
    %c24_43 = arith.constant 24 : index
    %c0_44 = arith.constant 0 : index
    %65 = vector.load %arg12[%c24_43, %c0_44] : memref<192x32xf32, #tpu.memory_space<vmem>>, vector<144x32xf32>
    tpu.vector_store %arg12[%c24_43, %c0_44], %64 {strides = array<i32>} : memref<192x32xf32, #tpu.memory_space<vmem>>, vector<144x32xf32>,
    %c0_45 = arith.constant 0 : index
    %c0_46 = arith.constant 0 : index
    %66 = vector.load %arg12[%c0_45, %c0_46] : memref<192x32xf32, #tpu.memory_space<vmem>>, vector<192x32xf32>
    %c1 = arith.constant 1 : index
    %c0_47 = arith.constant 0 : index
    %c0_48 = arith.constant 0 : index
    %67 = vector.load %arg5[%c1, %c0_47, %c0_48] : memref<3x32x32xf32, #tpu.memory_space<vmem>>, vector<1x32x32xf32>
    %68 = vector.shape_cast %67 : vector<1x32x32xf32> to vector<32x32xf32>
    %cst_49 = arith.constant dense<0.000000e+00> : vector<192x32xf32>
    %69 = tpu.matmul %66, %68, %cst_49 {dimension_numbers = #tpu.dot_dimension_numbers<[1], [0], [0], [1], [0, 0, 1, 1], [], []>} : vector<192x32xf32>, vector<32x32xf32>, vector<192x32xf32> -> vector<192x32xf32>
    %c1_50 = arith.constant 1 : index
    %c0_51 = arith.constant 0 : index
    %c0_52 = arith.constant 0 : index
    %70 = vector.load %arg6[%c1_50, %c0_51, %c0_52] : memref<3x1x32xf32, #tpu.memory_space<vmem>>, vector<1x1x32xf32>
    %71 = vector.shape_cast %70 : vector<1x1x32xf32> to vector<1x32xf32>
    %72 = vector.broadcast %71 : vector<1x32xf32> to vector<192x32xf32>
    %73 = arith.addf %69, %72 : vector<192x32xf32>
    %cst_53 = arith.constant 0.000000e+00 : f32
    %74 = vector.broadcast %cst_53 : f32 to vector<192x32xf32>
    %75 = arith.maximumf %73, %74 : vector<192x32xf32>
    %76 = arith.mulf %75, %0 : vector<192x32xf32>
    %c0_54 = arith.constant 0 : index
    %c0_55 = arith.constant 0 : index
    %77 = vector.load %arg13[%c0_54, %c0_55] : memref<192x32xf32, #tpu.memory_space<vmem>>, vector<192x32xf32>
    tpu.vector_store %arg13[%c0_54, %c0_55], %76 {strides = array<i32>} : memref<192x32xf32, #tpu.memory_space<vmem>>, vector<192x32xf32>,
    %c7_56 = arith.constant 7 : index
    %c0_57 = arith.constant 0 : index
    %78 = vector.load %arg13[%c7_56, %c0_57] : memref<192x32xf32, #tpu.memory_space<vmem>>, vector<144x32xf32>
    %c8_58 = arith.constant 8 : index
    %c0_59 = arith.constant 0 : index
    %79 = vector.load %arg13[%c8_58, %c0_59] : memref<192x32xf32, #tpu.memory_space<vmem>>, vector<144x32xf32>
    %c9_60 = arith.constant 9 : index
    %c0_61 = arith.constant 0 : index
    %80 = vector.load %arg13[%c9_60, %c0_61] : memref<192x32xf32, #tpu.memory_space<vmem>>, vector<144x32xf32>
    %c23_62 = arith.constant 23 : index
    %c0_63 = arith.constant 0 : index
    %81 = vector.load %arg13[%c23_62, %c0_63] : memref<192x32xf32, #tpu.memory_space<vmem>>, vector<144x32xf32>
    %c24_64 = arith.constant 24 : index
    %c0_65 = arith.constant 0 : index
    %82 = vector.load %arg13[%c24_64, %c0_65] : memref<192x32xf32, #tpu.memory_space<vmem>>, vector<144x32xf32>
    %c25_66 = arith.constant 25 : index
    %c0_67 = arith.constant 0 : index
    %83 = vector.load %arg13[%c25_66, %c0_67] : memref<192x32xf32, #tpu.memory_space<vmem>>, vector<144x32xf32>
    %c39_68 = arith.constant 39 : index
    %c0_69 = arith.constant 0 : index
    %84 = vector.load %arg13[%c39_68, %c0_69] : memref<192x32xf32, #tpu.memory_space<vmem>>, vector<144x32xf32>
    %c40_70 = arith.constant 40 : index
    %c0_71 = arith.constant 0 : index
    %85 = vector.load %arg13[%c40_70, %c0_71] : memref<192x32xf32, #tpu.memory_space<vmem>>, vector<144x32xf32>
    %c41_72 = arith.constant 41 : index
    %c0_73 = arith.constant 0 : index
    %86 = vector.load %arg13[%c41_72, %c0_73] : memref<192x32xf32, #tpu.memory_space<vmem>>, vector<144x32xf32>
    %87 = tpu.concatenate %78, %79, %80, %81, %82, %83, %84, %85, %86 in 1 : vector<144x32xf32>, vector<144x32xf32>, vector<144x32xf32>, vector<144x32xf32>, vector<144x32xf32>, vector<144x32xf32>, vector<144x32xf32>, vector<144x32xf32>, vector<144x32xf32> -> vector<144x288xf32>
    %c1_74 = arith.constant 1 : index
    %c0_75 = arith.constant 0 : index
    %c0_76 = arith.constant 0 : index
    %88 = vector.load %arg7[%c1_74, %c0_75, %c0_76] : memref<3x288x32xf32, #tpu.memory_space<vmem>>, vector<1x288x32xf32>
    %89 = vector.shape_cast %88 : vector<1x288x32xf32> to vector<288x32xf32>
    %cst_77 = arith.constant dense<0.000000e+00> : vector<144x32xf32>
    %90 = tpu.matmul %87, %89, %cst_77 {dimension_numbers = #tpu.dot_dimension_numbers<[1], [0], [0], [1], [0, 0, 1, 1], [], []>} : vector<144x288xf32>, vector<288x32xf32>, vector<144x32xf32> -> vector<144x32xf32>
    %c1_78 = arith.constant 1 : index
    %c0_79 = arith.constant 0 : index
    %c0_80 = arith.constant 0 : index
    %91 = vector.load %arg8[%c1_78, %c0_79, %c0_80] : memref<3x1x32xf32, #tpu.memory_space<vmem>>, vector<1x1x32xf32>
    %92 = vector.shape_cast %91 : vector<1x1x32xf32> to vector<1x32xf32>
    %93 = vector.broadcast %92 : vector<1x32xf32> to vector<144x32xf32>
    %94 = arith.addf %90, %93 : vector<144x32xf32>
    %cst_81 = arith.constant 0.000000e+00 : f32
    %95 = vector.broadcast %cst_81 : f32 to vector<144x32xf32>
    %96 = arith.maximumf %94, %95 : vector<144x32xf32>
    %97 = vector.extract_strided_slice %66 {offsets = [24, 0], sizes = [144, 32], strides = [1, 1]} : vector<192x32xf32> to vector<144x32xf32>
    %98 = vector.extract_strided_slice %0 {offsets = [24, 0], sizes = [144, 32], strides = [1, 1]} : vector<192x32xf32> to vector<144x32xf32>
    %99 = arith.mulf %96, %98 : vector<144x32xf32>
    %100 = arith.addf %97, %99 : vector<144x32xf32>
    %c24_82 = arith.constant 24 : index
    %c0_83 = arith.constant 0 : index
    %101 = vector.load %arg12[%c24_82, %c0_83] : memref<192x32xf32, #tpu.memory_space<vmem>>, vector<144x32xf32>
    tpu.vector_store %arg12[%c24_82, %c0_83], %100 {strides = array<i32>} : memref<192x32xf32, #tpu.memory_space<vmem>>, vector<144x32xf32>,
    %c0_84 = arith.constant 0 : index
    %c0_85 = arith.constant 0 : index
    %102 = vector.load %arg12[%c0_84, %c0_85] : memref<192x32xf32, #tpu.memory_space<vmem>>, vector<192x32xf32>
    %c2 = arith.constant 2 : index
    %c0_86 = arith.constant 0 : index
    %c0_87 = arith.constant 0 : index
    %103 = vector.load %arg5[%c2, %c0_86, %c0_87] : memref<3x32x32xf32, #tpu.memory_space<vmem>>, vector<1x32x32xf32>
    %104 = vector.shape_cast %103 : vector<1x32x32xf32> to vector<32x32xf32>
    %cst_88 = arith.constant dense<0.000000e+00> : vector<192x32xf32>
    %105 = tpu.matmul %102, %104, %cst_88 {dimension_numbers = #tpu.dot_dimension_numbers<[1], [0], [0], [1], [0, 0, 1, 1], [], []>} : vector<192x32xf32>, vector<32x32xf32>, vector<192x32xf32> -> vector<192x32xf32>
    %c2_89 = arith.constant 2 : index
    %c0_90 = arith.constant 0 : index
    %c0_91 = arith.constant 0 : index
    %106 = vector.load %arg6[%c2_89, %c0_90, %c0_91] : memref<3x1x32xf32, #tpu.memory_space<vmem>>, vector<1x1x32xf32>
    %107 = vector.shape_cast %106 : vector<1x1x32xf32> to vector<1x32xf32>
    %108 = vector.broadcast %107 : vector<1x32xf32> to vector<192x32xf32>
    %109 = arith.addf %105, %108 : vector<192x32xf32>
    %cst_92 = arith.constant 0.000000e+00 : f32
    %110 = vector.broadcast %cst_92 : f32 to vector<192x32xf32>
    %111 = arith.maximumf %109, %110 : vector<192x32xf32>
    %112 = arith.mulf %111, %0 : vector<192x32xf32>
    %c0_93 = arith.constant 0 : index
    %c0_94 = arith.constant 0 : index
    %113 = vector.load %arg13[%c0_93, %c0_94] : memref<192x32xf32, #tpu.memory_space<vmem>>, vector<192x32xf32>
    tpu.vector_store %arg13[%c0_93, %c0_94], %112 {strides = array<i32>} : memref<192x32xf32, #tpu.memory_space<vmem>>, vector<192x32xf32>,
    %c7_95 = arith.constant 7 : index
    %c0_96 = arith.constant 0 : index
    %114 = vector.load %arg13[%c7_95, %c0_96] : memref<192x32xf32, #tpu.memory_space<vmem>>, vector<144x32xf32>
    %c8_97 = arith.constant 8 : index
    %c0_98 = arith.constant 0 : index
    %115 = vector.load %arg13[%c8_97, %c0_98] : memref<192x32xf32, #tpu.memory_space<vmem>>, vector<144x32xf32>
    %c9_99 = arith.constant 9 : index
    %c0_100 = arith.constant 0 : index
    %116 = vector.load %arg13[%c9_99, %c0_100] : memref<192x32xf32, #tpu.memory_space<vmem>>, vector<144x32xf32>
    %c23_101 = arith.constant 23 : index
    %c0_102 = arith.constant 0 : index
    %117 = vector.load %arg13[%c23_101, %c0_102] : memref<192x32xf32, #tpu.memory_space<vmem>>, vector<144x32xf32>
    %c24_103 = arith.constant 24 : index
    %c0_104 = arith.constant 0 : index
    %118 = vector.load %arg13[%c24_103, %c0_104] : memref<192x32xf32, #tpu.memory_space<vmem>>, vector<144x32xf32>
    %c25_105 = arith.constant 25 : index
    %c0_106 = arith.constant 0 : index
    %119 = vector.load %arg13[%c25_105, %c0_106] : memref<192x32xf32, #tpu.memory_space<vmem>>, vector<144x32xf32>
    %c39_107 = arith.constant 39 : index
    %c0_108 = arith.constant 0 : index
    %120 = vector.load %arg13[%c39_107, %c0_108] : memref<192x32xf32, #tpu.memory_space<vmem>>, vector<144x32xf32>
    %c40_109 = arith.constant 40 : index
    %c0_110 = arith.constant 0 : index
    %121 = vector.load %arg13[%c40_109, %c0_110] : memref<192x32xf32, #tpu.memory_space<vmem>>, vector<144x32xf32>
    %c41_111 = arith.constant 41 : index
    %c0_112 = arith.constant 0 : index
    %122 = vector.load %arg13[%c41_111, %c0_112] : memref<192x32xf32, #tpu.memory_space<vmem>>, vector<144x32xf32>
    %123 = tpu.concatenate %114, %115, %116, %117, %118, %119, %120, %121, %122 in 1 : vector<144x32xf32>, vector<144x32xf32>, vector<144x32xf32>, vector<144x32xf32>, vector<144x32xf32>, vector<144x32xf32>, vector<144x32xf32>, vector<144x32xf32>, vector<144x32xf32> -> vector<144x288xf32>
    %c2_113 = arith.constant 2 : index
    %c0_114 = arith.constant 0 : index
    %c0_115 = arith.constant 0 : index
    %124 = vector.load %arg7[%c2_113, %c0_114, %c0_115] : memref<3x288x32xf32, #tpu.memory_space<vmem>>, vector<1x288x32xf32>
    %125 = vector.shape_cast %124 : vector<1x288x32xf32> to vector<288x32xf32>
    %cst_116 = arith.constant dense<0.000000e+00> : vector<144x32xf32>
    %126 = tpu.matmul %123, %125, %cst_116 {dimension_numbers = #tpu.dot_dimension_numbers<[1], [0], [0], [1], [0, 0, 1, 1], [], []>} : vector<144x288xf32>, vector<288x32xf32>, vector<144x32xf32> -> vector<144x32xf32>
    %c2_117 = arith.constant 2 : index
    %c0_118 = arith.constant 0 : index
    %c0_119 = arith.constant 0 : index
    %127 = vector.load %arg8[%c2_117, %c0_118, %c0_119] : memref<3x1x32xf32, #tpu.memory_space<vmem>>, vector<1x1x32xf32>
    %128 = vector.shape_cast %127 : vector<1x1x32xf32> to vector<1x32xf32>
    %129 = vector.broadcast %128 : vector<1x32xf32> to vector<144x32xf32>
    %130 = arith.addf %126, %129 : vector<144x32xf32>
    %cst_120 = arith.constant 0.000000e+00 : f32
    %131 = vector.broadcast %cst_120 : f32 to vector<144x32xf32>
    %132 = arith.maximumf %130, %131 : vector<144x32xf32>
    %133 = vector.extract_strided_slice %102 {offsets = [24, 0], sizes = [144, 32], strides = [1, 1]} : vector<192x32xf32> to vector<144x32xf32>
    %134 = vector.extract_strided_slice %0 {offsets = [24, 0], sizes = [144, 32], strides = [1, 1]} : vector<192x32xf32> to vector<144x32xf32>
    %135 = arith.mulf %132, %134 : vector<144x32xf32>
    %136 = arith.addf %133, %135 : vector<144x32xf32>
    %c24_121 = arith.constant 24 : index
    %c0_122 = arith.constant 0 : index
    %137 = vector.load %arg12[%c24_121, %c0_122] : memref<192x32xf32, #tpu.memory_space<vmem>>, vector<144x32xf32>
    tpu.vector_store %arg12[%c24_121, %c0_122], %136 {strides = array<i32>} : memref<192x32xf32, #tpu.memory_space<vmem>>, vector<144x32xf32>,
    %c0_123 = arith.constant 0 : index
    %c0_124 = arith.constant 0 : index
    %138 = vector.load %arg12[%c0_123, %c0_124] : memref<192x32xf32, #tpu.memory_space<vmem>>, vector<192x32xf32>
    %c0_125 = arith.constant 0 : index
    %c0_126 = arith.constant 0 : index
    %139 = vector.load %arg9[%c0_125, %c0_126] : memref<32x6xf32, #tpu.memory_space<vmem>>, vector<32x6xf32>
    %cst_127 = arith.constant dense<0.000000e+00> : vector<192x6xf32>
    %140 = tpu.matmul %138, %139, %cst_127 {dimension_numbers = #tpu.dot_dimension_numbers<[1], [0], [0], [1], [0, 0, 1, 1], [], []>} : vector<192x32xf32>, vector<32x6xf32>, vector<192x6xf32> -> vector<192x6xf32>
    %141 = vector.shape_cast %140 : vector<192x6xf32> to vector<1x192x6xf32>
    %cst_128 = arith.constant dense<0.000000e+00> : vector<1x6xf32>
    %142 = vector.multi_reduction <add>, %141, %cst_128 [1] : vector<1x192x6xf32> to vector<1x6xf32>
    %cst_129 = arith.constant 1.562500e-02 : f32
    %143 = vector.broadcast %cst_129 : f32 to vector<1x6xf32>
    %144 = arith.mulf %142, %143 : vector<1x6xf32>
    %c0_130 = arith.constant 0 : index
    %c0_131 = arith.constant 0 : index
    %145 = vector.load %arg10[%c0_130, %c0_131] : memref<1x6xf32, #tpu.memory_space<vmem>>, vector<1x6xf32>
    %146 = arith.addf %144, %145 : vector<1x6xf32>
    %c0_132 = arith.constant 0 : index
    %c0_133 = arith.constant 0 : index
    %c0_134 = arith.constant 0 : index
    %147 = vector.load %arg11[%c0_132, %c0_133, %c0_134] : memref<1x1x6xf32, #tpu.memory_space<vmem>>, vector<1x1x6xf32>
    %148 = vector.shape_cast %147 : vector<1x1x6xf32> to vector<1x6xf32>
    %149 = vector.shape_cast %146 : vector<1x6xf32> to vector<1x1x6xf32>
    tpu.vector_store %arg11[%c0_132, %c0_133, %c0_134], %149 {strides = array<i32>} : memref<1x1x6xf32, #tpu.memory_space<vmem>>, vector<1x1x6xf32>,
    return
  }
  func.func @transform_0(%arg0: i32) -> (i32, i32) {
    %c0_i32 = arith.constant 0 : i32
    %c0_i32_0 = arith.constant 0 : i32
    %c0_i32_1 = arith.constant 0 : i32
    return %c0_i32, %c0_i32_0 : i32, i32
  }
  func.func @transform_1(%arg0: i32) -> (i32, i32, i32, i32) {
    %c0_i32 = arith.constant 0 : i32
    %c0_i32_0 = arith.constant 0 : i32
    %c0_i32_1 = arith.constant 0 : i32
    %c0_i32_2 = arith.constant 0 : i32
    return %arg0, %c0_i32, %c0_i32_0, %c0_i32_1 : i32, i32, i32, i32
  }
  func.func @transform_2(%arg0: i32) -> (i32, i32) {
    %c0_i32 = arith.constant 0 : i32
    %c0_i32_0 = arith.constant 0 : i32
    %c0_i32_1 = arith.constant 0 : i32
    return %c0_i32, %c0_i32_0 : i32, i32
  }
  func.func @transform_3(%arg0: i32) -> (i32, i32) {
    %c0_i32 = arith.constant 0 : i32
    %c0_i32_0 = arith.constant 0 : i32
    %c0_i32_1 = arith.constant 0 : i32
    return %c0_i32, %c0_i32_0 : i32, i32
  }
  func.func @transform_4(%arg0: i32) -> (i32, i32, i32) {
    %c0_i32 = arith.constant 0 : i32
    %c0_i32_0 = arith.constant 0 : i32
    %c0_i32_1 = arith.constant 0 : i32
    %c0_i32_2 = arith.constant 0 : i32
    return %c0_i32, %c0_i32_0, %c0_i32_1 : i32, i32, i32
  }
  func.func @transform_5(%arg0: i32) -> (i32, i32, i32) {
    %c0_i32 = arith.constant 0 : i32
    %c0_i32_0 = arith.constant 0 : i32
    %c0_i32_1 = arith.constant 0 : i32
    %c0_i32_2 = arith.constant 0 : i32
    return %c0_i32, %c0_i32_0, %c0_i32_1 : i32, i32, i32
  }
  func.func @transform_6(%arg0: i32) -> (i32, i32, i32) {
    %c0_i32 = arith.constant 0 : i32
    %c0_i32_0 = arith.constant 0 : i32
    %c0_i32_1 = arith.constant 0 : i32
    %c0_i32_2 = arith.constant 0 : i32
    return %c0_i32, %c0_i32_0, %c0_i32_1 : i32, i32, i32
  }
  func.func @transform_7(%arg0: i32) -> (i32, i32, i32) {
    %c0_i32 = arith.constant 0 : i32
    %c0_i32_0 = arith.constant 0 : i32
    %c0_i32_1 = arith.constant 0 : i32
    %c0_i32_2 = arith.constant 0 : i32
    return %c0_i32, %c0_i32_0, %c0_i32_1 : i32, i32, i32
  }
  func.func @transform_8(%arg0: i32) -> (i32, i32) {
    %c0_i32 = arith.constant 0 : i32
    %c0_i32_0 = arith.constant 0 : i32
    %c0_i32_1 = arith.constant 0 : i32
    return %c0_i32, %c0_i32_0 : i32, i32
  }
  func.func @transform_9(%arg0: i32) -> (i32, i32) {
    %c0_i32 = arith.constant 0 : i32
    %c0_i32_0 = arith.constant 0 : i32
    %c0_i32_1 = arith.constant 0 : i32
    return %c0_i32, %c0_i32_0 : i32, i32
  }
  func.func @transform_10(%arg0: i32) -> (i32, i32, i32) {
    %c0_i32 = arith.constant 0 : i32
    %c0_i32_0 = arith.constant 0 : i32
    %c0_i32_1 = arith.constant 0 : i32
    return %arg0, %c0_i32, %c0_i32_0 : i32, i32, i32
  }
}

</mosaic_0001>

<bundles_post_ra>
// kernel: ernnet_forward.1
= control target key start
LH: loop header
LB: loop body
LE: loop exit
PB: predicated region body
PF: predicated region fallthrough
CT: control target
= control target key end

     0   :  { %s10079_s0 = inlined_call_operand.vmem [shape: f32[192,32], index: 0, kind: input, shape index: {}]   ;;  %s10080_s1 = inlined_call_operand.vmem [shape: f32[2,4,64,9], index: 1, kind: input, shape index: {}]   ;;  %s10081_s2 = inlined_call_operand.vmem [shape: f32[9,32], index: 2, kind: input, shape index: {}]   ;;  %s10082_s3 = inlined_call_operand.vmem [shape: f32[1,32], index: 3, kind: input, shape index: {}]   ;;  %s10083_s4 = inlined_call_operand.vmem [shape: f32[3,32,32], index: 4, kind: input, shape index: {}]   ;;  %s10084_s5 = inlined_call_operand.vmem [shape: f32[3,1,32], index: 5, kind: input, shape index: {}]   ;;  %s10085_s6 = inlined_call_operand.vmem [shape: f32[3,288,32], index: 6, kind: input, shape index: {}]   ;;  %s10086_s7 = inlined_call_operand.vmem [shape: f32[3,1,32], index: 7, kind: input, shape index: {}]   ;;  %s10087_s8 = inlined_call_operand.vmem [shape: f32[32,6], index: 8, kind: input, shape index: {}]   ;;  %s10088_s9 = inlined_call_operand.vmem [shape: f32[1,6], index: 9, kind: input, shape index: {}]   ;;  %s10089_s10 = inlined_call_operand.hbm [shape: f32[2,1,6], index: 10, kind: output, shape index: {}]  }
   0x1   :  { %10090 = sst [smem:[#allocation7_spill]] %s10079_s0 }
   0x2   :  { %15 = vsyncpa [#allocation5], 0 }
   0x3   :  { %17 = vsyncpa [#allocation5 + $0x1], 0  ;;  %s7332_s13 = smov 0   ;;  %s7334_s14 = smov 0  }
   0x4   :  { %s7336_s15 = smov 0   ;;  %s7338_s16 = smov 0  }
   0x5 LB: > { %s7353_s17 = sadd.s32 4294967295, %s7270_s16   ;;  %s5396_s18 = sadd.s32 4294967294, %s7270_s16   ;;  %s7270_s16 = sphi %s7338_s16, %s10097_s16   ;;  %s7266_s15 = sphi %s7336_s15, %s10096_s15   ;;  %s7262_s14 = sphi %s7334_s14, %s10095_s14   ;;  %s7258_s13 = sphi %s7332_s13, %s10094_s13  }
   0x6   : > { %s7357_s19 = sadd.s32 1, %s7270_s16   ;;  %s245_s20 = sadd.s32 1, %s7266_s15 }
   0x7   : > { %s242_s21 = ssub.s32 %s7270_s16, %s7357_s19  ;;  %p255_p0 = scmp.ne.s32.totalorder %s7266_s15, %s7262_s14 }
   0x8   : > { %p243_p1 = scmp.eq.s32.totalorder %s242_s21, 0  ;;  %p256_p2 = scmp.eq.s32.totalorder %s7353_s17, 1 }
   0x9   : > { %p261_p3 = scmp.ne.s32.totalorder %s7262_s14, %s7258_s13  ;;  %p262_p4 = scmp.eq.s32.totalorder %s5396_s18, 1 }
   0xa   : > { %s7368_s22 = scalar_select %p243_p1, %s7266_s15, %s245_s20  }
   0xb   : > { %p7370_p5 = por %p256_p2, %p255_p0  ;;  %p7374_p6 = por %p262_p4, %p261_p3 }
   0xc   : > { %p5399_p7 = scmp.ge.s32.totalorder %s7270_s16, 1  ;;  %p315_p8 = scmp.lt.s32.totalorder %s7270_s16, 3 }
   0xe   : > { %p316_p9 = pnand %p5399_p7, %p315_p8 }
   0xf   : > { %p352_p10 = scmp.lt.s32.totalorder (!%p316_p9), %s7353_s17, 1  ;;  %s10093_s0 = sld [smem:[#allocation7_spill]] (!%p316_p9) }
  0x10   : > { %319 = sbr.rel (%p316_p9) target bundleno = 2330 (0x91a), region = 60  ;;  %s7273_s12 = smov (!%p316_p9), 96  }
  0x11   : > { %s7274_s21 = smov (!%p316_p9), 32   ;;  %s5676_s25 = sshll.u32 (!%p316_p9), %s7353_s17, 4 }
  0x12   : > { %s5339_s11 = scalar_lea.hbm (!%p316_p9), %s10089_s10, %s5676_s25 }
  0x15   : > { %v414_v0 = vld [vmem:[%s10081_s2 + $0x8] sm:$0x1]  ;;  %vm512_vm0 = vcmask 1040384   ;;  %v413_v1 = vld [vmem:[%s10081_s2] sm:$0xff]  ;;  %s353_s29 = scalar_select %p352_p10, %s7353_s17, 1  ;;  %vm415_vm1 = vcmask 72704  }
  0x16   : > { %5892 = vmatprep.subr.msk.mxu0 %vm512_vm0, %v414_v0  ;;  %vm788_vm2 = vcmask 261120   ;;  %v840_v34 = vld [vmem:[%s10083_s4 + $0x18] sm:$0xff]  ;;  %v7272_v35 = vmov 0.0   ;;  %v839_v36 = vld [vmem:[%s10083_s4 + $0x10] sm:$0xff]  ;;  %v838_v37 = vld [vmem:[%s10083_s4 + $0x8] sm:$0xff]  ;;  %vm1647_vm3 = vcmask 523264  }
  0x17   : > { %5893 = vmatpush3.msk.msra.mxu0 %vm512_vm0, %v414_v0  ;;  %s5679_s30 = sshll.u32 %s353_s29, 8  ;;  %789 = vst.msk [vmem:[#allocation2] sm:$0xff] %vm788_vm2, %v7272_v35  ;;  %790 = vst.msk [vmem:[#allocation2 + $0x8] sm:$0xff] %vm788_vm2, %v7272_v35  ;;  %5944 = vmatprep.subr.mxu1 %v840_v34  ;;  %v837_v38 = vld [vmem:[%s10083_s4] sm:$0xff]  ;;  %s7275_s29 = smov 64   ;;  %vm1666_vm4 = vcmask 785408  }
  0x18   : > { %5894 = vmatprep.subr.mxu0 %v413_v1  ;;  %s7391_s18 = scalar_lea.vmem %s10080_s1, %s5679_s30  ;;  %791 = vst.msk [vmem:[#allocation2 + $0x10] sm:$0xff] %vm788_vm2, %v7272_v35  ;;  %792 = vst.msk [vmem:[#allocation2 + $0x18] sm:$0xff] %vm788_vm2, %v7272_v35  ;;  %5945 = vmatpush3.msra.mxu1 %v840_v34  ;;  %vm5269_vm5 = vcmask 48128   ;;  %vm5326_vm6 = vcmask 40960  }
  0x19   : > { %5895 = vmatpush3.msra.mxu0 %v413_v1  ;;  %v381_v2 = vld [vmem:[%s7391_s18] sm:$0xff]  ;;  %v382_v3 = vld [vmem:[%s7391_s18 + $0x8] sm:$0xff]  ;;  %v383_v4 = vld [vmem:[%s7391_s18 + $0x10] sm:$0xff]  ;;  %794 = vst.msk [vmem:[#allocation2 + $0x28] sm:$0xff] %vm788_vm2, %v7272_v35  ;;  %5946 = vmatprep.subr.mxu1 %v839_v36 }
  0x1a   : > { %5896 = vmatprep.mubr.msk.f32.mxu0 %vm415_vm1, %v381_v2  ;;  %v384_v5 = vld [vmem:[%s7391_s18 + $0x18] sm:$0xff]  ;;  %v385_v6 = vld [vmem:[%s7391_s18 + $0x20] sm:$0xff]  ;;  %v386_v7 = vld [vmem:[%s7391_s18 + $0x28] sm:$0xff]  ;;  %796 = vst.msk [vmem:[#allocation2 + $0x38] sm:$0xff] %vm788_vm2, %v7272_v35  ;;  %1820 = vmatprep.subr.mxu0 %v7272_v35 }
  0x1b   : > { %5897 = vmatmul.mubr.msk.f32.vlgmr.msra.gmra.mxu0 %vm415_vm1, %v382_v3  ;;  %v387_v8 = vld [vmem:[%s7391_s18 + $0x30] sm:$0xff]  ;;  %v388_v9 = vld [vmem:[%s7391_s18 + $0x38] sm:$0xff]  ;;  %v389_v10 = vld [vmem:[%s7391_s18 + $0x40] sm:$0xff]  ;;  %798 = vst.msk [vmem:[#allocation2 + $0x48] sm:$0xff] %vm788_vm2, %v7272_v35  ;;  %5947 = vmatpush3.msra.mxu1 %v839_v36 }
  0x1c   : > { %5899 = vmatprep.mubr.msk.f32.mxu0 %vm415_vm1, %v383_v4  ;;  %v390_v11 = vld [vmem:[%s7391_s18 + $0x48] sm:$0xff]  ;;  %v391_v12 = vld [vmem:[%s7391_s18 + $0x50] sm:$0xff]  ;;  %v392_v13 = vld [vmem:[%s7391_s18 + $0x58] sm:$0xff]  ;;  %800 = vst.msk [vmem:[#allocation2 + $0x58] sm:$0xff] %vm788_vm2, %v7272_v35  ;;  %5948 = vmatprep.subr.mxu1 %v838_v37 }
  0x1d   : > { %v393_v14 = vld [vmem:[%s7391_s18 + $0x60] sm:$0xff]  ;;  %v394_v15 = vld [vmem:[%s7391_s18 + $0x68] sm:$0xff]  ;;  %v395_v16 = vld [vmem:[%s7391_s18 + $0x70] sm:$0xff]  ;;  %802 = vst.msk [vmem:[#allocation2 + $0x68] sm:$0xff] %vm788_vm2, %v7272_v35  ;;  %5949 = vmatpush3.msra.mxu1 %v838_v37 }
  0x1e   : > { %v396_v17 = vld [vmem:[%s7391_s18 + $0x78] sm:$0xff]  ;;  %v397_v18 = vld [vmem:[%s7391_s18 + $0x80] sm:$0xff]  ;;  %v398_v19 = vld [vmem:[%s7391_s18 + $0x88] sm:$0xff]  ;;  %804 = vst.msk [vmem:[#allocation2 + $0x78] sm:$0xff] %vm788_vm2, %v7272_v35  ;;  %5950 = vmatprep.subr.mxu1 %v837_v38 }
  0x1f   : > { %5900 = vmatmul.mubr.msk.f32.gmra.mxu0 %vm415_vm1, %v384_v5  ;;  %v399_v20 = vld [vmem:[%s7391_s18 + $0x90] sm:$0xff]  ;;  %v400_v21 = vld [vmem:[%s7391_s18 + $0x98] sm:$0xff]  ;;  %v401_v22 = vld [vmem:[%s7391_s18 + $0xa0] sm:$0xff]  ;;  %806 = vst.msk [vmem:[#allocation2 + $0x88] sm:$0xff] %vm788_vm2, %v7272_v35  ;;  %5951 = vmatpush3.msra.mxu1 %v837_v38 }
  0x20   : > { %5902 = vmatprep.mubr.msk.f32.mxu0 %vm415_vm1, %v385_v6  ;;  %v402_v23 = vld [vmem:[%s7391_s18 + $0xa8] sm:$0xff]  ;;  %v403_v24 = vld [vmem:[%s7391_s18 + $0xb0] sm:$0xff]  ;;  %v404_v25 = vld [vmem:[%s7391_s18 + $0xb8] sm:$0xff]  ;;  %808 = vst.msk [vmem:[#allocation2 + $0x98] sm:$0xff] %vm788_vm2, %v7272_v35 }
  0x21   : > { %v405_v26 = vld [vmem:[%s7391_s18 + $0xc0] sm:$0xff]  ;;  %v406_v27 = vld [vmem:[%s7391_s18 + $0xc8] sm:$0xff]  ;;  %v407_v28 = vld [vmem:[%s7391_s18 + $0xd0] sm:$0xff]  ;;  %809 = vst.msk [vmem:[#allocation2 + $0xa0] sm:$0xff] %vm788_vm2, %v7272_v35 }
  0x22   : > { %v408_v29 = vld [vmem:[%s7391_s18 + $0xd8] sm:$0xff]  ;;  %v409_v30 = vld [vmem:[%s7391_s18 + $0xe0] sm:$0xff]  ;;  %v410_v31 = vld [vmem:[%s7391_s18 + $0xe8] sm:$0xff]  ;;  %810 = vst.msk [vmem:[#allocation2 + $0xa8] sm:$0xff] %vm788_vm2, %v7272_v35 }
  0x23   : > { %5903 = vmatmul.mubr.msk.f32.gmra.mxu0 %vm415_vm1, %v386_v7  ;;  %v411_v32 = vld [vmem:[%s7391_s18 + $0xf0] sm:$0xff]  ;;  %v412_v33 = vld [vmem:[%s7391_s18 + $0xf8] sm:$0xff]  ;;  %811 = vst.msk [vmem:[#allocation2 + $0xb0] sm:$0xff] %vm788_vm2, %v7272_v35  ;;  %812 = vst.msk [vmem:[#allocation2 + $0xb8] sm:$0xff] %vm788_vm2, %v7272_v35  ;;  %s7276_s18 = smov [#allocation4]  }
  0x24   : > { %5905 = vmatprep.mubr.msk.f32.mxu0 %vm415_vm1, %v387_v8  ;;  %v813_v39 = vld [vmem:[#allocation2] sm:$0xff]  ;;  %v814_v40 = vld [vmem:[#allocation2 + $0x8] sm:$0xff]  ;;  %v815_v41 = vld [vmem:[#allocation2 + $0x10] sm:$0xff]  ;;  %s7214_s20 = sshll.u32 %s7276_s18, 4  ;;  %s7215_s20 = int_to_ptr.vmem [resolvable:$false] %s7214_s20 }
  0x25   : > { %5952 = vmatprep.mubr.msk.f32.mxu1 %vm788_vm2, %v813_v39  ;;  %v816_v42 = vld [vmem:[#allocation2 + $0x18] sm:$0xff]  ;;  %v5435_v6 = vld [vmem:[%s10082_s3] ss:$0 sm:$0xff]  ;;  %s7216_s17 = scalar_lea.vmem %s7215_s20, 32 }
  0x26   : > { %5953 = vmatmul.mubr.msk.f32.vlgmr.msra.gmra.mxu1 %vm788_vm2, %v814_v40 }
  0x27   : > { %5906 = vmatmul.mubr.msk.f32.gmra.mxu0 %vm415_vm1, %v388_v9  ;;  %5955 = vmatprep.mubr.msk.f32.mxu1 %vm788_vm2, %v815_v41 }
  0x28   : > { %5908 = vmatprep.mubr.msk.f32.mxu0 %vm415_vm1, %v389_v10 }
  0x2a   : > { %5956 = vmatmul.mubr.msk.f32.gmra.mxu1 %vm788_vm2, %v816_v42 }
  0x2b   : > { %5909 = vmatmul.mubr.msk.f32.gmra.mxu0 %vm415_vm1, %v390_v11 }
  0x2c   : > { %5911 = vmatprep.mubr.msk.f32.mxu0 %vm415_vm1, %v391_v12 }
  0x2f   : > { %5912 = vmatmul.mubr.msk.f32.gmra.mxu0 %vm415_vm1, %v392_v13 }
  0x30   : > { %5914 = vmatprep.mubr.msk.f32.mxu0 %vm415_vm1, %v393_v14 }
  0x33   : > { %5915 = vmatmul.mubr.msk.f32.gmra.mxu0 %vm415_vm1, %v394_v15 }
  0x34   : > { %5917 = vmatprep.mubr.msk.f32.mxu0 %vm415_vm1, %v395_v16 }
  0x37   : > { %5918 = vmatmul.mubr.msk.f32.gmra.mxu0 %vm415_vm1, %v396_v17 }
  0x38   : > { %5920 = vmatprep.mubr.msk.f32.mxu0 %vm415_vm1, %v397_v18 }
  0x3b   : > { %5921 = vmatmul.mubr.msk.f32.gmra.mxu0 %vm415_vm1, %v398_v19 }
  0x3c   : > { %5923 = vmatprep.mubr.msk.f32.mxu0 %vm415_vm1, %v399_v20 }
  0x3f   : > { %5924 = vmatmul.mubr.msk.f32.gmra.mxu0 %vm415_vm1, %v400_v21 }
  0x40   : > { %5926 = vmatprep.mubr.msk.f32.mxu0 %vm415_vm1, %v401_v22 }
  0x43   : > { %5927 = vmatmul.mubr.msk.f32.gmra.mxu0 %vm415_vm1, %v402_v23 }
  0x44   : > { %5929 = vmatprep.mubr.msk.f32.mxu0 %vm415_vm1, %v403_v24 }
  0x47   : > { %5930 = vmatmul.mubr.msk.f32.gmra.mxu0 %vm415_vm1, %v404_v25 }
  0x48   : > { %5932 = vmatprep.mubr.msk.f32.mxu0 %vm415_vm1, %v405_v26 }
  0x4b   : > { %5933 = vmatmul.mubr.msk.f32.gmra.mxu0 %vm415_vm1, %v406_v27 }
  0x4c   : > { %5935 = vmatprep.mubr.msk.f32.mxu0 %vm415_vm1, %v407_v28 }
  0x4f   : > { %5936 = vmatmul.mubr.msk.f32.gmra.mxu0 %vm415_vm1, %v408_v29 }
  0x50   : > { %5938 = vmatprep.mubr.msk.f32.mxu0 %vm415_vm1, %v409_v30 }
  0x53   : > { %5939 = vmatmul.mubr.msk.f32.gmra.mxu0 %vm415_vm1, %v410_v31 }
  0x54   : > { %5941 = vmatprep.mubr.msk.f32.mxu0 %vm415_vm1, %v411_v32 }
  0x57   : > { %5942 = vmatmul.mubr.msk.f32.gmra.mxu0 %vm415_vm1, %v412_v33 }
  0xdb   : > { %v5898_v43 = vpop.f32.mrf.mxu0 }
  0xdd   : > { %v582_v44 = vpop.f32.mrf.mxu0 }
  0xdf   : > { %v5901_v45 = vpop.f32.mrf.mxu0 }
  0xe1   : > { %v592_v46 = vpop.f32.mrf.mxu0 }
  0xe3   : > { %v5904_v47 = vpop.f32.mrf.mxu0 }
  0xe5   : > { %v602_v48 = vpop.f32.mrf.mxu0 }
  0xe7   : > { %v7506_v49 = vpop.f32.mrf.mxu0 }
  0xe9   : > { %v7508_v50 = vpop.f32.mrf.mxu0 }
  0xeb   : > { %v5910_v51 = vpop.f32.mrf.mxu0 }
  0xec   : > { %v742_v4 = vmax.f32 %v5898_v43, %v5910_v51  ;;  %v818_v51 = vld [vmem:[#allocation2 + $0x28] sm:$0xff] }
  0xed   : > { %v622_v52 = vpop.f32.mrf.mxu0 }
  0xee   : > { %v741_v8 = vmax.f32 %v582_v44, %v622_v52 }
  0xef   : > { %v5913_v53 = vpop.f32.mrf.mxu0 }
  0xf0   : > { %v744_v12 = vmax.f32 %v5901_v45, %v5913_v53 }
  0xf1   : > { %v632_v54 = vpop.f32.mrf.mxu0 }
  0xf2   : > { %v743_v16 = vmax.f32 %v592_v46, %v632_v54 }
  0xf3   : > { %v5916_v55 = vpop.f32.mrf.mxu0 }
  0xf4   : > { %v746_v22 = vmax.f32 %v5904_v47, %v5916_v55 }
  0xf5   : > { %v642_v56 = vpop.f32.mrf.mxu0 }
  0xf6   : > { %v745_v28 = vmax.f32 %v602_v48, %v642_v56  ;;  %v820_v56 = vld [vmem:[#allocation2 + $0x38] sm:$0xff] }
  0xf7   : > { %v5919_v57 = vpop.f32.mrf.mxu0 }
  0xf8   : > { %v748_v34 = vmax.f32 %v7506_v49, %v5919_v57 }
  0xf9   : > { %v652_v58 = vpop.f32.mrf.mxu0 }
  0xfa   : > { %v747_v41 = vmax.f32 %v7508_v50, %v652_v58  ;;  %v822_v58 = vld [vmem:[#allocation2 + $0x48] sm:$0xff] }
  0xfb   : > { %v5922_v59 = vpop.f32.mrf.mxu0 }
  0xfd   : > { %v662_v60 = vpop.f32.mrf.mxu0 }
  0xff   : > { %v5925_v61 = vpop.f32.mrf.mxu0 }
 0x101   : > { %v672_v62 = vpop.f32.mrf.mxu0 }
 0x103   : > { %v5928_v63 = vpop.f32.mrf.mxu0 }
 0x105   : > { %v682_v0 = vpop.f32.mrf.mxu0 }
 0x107   : > { %v5931_v1 = vpop.f32.mrf.mxu0 }
 0x109   : > { %v692_v2 = vpop.f32.mrf.mxu0 }
 0x10b   : > { %v5934_v3 = vpop.f32.mrf.mxu0 }
 0x10c   : > { %v750_v5 = vmax.f32 %v5922_v59, %v5934_v3 }
 0x10d   : > { %v702_v7 = vpop.f32.mrf.mxu0 }
 0x10e   : > { %v758_v9 = vmax.f32 %v742_v4, %v750_v5  ;;  %v749_v10 = vmax.f32 %v662_v60, %v702_v7  ;;  %v824_v60 = vld [vmem:[#allocation2 + $0x58] sm:$0xff]  ;;  %v833_v5 = vld [vmem:[#allocation2 + $0xa0] sm:$0xff]  ;;  %v835_v7 = vld [vmem:[#allocation2 + $0xb0] sm:$0xff] }
 0x10f   : > { %v5937_v11 = vpop.f32.mrf.mxu0  ;;  %v832_v4 = vld [vmem:[#allocation2 + $0x98] sm:$0xff] }
 0x110   : > { %v773_v13 = vadd.f32 %v5435_v6, %v758_v9  ;;  %v757_v14 = vmax.f32 %v741_v8, %v749_v10  ;;  %v752_v15 = vmax.f32 %v5925_v61, %v5937_v11  ;;  %v836_v8 = vld [vmem:[#allocation2 + $0xb8] sm:$0xff]  ;;  %v7546_v9 = vld [vmem:[%s10084_s5] ss:$0 sm:$0xff]  ;;  %v5954_v10 = vpop.f32.mrf.mxu1 }
 0x111   : > { %v712_v17 = vpop.f32.mrf.mxu0  ;;  %v992_v11 = vadd.f32 %v5954_v10, %v7546_v9  ;;  %v364_v10 = vld [vmem:[%s10093_s0 + $0x38] sm:$0xff] }
 0x112   : > { %v781_v18 = vmax.f32 %v773_v13, 0.0  ;;  %v772_v19 = vadd.f32 %v5435_v6, %v757_v14  ;;  %v760_v20 = vmax.f32 %v744_v12, %v752_v15  ;;  %v751_v21 = vmax.f32 %v672_v62, %v712_v17  ;;  %v826_v62 = vld [vmem:[#allocation2 + $0x68] sm:$0xff]  ;;  %v986_v13 = vpop.f32.mrf.mxu1 }
 0x113   : > { %v5940_v23 = vpop.f32.mrf.mxu0  ;;  %v358_v12 = vld [vmem:[%s10093_s0 + $0x8] sm:$0xff]  ;;  %v1106_v14 = vmax.f32 %v992_v11, 0.0  ;;  %v987_v15 = vadd.f32 %v7546_v9, %v986_v13 }
 0x114   : > { %795 = vst.msk [vmem:[#allocation2 + $0x30] sm:$0xff] %vm788_vm2, %v781_v18  ;;  %v780_v24 = vmax.f32 %v772_v19, 0.0  ;;  %v775_v25 = vadd.f32 %v5435_v6, %v760_v20  ;;  %v759_v26 = vmax.f32 %v743_v16, %v751_v21  ;;  %v754_v27 = vmax.f32 %v5928_v63, %v5940_v23  ;;  %v357_v16 = vld [vmem:[%s10093_s0] sm:$0xff]  ;;  %v5957_v17 = vpop.f32.mrf.mxu1  ;;  %v360_v21 = vld [vmem:[%s10093_s0 + $0x18] sm:$0xff] }
 0x115   : > { %v722_v29 = vpop.f32.mrf.mxu0  ;;  %v1130_v18 = vmul.f32 %v1106_v14, %v358_v12  ;;  %v1105_v19 = vmax.f32 %v987_v15, 0.0  ;;  %v1002_v20 = vadd.f32 %v5957_v17, %v7546_v9  ;;  %v1759_v12 = vld [vmem:[%s10085_s6 + $0xa0] sm:$0xff] }
 0x116   : > { %793 = vst.msk [vmem:[#allocation2 + $0x20] sm:$0xff] %vm788_vm2, %v780_v24  ;;  %v783_v30 = vmax.f32 %v775_v25, 0.0  ;;  %v774_v31 = vadd.f32 %v5435_v6, %v759_v26  ;;  %v762_v32 = vmax.f32 %v746_v22, %v754_v27  ;;  %v753_v33 = vmax.f32 %v682_v0, %v722_v29  ;;  %v828_v0 = vld [vmem:[#allocation2 + $0x78] sm:$0xff]  ;;  %v996_v22 = vpop.f32.mrf.mxu1  ;;  %v359_v26 = vld [vmem:[%s10093_s0 + $0x10] sm:$0xff] }
 0x117   : > { %v5943_v36 = vpop.f32.mrf.mxu0  ;;  %1154 = vst.msk [vmem:[#allocation3 + $0x8] sm:$0xff] %vm788_vm2, %v1130_v18  ;;  %v1129_v23 = vmul.f32 %v1105_v19, %v357_v16  ;;  %v1108_v24 = vmax.f32 %v1002_v20, 0.0  ;;  %v997_v25 = vadd.f32 %v7546_v9, %v996_v22  ;;  %v363_v16 = vld [vmem:[%s10093_s0 + $0x30] sm:$0xff]  ;;  %v1758_v18 = vld [vmem:[%s10085_s6 + $0x98] sm:$0xff]  ;;  %v366_v22 = vld [vmem:[%s10093_s0 + $0x48] sm:$0xff] }
 0x118   : > { %799 = vst.msk [vmem:[#allocation2 + $0x50] sm:$0xff] %vm788_vm2, %v783_v30  ;;  %v782_v37 = vmax.f32 %v774_v31, 0.0  ;;  %v777_v38 = vadd.f32 %v5435_v6, %v762_v32  ;;  %v761_v39 = vmax.f32 %v745_v28, %v753_v33  ;;  %v756_v40 = vmax.f32 %v5931_v1, %v5943_v36  ;;  %v1774_v30 = vld [vmem:[%s10085_s6 + $0x118] sm:$0xff]  ;;  %v1773_v31 = vld [vmem:[%s10085_s6 + $0x110] sm:$0xff]  ;;  %v1772_v32 = vld [vmem:[%s10085_s6 + $0x108] sm:$0xff] }
 0x119   : > { %v732_v42 = vpop.f32.mrf.mxu0  ;;  %1153 = vst.msk [vmem:[#allocation3] sm:$0xff] %vm788_vm2, %v1129_v23  ;;  %v1132_v27 = vmul.f32 %v1108_v24, %v360_v21  ;;  %v1107_v28 = vmax.f32 %v997_v25, 0.0  ;;  %5988 = vmatprep.subr.mxu1 %v1774_v30  ;;  %v1771_v33 = vld [vmem:[%s10085_s6 + $0x100] sm:$0xff]  ;;  %v1753_v36 = vld [vmem:[%s10085_s6 + $0x70] sm:$0xff] }
 0x11a   : > { %797 = vst.msk [vmem:[#allocation2 + $0x40] sm:$0xff] %vm788_vm2, %v782_v37  ;;  %v785_v43 = vmax.f32 %v777_v38, 0.0  ;;  %v776_v44 = vadd.f32 %v5435_v6, %v761_v39  ;;  %v764_v45 = vmax.f32 %v748_v34, %v756_v40  ;;  %v755_v46 = vmax.f32 %v692_v2, %v732_v42  ;;  %v830_v2 = vld [vmem:[#allocation2 + $0x88] sm:$0xff]  ;;  %5989 = vmatpush3.msra.mxu1 %v1774_v30  ;;  %v1754_v34 = vld [vmem:[%s10085_s6 + $0x78] sm:$0xff]  ;;  %v1751_v38 = vld [vmem:[%s10085_s6 + $0x60] sm:$0xff] }
 0x11b   : > { %v819_v50 = vld [vmem:[#allocation2 + $0x30] sm:$0xff]  ;;  %1156 = vst.msk [vmem:[#allocation3 + $0x18] sm:$0xff] %vm788_vm2, %v1132_v27  ;;  %v1131_v29 = vmul.f32 %v1107_v28, %v359_v26  ;;  %5990 = vmatprep.subr.mxu1 %v1773_v31  ;;  %1821 = vmatpush1.msra.mxu0 %v1754_v34  ;;  %v1752_v37 = vld [vmem:[%s10085_s6 + $0x68] sm:$0xff]  ;;  %v1750_v39 = vld [vmem:[%s10085_s6 + $0x58] sm:$0xff] }
 0x11c   : > { %803 = vst.msk [vmem:[#allocation2 + $0x70] sm:$0xff] %vm788_vm2, %v785_v43  ;;  %v784_v47 = vmax.f32 %v776_v44, 0.0  ;;  %v779_v48 = vadd.f32 %v5435_v6, %v764_v45  ;;  %v763_v49 = vmax.f32 %v747_v41, %v755_v46  ;;  %5991 = vmatpush3.msra.mxu1 %v1773_v31  ;;  %1822 = vmatprep.subr.mxu0 %v7272_v35  ;;  %v1749_v40 = vld [vmem:[%s10085_s6 + $0x50] sm:$0xff]  ;;  %v1748_v41 = vld [vmem:[%s10085_s6 + $0x48] sm:$0xff]  ;;  %v1747_v42 = vld [vmem:[%s10085_s6 + $0x40] sm:$0xff] }
 0x11d   : > { %v817_v52 = vld [vmem:[#allocation2 + $0x20] sm:$0xff]  ;;  %1155 = vst.msk [vmem:[#allocation3 + $0x10] sm:$0xff] %vm788_vm2, %v1131_v29  ;;  %5992 = vmatprep.subr.mxu1 %v1772_v32  ;;  %1823 = vmatpush1.msra.mxu0 %v1753_v36  ;;  %v1746_v43 = vld [vmem:[%s10085_s6 + $0x38] sm:$0xff]  ;;  %v1745_v44 = vld [vmem:[%s10085_s6 + $0x30] sm:$0xff] }
 0x11e   : > { %801 = vst.msk [vmem:[#allocation2 + $0x60] sm:$0xff] %vm788_vm2, %v784_v47  ;;  %v787_v53 = vmax.f32 %v779_v48, 0.0  ;;  %v778_v54 = vadd.f32 %v5435_v6, %v763_v49  ;;  %5958 = vmatprep.mubr.msk.f32.mxu1 %vm788_vm2, %v817_v52  ;;  %v834_v6 = vld [vmem:[#allocation2 + $0xa8] sm:$0xff]  ;;  %5993 = vmatpush3.msra.mxu1 %v1772_v32  ;;  %v1743_v46 = vld [vmem:[%s10085_s6 + $0x20] sm:$0xff]  ;;  %v1742_v47 = vld [vmem:[%s10085_s6 + $0x18] sm:$0xff] }
 0x11f   : > { %5959 = vmatmul.mubr.msk.f32.gmra.mxu1 %vm788_vm2, %v818_v51  ;;  %v823_v59 = vld [vmem:[#allocation2 + $0x50] sm:$0xff]  ;;  %5994 = vmatprep.subr.mxu1 %v1771_v33  ;;  %v1744_v45 = vld [vmem:[%s10085_s6 + $0x28] sm:$0xff]  ;;  %v1739_v51 = vld [vmem:[%s10085_s6] sm:$0xff] }
 0x120   : > { %807 = vst.msk [vmem:[#allocation2 + $0x90] sm:$0xff] %vm788_vm2, %v787_v53  ;;  %v786_v55 = vmax.f32 %v778_v54, 0.0  ;;  %5961 = vmatprep.mubr.msk.f32.mxu1 %vm788_vm2, %v819_v50  ;;  %5995 = vmatpush3.msra.mxu1 %v1771_v33  ;;  %v1741_v48 = vld [vmem:[%s10085_s6 + $0x10] sm:$0xff]  ;;  %v1740_v49 = vld [vmem:[%s10085_s6 + $0x8] sm:$0xff]  ;;  %v1770_v52 = vld [vmem:[%s10085_s6 + $0xf8] sm:$0xff] }
 0x121   : > { %v821_v57 = vld [vmem:[#allocation2 + $0x40] sm:$0xff]  ;;  %1824 = vmatprep.subr.mxu0 %v7272_v35  ;;  %v1769_v53 = vld [vmem:[%s10085_s6 + $0xf0] sm:$0xff]  ;;  %v1768_v54 = vld [vmem:[%s10085_s6 + $0xe8] sm:$0xff] }
 0x122   : > { %805 = vst.msk [vmem:[#allocation2 + $0x80] sm:$0xff] %vm788_vm2, %v786_v55  ;;  %1825 = vmatpush1.msra.mxu0 %v1752_v37  ;;  %v1767_v50 = vld [vmem:[%s10085_s6 + $0xe0] sm:$0xff]  ;;  %v1766_v55 = vld [vmem:[%s10085_s6 + $0xd8] sm:$0xff]  ;;  %v1757_v24 = vld [vmem:[%s10085_s6 + $0x90] sm:$0xff] }
 0x123   : > { %5962 = vmatmul.mubr.msk.f32.gmra.mxu1 %vm788_vm2, %v820_v56  ;;  %v827_v63 = vld [vmem:[#allocation2 + $0x70] sm:$0xff]  ;;  %1826 = vmatprep.subr.mxu0 %v7272_v35  ;;  %v365_v28 = vld [vmem:[%s10093_s0 + $0x40] sm:$0xff]  ;;  %v1756_v30 = vld [vmem:[%s10085_s6 + $0x88] sm:$0xff] }
 0x124   : > { %5964 = vmatprep.mubr.msk.f32.mxu1 %vm788_vm2, %v821_v57  ;;  %1827 = vmatpush1.msra.mxu0 %v1751_v38  ;;  %v1765_v56 = vld [vmem:[%s10085_s6 + $0xd0] sm:$0xff]  ;;  %v1764_v57 = vld [vmem:[%s10085_s6 + $0xc8] sm:$0xff]  ;;  %v368_v36 = vld [vmem:[%s10093_s0 + $0x58] sm:$0xff] }
 0x125   : > { %v825_v61 = vld [vmem:[#allocation2 + $0x60] sm:$0xff]  ;;  %1828 = vmatprep.subr.mxu0 %v7272_v35  ;;  %v7732_v34 = vld [vmem:[#allocation3 + $0x17] sm:$0xff] }
 0x126   : > { %1829 = vmatpush1.msra.mxu0 %v1750_v39  ;;  %v1755_v39 = vld [vmem:[%s10085_s6 + $0x80] sm:$0xff] }
 0x127   : > { %5965 = vmatmul.mubr.msk.f32.gmra.mxu1 %vm788_vm2, %v822_v58  ;;  %v831_v3 = vld [vmem:[#allocation2 + $0x90] sm:$0xff]  ;;  %1830 = vmatprep.subr.mxu0 %v7272_v35  ;;  %v1763_v58 = vld [vmem:[%s10085_s6 + $0xc0] sm:$0xff] }
 0x128   : > { %5967 = vmatprep.mubr.msk.f32.mxu1 %vm788_vm2, %v823_v59  ;;  %1831 = vmatpush1.msra.mxu0 %v1749_v40  ;;  %v1762_v59 = vld [vmem:[%s10085_s6 + $0xb8] sm:$0xff] }
 0x129   : > { %v829_v1 = vld [vmem:[#allocation2 + $0x80] sm:$0xff]  ;;  %1832 = vmatprep.subr.mxu0 %v7272_v35 }
 0x12a   : > { %1833 = vmatpush1.msra.mxu0 %v1748_v41 }
 0x12b   : > { %5968 = vmatmul.mubr.msk.f32.gmra.mxu1 %vm788_vm2, %v824_v60  ;;  %1834 = vmatprep.subr.mxu0 %v7272_v35  ;;  %v1761_v60 = vld [vmem:[%s10085_s6 + $0xb0] sm:$0xff] }
 0x12c   : > { %5970 = vmatprep.mubr.msk.f32.mxu1 %vm788_vm2, %v825_v61  ;;  %1835 = vmatpush1.msra.mxu0 %v1747_v42 }
 0x12d   : > { %1836 = vmatprep.subr.mxu0 %v7272_v35 }
 0x12e   : > { %1837 = vmatpush1.msra.mxu0 %v1746_v43 }
 0x12f   : > { %5971 = vmatmul.mubr.msk.f32.gmra.mxu1 %vm788_vm2, %v826_v62  ;;  %1838 = vmatprep.subr.mxu0 %v7272_v35 }
 0x130   : > { %5973 = vmatprep.mubr.msk.f32.mxu1 %vm788_vm2, %v827_v63  ;;  %1839 = vmatpush1.msra.mxu0 %v1745_v44  ;;  %v362_v63 = vld [vmem:[%s10093_s0 + $0x28] sm:$0xff] }
 0x131   : > { %1840 = vmatprep.subr.mxu0 %v7272_v35  ;;  %v1195_v44 = vld [vmem:[#allocation3 + $0x8] sm:$0xff] }
 0x132   : > { %1841 = vmatpush1.msra.mxu0 %v1744_v45  ;;  %v367_v45 = vld [vmem:[%s10093_s0 + $0x50] sm:$0xff] }
 0x133   : > { %5974 = vmatmul.mubr.msk.f32.gmra.mxu1 %vm788_vm2, %v828_v0  ;;  %1842 = vmatprep.subr.mxu0 %v7272_v35 }
 0x134   : > { %5976 = vmatprep.mubr.msk.f32.mxu1 %vm788_vm2, %v829_v1  ;;  %1843 = vmatpush1.msra.mxu0 %v1743_v46 }
 0x135   : > { %1844 = vmatprep.subr.mxu0 %v7272_v35 }
 0x136   : > { %1845 = vmatpush1.msra.mxu0 %v1742_v47 }
 0x137   : > { %5977 = vmatmul.mubr.msk.f32.gmra.mxu1 %vm788_vm2, %v830_v2  ;;  %1846 = vmatprep.subr.mxu0 %v7272_v35 }
 0x138   : > { %5979 = vmatprep.mubr.msk.f32.mxu1 %vm788_vm2, %v831_v3  ;;  %1847 = vmatpush1.msra.mxu0 %v1741_v48  ;;  %v361_v3 = vld [vmem:[%s10093_s0 + $0x20] sm:$0xff] }
 0x139   : > { %1848 = vmatprep.subr.mxu0 %v7272_v35 }
 0x13a   : > { %1849 = vmatpush1.msra.mxu0 %v1740_v49 }
 0x13b   : > { %5980 = vmatmul.mubr.msk.f32.gmra.mxu1 %vm788_vm2, %v832_v4  ;;  %1850 = vmatprep.subr.mxu0 %v7272_v35 }
 0x13c   : > { %5982 = vmatprep.mubr.msk.f32.mxu1 %vm788_vm2, %v833_v5  ;;  %1851 = vmatpush1.msra.mxu0 %v1739_v51  ;;  %v1760_v5 = vld [vmem:[%s10085_s6 + $0xa8] sm:$0xff] }
 0x13d   : > { %1852 = vmatprep.subr.mxu0 %v7272_v35 }
 0x13e   : > { %1853 = vmatpush2.msra.mxu0 %v1770_v52 }
 0x13f   : > { %5983 = vmatmul.mubr.msk.f32.gmra.mxu1 %vm788_vm2, %v834_v6  ;;  %1854 = vmatprep.subr.mxu0 %v7272_v35 }
 0x140   : > { %5985 = vmatprep.mubr.msk.f32.mxu1 %vm788_vm2, %v835_v7  ;;  %1855 = vmatpush2.msra.mxu0 %v1769_v53 }
 0x141   : > { %1856 = vmatprep.subr.mxu0 %v7272_v35 }
 0x142   : > { %1857 = vmatpush2.msra.mxu0 %v1768_v54  ;;  %v370_v54 = vld [vmem:[%s10093_s0 + $0x68] sm:$0xff] }
 0x143   : > { %5986 = vmatmul.mubr.msk.f32.gmra.mxu1 %vm788_vm2, %v836_v8  ;;  %1858 = vmatprep.subr.mxu0 %v7272_v35 }
 0x144   : > { %1859 = vmatpush2.msra.mxu0 %v1767_v50  ;;  %v1196_v50 = vld [vmem:[#allocation3 + $0x10] sm:$0xff] }
 0x145   : > { %1860 = vmatprep.subr.mxu0 %v7272_v35 }
 0x146   : > { %1861 = vmatpush2.msra.mxu0 %v1766_v55 }
 0x147   : > { %1862 = vmatprep.subr.mxu0 %v7272_v35 }
 0x148   : > { %1863 = vmatpush2.msra.mxu0 %v1765_v56 }
 0x149   : > { %1864 = vmatprep.subr.mxu0 %v7272_v35 }
 0x14a   : > { %1865 = vmatpush2.msra.mxu0 %v1764_v57 }
 0x14b   : > { %1866 = vmatprep.subr.mxu0 %v7272_v35 }
 0x14c   : > { %1867 = vmatpush2.msra.mxu0 %v1763_v58 }
 0x14d   : > { %1868 = vmatprep.subr.mxu0 %v7272_v35 }
 0x14e   : > { %1869 = vmatpush2.msra.mxu0 %v1762_v59 }
 0x14f   : > { %1870 = vmatprep.subr.mxu0 %v7272_v35 }
 0x150   : > { %1871 = vmatpush2.msra.mxu0 %v1761_v60 }
 0x151   : > { %1872 = vmatprep.subr.mxu0 %v7272_v35 }
 0x152   : > { %1873 = vmatpush2.msra.mxu0 %v1760_v5 }
 0x153   : > { %1874 = vmatprep.subr.mxu0 %v7272_v35 }
 0x154   : > { %1875 = vmatpush2.msra.mxu0 %v1759_v12 }
 0x155   : > { %1876 = vmatprep.subr.mxu0 %v7272_v35 }
 0x156   : > { %1877 = vmatpush2.msra.mxu0 %v1758_v18  ;;  %v371_v18 = vld [vmem:[%s10093_s0 + $0x70] sm:$0xff] }
 0x157   : > { %1878 = vmatprep.subr.mxu0 %v7272_v35 }
 0x158   : > { %1879 = vmatpush2.msra.mxu0 %v1757_v24 }
 0x159   : > { %1880 = vmatprep.subr.mxu0 %v7272_v35 }
 0x15a   : > { %1881 = vmatpush2.msra.mxu0 %v1756_v30 }
 0x15b   : > { %1882 = vmatprep.subr.mxu0 %v7272_v35 }
 0x15c   : > { %1883 = vmatpush2.msra.mxu0 %v1755_v39 }
 0x15d   : > { %3211 = vmatprep.subr.mxu0 %v7272_v35 }
 0x1df   : > { %v5960_v61 = vpop.f32.mrf.mxu1 }
 0x1e0   : > { %v1012_v62 = vadd.f32 %v5960_v61, %v7546_v9  ;;  %v1213_v61 = vld [vmem:[#allocation3 + $0x9] sm:$0xff] }
 0x1e1   : > { %v1006_v0 = vpop.f32.mrf.mxu1 }
 0x1e2   : > { %v1110_v1 = vmax.f32 %v1012_v62, 0.0  ;;  %v1007_v2 = vadd.f32 %v7546_v9, %v1006_v0 }
 0x1e3   : > { %v5963_v4 = vpop.f32.mrf.mxu1 }
 0x1e4   : > { %v1134_v6 = vmul.f32 %v1110_v1, %v362_v63  ;;  %v1109_v7 = vmax.f32 %v1007_v2, 0.0  ;;  %v1022_v8 = vadd.f32 %v5963_v4, %v7546_v9  ;;  %v369_v63 = vld [vmem:[%s10093_s0 + $0x60] sm:$0xff] }
 0x1e5   : > { %v1016_v11 = vpop.f32.mrf.mxu1 }
 0x1e6   : > { %1158 = vst.msk [vmem:[#allocation3 + $0x28] sm:$0xff] %vm788_vm2, %v1134_v6  ;;  %v1133_v13 = vmul.f32 %v1109_v7, %v361_v3  ;;  %v1112_v14 = vmax.f32 %v1022_v8, 0.0  ;;  %v1017_v15 = vadd.f32 %v7546_v9, %v1016_v11 }
 0x1e7   : > { %v5966_v17 = vpop.f32.mrf.mxu1 }
 0x1e8   : > { %1157 = vst.msk [vmem:[#allocation3 + $0x20] sm:$0xff] %vm788_vm2, %v1133_v13  ;;  %v1136_v19 = vmul.f32 %v1112_v14, %v364_v10  ;;  %v1111_v20 = vmax.f32 %v1017_v15, 0.0  ;;  %v1032_v21 = vadd.f32 %v5966_v17, %v7546_v9  ;;  %v372_v10 = vld [vmem:[%s10093_s0 + $0x78] sm:$0xff] }
 0x1e9   : > { %v1026_v23 = vpop.f32.mrf.mxu1 }
 0x1ea   : > { %1160 = vst.msk [vmem:[#allocation3 + $0x38] sm:$0xff] %vm788_vm2, %v1136_v19  ;;  %v1135_v25 = vmul.f32 %v1111_v20, %v363_v16  ;;  %v1114_v26 = vmax.f32 %v1032_v21, 0.0  ;;  %v1027_v27 = vadd.f32 %v7546_v9, %v1026_v23 }
 0x1eb   : > { %v5969_v29 = vpop.f32.mrf.mxu1 }
 0x1ec   : > { %1159 = vst.msk [vmem:[#allocation3 + $0x30] sm:$0xff] %vm788_vm2, %v1135_v25  ;;  %v1138_v31 = vmul.f32 %v1114_v26, %v366_v22  ;;  %v1113_v32 = vmax.f32 %v1027_v27, 0.0  ;;  %v1042_v33 = vadd.f32 %v5969_v29, %v7546_v9  ;;  %v374_v26 = vld [vmem:[%s10093_s0 + $0x88] sm:$0xff] }
 0x1ed   : > { %v1036_v37 = vpop.f32.mrf.mxu1  ;;  %v7737_v38 = vld [vmem:[#allocation3 + $0x28] sm:$0xff] }
 0x1ee   : > { %1162 = vst.msk [vmem:[#allocation3 + $0x48] sm:$0xff] %vm788_vm2, %v1138_v31  ;;  %v1137_v40 = vmul.f32 %v1113_v32, %v365_v28  ;;  %v1116_v41 = vmax.f32 %v1042_v33, 0.0  ;;  %v1037_v42 = vadd.f32 %v7546_v9, %v1036_v37  ;;  %v6276_v43 = vpack.i.bf16 %v7732_v34, %v7737_v38  ;;  %v1214_v32 = vld [vmem:[#allocation3 + $0x11] sm:$0xff] }
 0x1ef   : > { %v7750_v46 = vld [vmem:[#allocation3 + $0x19] sm:$0xff]  ;;  %v5972_v47 = vpop.f32.mrf.mxu1  ;;  %v7752_v48 = vld [vmem:[#allocation3 + $0x21] sm:$0xff] }
 0x1f0   : > { %1161 = vst.msk [vmem:[#allocation3 + $0x40] sm:$0xff] %vm788_vm2, %v1137_v40  ;;  %v1140_v49 = vmul.f32 %v1116_v41, %v368_v36  ;;  %v1115_v51 = vmax.f32 %v1037_v42, 0.0  ;;  %6277 = vrot.lane.b32.xlu1 %v6276_v43, %s7273_s12  ;;  %v6281_v52 = vpack.i.bf16 %v1195_v44, %v7750_v46  ;;  %v1052_v53 = vadd.f32 %v5972_v47, %v7546_v9  ;;  %v7762_v56 = vld [vmem:[#allocation3 + $0x27] sm:$0xff]  ;;  %v7785_v7 = vld [vmem:[#allocation3 + $0x1f] sm:$0xff] }
 0x1f1   : > { %v1046_v55 = vpop.f32.mrf.mxu1  ;;  %v6291_v59 = vpack.i.bf16 %v1196_v50, %v7752_v48  ;;  %v6286_v4 = vpack.i.bf16 %v1213_v61, %v7762_v56  ;;  %v7787_v8 = vld [vmem:[#allocation3 + $0x38] sm:$0xff]  ;;  %v373_v36 = vld [vmem:[%s10093_s0 + $0x80] sm:$0xff] }
 0x1f2   : > { %1164 = vst.msk [vmem:[#allocation3 + $0x58] sm:$0xff] %vm788_vm2, %v1140_v49  ;;  %v1139_v57 = vmul.f32 %v1115_v51, %v367_v45  ;;  %6282 = vrot.lane.b32.xlu0 %v6281_v52, %s7274_s21  ;;  %v1118_v58 = vmax.f32 %v1052_v53, 0.0  ;;  %v1047_v60 = vadd.f32 %v7546_v9, %v1046_v55  ;;  %v6296_v20 = vpack.i.bf16 %v7762_v56, %v7787_v8  ;;  %v7838_v44 = vld [vmem:[#allocation3 + $0x20] sm:$0xff]  ;;  %v376_v45 = vld [vmem:[%s10093_s0 + $0x98] sm:$0xff]  ;;  %v375_v55 = vld [vmem:[%s10093_s0 + $0x90] sm:$0xff] }
 0x1f3   : > { %v7768_v62 = vld [vmem:[#allocation3 + $0x29] sm:$0xff]  ;;  %v5975_v1 = vpop.f32.mrf.mxu1  ;;  %v7780_v5 = vld [vmem:[#allocation3 + $0x31] sm:$0xff] }
 0x1f4   : > { %v7773_v0 = vld [vmem:[#allocation3 + $0x30] sm:$0xff]  ;;  %1163 = vst.msk [vmem:[#allocation3 + $0x50] sm:$0xff] %vm788_vm2, %v1139_v57  ;;  %v1142_v2 = vmul.f32 %v1118_v58, %v370_v54  ;;  %6292 = vrot.lane.b32.xlu1 %v6291_v59, %s7274_s21  ;;  %5996 = vmatprep.mubr.msk.f32.mxu1 %vm788_vm2, %v7768_v62  ;;  %v1117_v3 = vmax.f32 %v1047_v60, 0.0  ;;  %v1062_v6 = vadd.f32 %v5975_v1, %v7546_v9  ;;  %v7848_v49 = vld [vmem:[#allocation3 + $0x18] sm:$0xff] }
 0x1f5   : > { %5997 = vmatmul.mubr.msk.f32.vlgmr.msra.gmra.mxu1 %vm788_vm2, %v7780_v5  ;;  %v1056_v11 = vpop.f32.mrf.mxu1  ;;  %v6306_v13 = vpack.i.bf16 %v7785_v7, %v7773_v0  ;;  %v7799_v17 = vld [vmem:[#allocation3 + $0x37] sm:$0xff]  ;;  %v7813_v25 = vld [vmem:[#allocation3 + $0x2f] sm:$0xff]  ;;  %v6321_v47 = vpack.i.bf16 %v7838_v44, %v7780_v5  ;;  %v6311_v58 = vpack.i.bf16 %v7848_v49, %v7768_v62 }
 0x1f6   : > { %1166 = vst.msk [vmem:[#allocation3 + $0x68] sm:$0xff] %vm788_vm2, %v1142_v2  ;;  %v1141_v12 = vmul.f32 %v1117_v3, %v369_v63  ;;  %6287 = vrot.lane.b32.xlu0 %v6286_v4, %s7275_s29  ;;  %v1120_v14 = vmax.f32 %v1062_v6, 0.0  ;;  %v1057_v15 = vadd.f32 %v7546_v9, %v1056_v11  ;;  %v6316_v28 = vpack.i.bf16 %v7750_v46, %v7799_v17  ;;  %v7868_v1 = vld [vmem:[#allocation3 + $0x48] sm:$0xff] }
 0x1f7   : > { %v7797_v16 = vld [vmem:[#allocation3 + $0x39] sm:$0xff]  ;;  %v5978_v19 = vpop.f32.mrf.mxu1  ;;  %v7810_v23 = vld [vmem:[#allocation3 + $0x41] sm:$0xff]  ;;  %v6301_v39 = vpack.i.bf16 %v1214_v32, %v7813_v25 }
 0x1f8   : > { %1165 = vst.msk [vmem:[#allocation3 + $0x60] sm:$0xff] %vm788_vm2, %v1141_v12  ;;  %6307 = vrot.lane.b32.xlu1 %v6306_v13, %s7273_s12  ;;  %5999 = vmatprep.mubr.msk.f32.mxu1 %vm788_vm2, %v7797_v16  ;;  %v1144_v21 = vmul.f32 %v1120_v14, %v372_v10  ;;  %v1119_v22 = vmax.f32 %v1057_v15, 0.0  ;;  %v1072_v24 = vadd.f32 %v5978_v19, %v7546_v9  ;;  %v7852_v54 = vld [vmem:[#allocation3 + $0x40] sm:$0xff]  ;;  %v378_v2 = vld [vmem:[%s10093_s0 + $0xa8] sm:$0xff] }
 0x1f9   : > { %6000 = vmatmul.mubr.msk.f32.gmra.mxu1 %vm788_vm2, %v7810_v23  ;;  %v1066_v27 = vpop.f32.mrf.mxu1  ;;  %v6336_v4 = vpack.i.bf16 %v7813_v25, %v7852_v54  ;;  %v7880_v12 = vld [vmem:[#allocation3 + $0x47] sm:$0xff] }
 0x1fa   : > { %6297 = vrot.lane.b32.xlu0 %v6296_v20, %s7273_s12  ;;  %1168 = vst.msk [vmem:[#allocation3 + $0x78] sm:$0xff] %vm788_vm2, %v1144_v21  ;;  %v1143_v29 = vmul.f32 %v1119_v22, %v371_v18  ;;  %v1122_v30 = vmax.f32 %v1072_v24, 0.0  ;;  %v1067_v31 = vadd.f32 %v7546_v9, %v1066_v27  ;;  %v377_v14 = vld [vmem:[%s10093_s0 + $0xa0] sm:$0xff]  ;;  %v6326_v18 = vpack.i.bf16 %v7799_v17, %v7868_v1 }
 0x1fb   : > { %v7825_v33 = vld [vmem:[#allocation3 + $0x49] sm:$0xff]  ;;  %v5981_v37 = vpop.f32.mrf.mxu1  ;;  %v7835_v42 = vld [vmem:[#allocation3 + $0x51] sm:$0xff]  ;;  %v7896_v24 = vld [vmem:[#allocation3 + $0x3f] sm:$0xff] }
 0x1fc   : > { %6317 = vrot.lane.b32.xlu1 %v6316_v28, %s7275_s29  ;;  %1167 = vst.msk [vmem:[#allocation3 + $0x70] sm:$0xff] %vm788_vm2, %v1143_v29  ;;  %6002 = vmatprep.mubr.msk.f32.mxu1 %vm788_vm2, %v7825_v33  ;;  %v1146_v40 = vmul.f32 %v1122_v30, %v374_v26  ;;  %v1121_v41 = vmax.f32 %v1067_v31, 0.0  ;;  %v1082_v43 = vadd.f32 %v5981_v37, %v7546_v9  ;;  %v380_v26 = vld [vmem:[%s10093_s0 + $0xb8] sm:$0xff] }
 0x1fd   : > { %6003 = vmatmul.mubr.msk.f32.gmra.mxu1 %vm788_vm2, %v7835_v42  ;;  %v1076_v46 = vpop.f32.mrf.mxu1  ;;  %v6346_v28 = vpack.i.bf16 %v7768_v62, %v7880_v12  ;;  %v6331_v37 = vpack.i.bf16 %v7752_v48, %v7896_v24 }
 0x1fe   : > { %6302 = vrot.lane.b32.xlu0 %v6301_v39, %s7275_s29  ;;  %1170 = vst.msk [vmem:[#allocation3 + $0x88] sm:$0xff] %vm788_vm2, %v1146_v40  ;;  %v1145_v51 = vmul.f32 %v1121_v41, %v373_v36  ;;  %v1124_v52 = vmax.f32 %v1082_v43, 0.0  ;;  %v1077_v53 = vadd.f32 %v7546_v9, %v1076_v46  ;;  %v379_v36 = vld [vmem:[%s10093_s0 + $0xb0] sm:$0xff] }
 0x1ff   : > { %v7854_v50 = vld [vmem:[#allocation3 + $0x59] sm:$0xff]  ;;  %v5984_v57 = vpop.f32.mrf.mxu1  ;;  %v7865_v61 = vld [vmem:[#allocation3 + $0x61] sm:$0xff]  ;;  %v7927_v41 = vld [vmem:[#allocation3 + $0x50] sm:$0xff] }
 0x200   : > { %6322 = vrot.lane.b32.xlu1 %v6321_v47, %s7274_s21  ;;  %1169 = vst.msk [vmem:[#allocation3 + $0x80] sm:$0xff] %vm788_vm2, %v1145_v51  ;;  %6005 = vmatprep.mubr.msk.f32.mxu1 %vm788_vm2, %v7854_v50  ;;  %v1148_v59 = vmul.f32 %v1124_v52, %v376_v45  ;;  %v1123_v60 = vmax.f32 %v1077_v53, 0.0  ;;  %v1092_v63 = vadd.f32 %v5984_v57, %v7546_v9  ;;  %v7939_v47 = vld [vmem:[#allocation3 + $0x58] sm:$0xff] }
 0x201   : > { %6006 = vmatmul.mubr.msk.f32.gmra.mxu1 %vm788_vm2, %v7865_v61  ;;  %v1086_v3 = vpop.f32.mrf.mxu1  ;;  %v6341_v45 = vpack.i.bf16 %v7737_v38, %v7797_v16  ;;  %v6366_v51 = vpack.i.bf16 %v7896_v24, %v7927_v41  ;;  %v7946_v52 = vld [vmem:[#allocation3 + $0x57] sm:$0xff] }
 0x202   : > { %6312 = vrot.lane.b32.xlu0 %v6311_v58, %s7274_s21  ;;  %1172 = vst.msk [vmem:[#allocation3 + $0x98] sm:$0xff] %vm788_vm2, %v1148_v59  ;;  %v1147_v6 = vmul.f32 %v1123_v60, %v375_v55  ;;  %v1126_v10 = vmax.f32 %v1092_v63, 0.0  ;;  %v1087_v11 = vadd.f32 %v7546_v9, %v1086_v3  ;;  %v6356_v55 = vpack.i.bf16 %v7880_v12, %v7939_v47  ;;  %v7957_v58 = vld [vmem:[#allocation3 + $0x4f] sm:$0xff] }
 0x203   : > { %v7882_v13 = vld [vmem:[#allocation3 + $0x69] sm:$0xff]  ;;  %v5987_v15 = vpop.f32.mrf.mxu1  ;;  %v7893_v21 = vld [vmem:[#allocation3 + $0x71] sm:$0xff]  ;;  %v6376_v59 = vpack.i.bf16 %v7797_v16, %v7946_v52  ;;  %v6361_v63 = vpack.i.bf16 %v7780_v5, %v7957_v58  ;;  %v6381_v3 = vpack.i.bf16 %v7852_v54, %v7835_v42  ;;  %v6371_v16 = vpack.i.bf16 %v7787_v8, %v7825_v33 }
 0x204   : > { %6337 = vrot.lane.b32.xlu1 %v6336_v4, %s7273_s12  ;;  %1171 = vst.msk [vmem:[#allocation3 + $0x90] sm:$0xff] %vm788_vm2, %v1147_v6  ;;  %6008 = vmatprep.mubr.msk.f32.mxu1 %vm788_vm2, %v7882_v13  ;;  %v1150_v19 = vmul.f32 %v1126_v10, %v378_v2  ;;  %v1125_v20 = vmax.f32 %v1087_v11, 0.0  ;;  %v1102_v22 = vadd.f32 %v5987_v15, %v7546_v9  ;;  %v7972_v4 = vld [vmem:[#allocation3 + $0x60] sm:$0xff]  ;;  %v7977_v6 = vld [vmem:[#allocation3 + $0x68] sm:$0xff] }
 0x205   : > { %6009 = vmatmul.mubr.msk.f32.gmra.mxu1 %vm788_vm2, %v7893_v21  ;;  %v1096_v27 = vpop.f32.mrf.mxu1  ;;  %v6396_v5 = vpack.i.bf16 %v7957_v58, %v7972_v4  ;;  %v7982_v10 = vld [vmem:[#allocation3 + $0x67] sm:$0xff]  ;;  %v6386_v11 = vpack.i.bf16 %v7946_v52, %v7977_v6 }
 0x206   : > { %6327 = vrot.lane.b32.xlu0 %v6326_v18, %s7273_s12  ;;  %1174 = vst.msk [vmem:[#allocation3 + $0xa8] sm:$0xff] %vm788_vm2, %v1150_v19  ;;  %v1149_v29 = vmul.f32 %v1125_v20, %v377_v14  ;;  %v1128_v30 = vmax.f32 %v1102_v22, 0.0  ;;  %v1097_v31 = vadd.f32 %v7546_v9, %v1096_v27  ;;  %v6351_v9 = vpack.i.bf16 %v7773_v0, %v7810_v23  ;;  %v7987_v14 = vld [vmem:[#allocation3 + $0x5f] sm:$0xff]  ;;  %v7998_v20 = vld [vmem:[#allocation3 + $0x70] sm:$0xff] }
 0x207   : > { %v7908_v32 = vld [vmem:[#allocation3 + $0x79] sm:$0xff]  ;;  %v7919_v40 = vld [vmem:[#allocation3 + $0x81] sm:$0xff]  ;;  %v6406_v15 = vpack.i.bf16 %v7825_v33, %v7982_v10  ;;  %v6391_v18 = vpack.i.bf16 %v7810_v23, %v7987_v14  ;;  %v6411_v19 = vpack.i.bf16 %v7927_v41, %v7865_v61  ;;  %v6401_v22 = vpack.i.bf16 %v7868_v1, %v7854_v50 }
 0x208   : > { %6347 = vrot.lane.b32.xlu1 %v6346_v28, %s7275_s29  ;;  %1173 = vst.msk [vmem:[#allocation3 + $0xa0] sm:$0xff] %vm788_vm2, %v1149_v29  ;;  %6011 = vmatprep.mubr.msk.f32.mxu1 %vm788_vm2, %v7908_v32  ;;  %v1152_v62 = vmul.f32 %v1128_v30, %v380_v26  ;;  %v1127_v39 = vmax.f32 %v1097_v31, 0.0  ;;  %v8003_v26 = vld [vmem:[#allocation3 + $0x78] sm:$0xff]  ;;  %v6426_v33 = vpack.i.bf16 %v7987_v14, %v7998_v20  ;;  %v8013_v28 = vld [vmem:[#allocation3 + $0x6f] sm:$0xff] }
 0x209   : > { %6012 = vmatmul.mubr.msk.f32.gmra.mxu1 %vm788_vm2, %v7919_v40  ;;  %v8008_v23 = vld [vmem:[#allocation3 + $0x77] sm:$0xff]  ;;  %v6416_v27 = vpack.i.bf16 %v7982_v10, %v8003_v26  ;;  %v6421_v30 = vpack.i.bf16 %v7835_v42, %v8013_v28  ;;  %v6441_v31 = vpack.i.bf16 %v7972_v4, %v7893_v21  ;;  %v8034_v42 = vld [vmem:[#allocation3 + $0x87] sm:$0xff] }
 0x20a   : > { %6332 = vrot.lane.b32.xlu0 %v6331_v37, %s7275_s29  ;;  %1176 = vst.msk [vmem:[#allocation3 + $0xb8] sm:$0xff] %vm788_vm2, %v1152_v62  ;;  %v1151_v48 = vmul.f32 %v1127_v39, %v379_v36  ;;  %v6436_v29 = vpack.i.bf16 %v7854_v50, %v8008_v23  ;;  %v8024_v36 = vld [vmem:[#allocation3 + $0x80] sm:$0xff]  ;;  %v6431_v37 = vpack.i.bf16 %v7939_v47, %v7882_v13  ;;  %v8029_v62 = vld [vmem:[#allocation3 + $0x88] sm:$0xff] }
 0x20b   : > { %v7929_v43 = vld [vmem:[#allocation3 + $0x89] sm:$0xff]  ;;  %v7937_v46 = vld [vmem:[#allocation3 + $0x91] sm:$0xff]  ;;  %v6456_v50 = vpack.i.bf16 %v8013_v28, %v8024_v36  ;;  %v6446_v39 = vpack.i.bf16 %v8008_v23, %v8029_v62 }
 0x20c   : > { %6352 = vrot.lane.b32.xlu1 %v6351_v9, %s7274_s21  ;;  %1175 = vst.msk [vmem:[#allocation3 + $0xb0] sm:$0xff] %vm788_vm2, %v1151_v48  ;;  %6014 = vmatprep.mubr.msk.f32.mxu1 %vm788_vm2, %v7929_v43  ;;  %v8039_v9 = vld [vmem:[#allocation3 + $0x7f] sm:$0xff]  ;;  %v6466_v48 = vpack.i.bf16 %v7882_v13, %v8034_v42 }
 0x20d   : > { %6015 = vmatmul.mubr.msk.f32.gmra.mxu1 %vm788_vm2, %v7937_v46 }
 0x20e   : > { %6342 = vrot.lane.b32.xlu0 %v6341_v45, %s7274_s21  ;;  %v6451_v45 = vpack.i.bf16 %v7865_v61, %v8039_v9  ;;  %v1231_v61 = vld [vmem:[#allocation3 + $0x97] sm:$0xff] }
 0x20f   : > { %v7948_v53 = vld [vmem:[#allocation3 + $0x99] sm:$0xff]  ;;  %v7955_v57 = vld [vmem:[#allocation3 + $0xa1] sm:$0xff] }
 0x210   : > { %6367 = vrot.lane.b32.xlu1 %v6366_v51, %s7273_s12  ;;  %6017 = vmatprep.mubr.msk.f32.mxu1 %vm788_vm2, %v7948_v53  ;;  %v6471_v51 = vpack.i.bf16 %v7998_v20, %v7919_v40 }
 0x211   : > { %6018 = vmatmul.mubr.msk.f32.gmra.mxu1 %vm788_vm2, %v7955_v57 }
 0x212   : > { %6357 = vrot.lane.b32.xlu0 %v6356_v55, %s7273_s12  ;;  %v8050_v55 = vld [vmem:[#allocation3 + $0x90] sm:$0xff] }
 0x213   : > { %v1241_v60 = vld [vmem:[#allocation3 + $0xa9] sm:$0xff]  ;;  %v1242_v2 = vld [vmem:[#allocation3 + $0xb1] sm:$0xff]  ;;  %v6486_v13 = vpack.i.bf16 %v8039_v9, %v8050_v55 }
 0x214   : > { %6377 = vrot.lane.b32.xlu1 %v6376_v59, %s7275_s29  ;;  %6020 = vmatprep.mubr.msk.f32.mxu1 %vm788_vm2, %v1241_v60  ;;  %v6461_v59 = vpack.i.bf16 %v7977_v6, %v7908_v32  ;;  %v8055_v60 = vld [vmem:[#allocation3 + $0x98] sm:$0xff] }
 0x215   : > { %6021 = vmatmul.mubr.msk.f32.gmra.mxu1 %vm788_vm2, %v1242_v2  ;;  %v8063_v2 = vld [vmem:[#allocation3 + $0x8f] sm:$0xff] }
 0x216   : > { %6362 = vrot.lane.b32.xlu0 %v6361_v63, %s7275_s29  ;;  %v6476_v63 = vpack.i.bf16 %v8034_v42, %v8055_v60 }
 0x218   : > { %6382 = vrot.lane.b32.xlu1 %v6381_v3, %s7274_s21  ;;  %v6496_v3 = vpack.i.bf16 %v7908_v32, %v1231_v61 }
 0x21a   : > { %6372 = vrot.lane.b32.xlu0 %v6371_v16, %s7274_s21  ;;  %v6481_v16 = vpack.i.bf16 %v7893_v21, %v8063_v2 }
 0x21c   : > { %6397 = vrot.lane.b32.xlu1 %v6396_v5, %s7273_s12  ;;  %v6501_v5 = vpack.i.bf16 %v8024_v36, %v7937_v46 }
 0x21e   : > { %6387 = vrot.lane.b32.xlu0 %v6386_v11, %s7273_s12  ;;  %v8073_v11 = vld [vmem:[#allocation3 + $0xa0] sm:$0xff] }
 0x21f   : > { %v6511_v32 = vpack.i.bf16 %v8063_v2, %v8073_v11 }
 0x220   : > { %6407 = vrot.lane.b32.xlu1 %v6406_v15, %s7275_s29  ;;  %v6491_v15 = vpack.i.bf16 %v8003_v26, %v7929_v43 }
 0x222   : > { %6392 = vrot.lane.b32.xlu0 %v6391_v18, %s7275_s29  ;;  %v1232_v18 = vld [vmem:[#allocation3 + $0x9f] sm:$0xff] }
 0x223   : > { %v6506_v21 = vpack.i.bf16 %v7919_v40, %v1232_v18  ;;  %v1238_v40 = vld [vmem:[#allocation3 + $0xaf] sm:$0xff] }
 0x224   : > { %6412 = vrot.lane.b32.xlu1 %v6411_v19, %s7274_s21  ;;  %v1237_v19 = vld [vmem:[#allocation3 + $0xa7] sm:$0xff] }
 0x226   : > { %6402 = vrot.lane.b32.xlu0 %v6401_v22, %s7274_s21  ;;  %v6526_v22 = vpack.i.bf16 %v7929_v43, %v1237_v19  ;;  %v5483_v43 = vld [vmem:[%s10083_s4 + $0x38] sm:$0xff] }
 0x227   : > { %6023 = vmatprep.subr.mxu1 %v5483_v43 }
 0x228   : > { %6427 = vrot.lane.b32.xlu1 %v6426_v33, %s7273_s12  ;;  %v6516_v33 = vpack.i.bf16 %v8029_v62, %v7948_v53  ;;  %v6536_v53 = vpack.i.bf16 %v7937_v46, %v1238_v40  ;;  %6024 = vmatpush3.msra.mxu1 %v5483_v43  ;;  %v1178_v40 = vld [vmem:[#allocation3 + $0xf] sm:$0xff] }
 0x22a   : > { %6417 = vrot.lane.b32.xlu0 %v6416_v27, %s7273_s12  ;;  %v1239_v27 = vld [vmem:[#allocation3 + $0xa8] sm:$0xff] }
 0x22c   : > { %6437 = vrot.lane.b32.xlu1 %v6436_v29, %s7275_s29  ;;  %v6531_v29 = vpack.i.bf16 %v8050_v55, %v7955_v57 }
 0x22e   : > { %6422 = vrot.lane.b32.xlu0 %v6421_v30, %s7275_s29  ;;  %v1240_v30 = vld [vmem:[#allocation3 + $0xb0] sm:$0xff] }
 0x230   : > { %6442 = vrot.lane.b32.xlu1 %v6441_v31, %s7274_s21  ;;  %v6521_v31 = vpack.i.bf16 %v1231_v61, %v1239_v27 }
 0x232   : > { %6432 = vrot.lane.b32.xlu0 %v6431_v37, %s7274_s21  ;;  %v6541_v37 = vpack.i.bf16 %v1232_v18, %v1240_v30 }
 0x234   : > { %6457 = vrot.lane.b32.xlu1 %v6456_v50, %s7273_s12 }
 0x236   : > { %6447 = vrot.lane.b32.xlu0 %v6446_v39, %s7273_s12 }
 0x238   : > { %6467 = vrot.lane.b32.xlu1 %v6466_v48, %s7275_s29 }
 0x23a   : > { %6452 = vrot.lane.b32.xlu0 %v6451_v45, %s7275_s29 }
 0x23c   : > { %6472 = vrot.lane.b32.xlu1 %v6471_v51, %s7274_s21 }
 0x23e   : > { %6462 = vrot.lane.b32.xlu0 %v6461_v59, %s7274_s21  ;;  %v1177_v59 = vld [vmem:[#allocation3 + $0x7] sm:$0xff] }
 0x240   : > { %6487 = vrot.lane.b32.xlu1 %v6486_v13, %s7273_s12 }
 0x242   : > { %6477 = vrot.lane.b32.xlu0 %v6476_v63, %s7273_s12 }
 0x244   : > { %6497 = vrot.lane.b32.xlu1 %v6496_v3, %s7275_s29 }
 0x246   : > { %6482 = vrot.lane.b32.xlu0 %v6481_v16, %s7275_s29 }
 0x248   : > { %6502 = vrot.lane.b32.xlu1 %v6501_v5, %s7274_s21 }
 0x24a   : > { %6492 = vrot.lane.b32.xlu0 %v6491_v15, %s7274_s21 }
 0x24c   : > { %6512 = vrot.lane.b32.xlu1 %v6511_v32, %s7273_s12 }
 0x24e   : > { %6507 = vrot.lane.b32.xlu0 %v6506_v21, %s7275_s29 }
 0x250   : > { %6527 = vrot.lane.b32.xlu1 %v6526_v22, %s7275_s29 }
 0x252   : > { %6517 = vrot.lane.b32.xlu0 %v6516_v33, %s7274_s21 }
 0x254   : > { %6532 = vrot.lane.b32.xlu1 %v6531_v29, %s7274_s21 }
 0x256   : > { %6522 = vrot.lane.b32.xlu0 %v6521_v31, %s7273_s12 }
 0x258   : > { %6542 = vrot.lane.b32.xlu1 %v6541_v37, %s7273_s12 }
 0x25a   : > { %6537 = vrot.lane.b32.xlu0 %v6536_v53, %s7275_s29 }
 0x262   : > { %v6278_v57 = vpop.permute.xlu1 %6277 }
 0x263   : > { %v6280_v63 = vunpack.i.h.bf16 %v6278_v57  ;;  %v6279_v3 = vunpack.i.l.bf16 %v6278_v57 }
 0x264   : > { %v6283_v50 = vpop.permute.xlu0 %6282 }
 0x265   : > { %v6285_v39 = vunpack.i.h.bf16 %v6283_v50  ;;  %v6284_v48 = vunpack.i.l.bf16 %v6283_v50 }
 0x266   : > { %v6293_v45 = vpop.permute.xlu1 %6292 }
 0x267   : > { %v1629_v16 = vsel %vm788_vm2, %v1177_v59, %v6285_v39  ;;  %v1685_v5 = vsel %vm788_vm2, %v7848_v49, %v6284_v48  ;;  %v6295_v22 = vunpack.i.h.bf16 %v6293_v45  ;;  %v6294_v33 = vunpack.i.l.bf16 %v6293_v45 }
 0x268   : > { %v6288_v51 = vpop.permute.xlu0 %6287 }
 0x269   : > { %v6290_v13 = vunpack.i.h.bf16 %v6288_v51  ;;  %v6289_v61 = vunpack.i.l.bf16 %v6288_v51  ;;  %v1686_v53 = vsel %vm788_vm2, %v7838_v44, %v6294_v33  ;;  %v1630_v57 = vsel %vm788_vm2, %v1178_v40, %v6295_v22 }
 0x26a   : > { %v6308_v46 = vpop.permute.xlu1 %6307 }
 0x26b   : > { %v1703_v15 = vsel %vm1647_vm3, %v1685_v5, %v6289_v61  ;;  %v1648_v18 = vsel %vm1647_vm3, %v1629_v16, %v6290_v13  ;;  %v6310_v37 = vunpack.i.h.bf16 %v6308_v46  ;;  %v6309_v49 = vunpack.i.l.bf16 %v6308_v46 }
 0x26c   : > { %v6298_v32 = vpop.permute.xlu0 %6297  ;;  %v1721_v19 = vsel %vm1666_vm4, %v1703_v15, %v6279_v3  ;;  %v1667_v21 = vsel %vm1666_vm4, %v1648_v18, %v6280_v63 }
 0x26d   : > { %1884 = vmatprep.mubr.f32.mxu0 %v1721_v19  ;;  %v6300_v16 = vunpack.i.h.bf16 %v6298_v32  ;;  %v6299_v44 = vunpack.i.l.bf16 %v6298_v32 }
 0x26e   : > { %1885 = vmatmul.mubr.f32.vlgmr.msra.gmra.mxu0 %v1667_v21  ;;  %v6318_v27 = vpop.permute.xlu1 %6317 }
 0x26f   : > { %v6320_v61 = vunpack.i.h.bf16 %v6318_v27  ;;  %v6319_v63 = vunpack.i.l.bf16 %v6318_v27 }
 0x270   : > { %v6303_v29 = vpop.permute.xlu0 %6302 }
 0x271   : > { %v6305_v30 = vunpack.i.h.bf16 %v6303_v29  ;;  %v6304_v31 = vunpack.i.l.bf16 %v6303_v29 }
 0x272   : > { %v6323_v43 = vpop.permute.xlu1 %6322 }
 0x273   : > { %v1704_v50 = vsel %vm1647_vm3, %v1686_v53, %v6304_v31  ;;  %v1649_v39 = vsel %vm1647_vm3, %v1630_v57, %v6305_v30  ;;  %v6325_v33 = vunpack.i.h.bf16 %v6323_v43  ;;  %v6324_v27 = vunpack.i.l.bf16 %v6323_v43 }
 0x274   : > { %v6313_v48 = vpop.permute.xlu0 %6312  ;;  %v1722_v45 = vsel %vm1666_vm4, %v1704_v50, %v6309_v49  ;;  %v1668_v51 = vsel %vm1666_vm4, %v1649_v39, %v6310_v37 }
 0x275   : > { %v6315_v59 = vunpack.i.h.bf16 %v6313_v48  ;;  %v6314_v13 = vunpack.i.l.bf16 %v6313_v48  ;;  %1889 = vmatprep.mubr.f32.mxu0 %v1722_v45  ;;  %v1688_v37 = vsel %vm788_vm2, %v7773_v0, %v6324_v27  ;;  %v1632_v49 = vsel %vm788_vm2, %v7785_v7, %v6325_v33 }
 0x276   : > { %1890 = vmatmul.mubr.f32.gmra.mxu0 %v1668_v51  ;;  %v6338_v3 = vpop.permute.xlu1 %6337 }
 0x277   : > { %v1687_v46 = vsel %vm788_vm2, %v7737_v38, %v6314_v13  ;;  %v1631_v5 = vsel %vm788_vm2, %v7732_v34, %v6315_v59  ;;  %v6340_v31 = vunpack.i.h.bf16 %v6338_v3  ;;  %v6339_v40 = vunpack.i.l.bf16 %v6338_v3 }
 0x278   : > { %v6328_v15 = vpop.permute.xlu0 %6327  ;;  %v1705_v18 = vsel %vm1647_vm3, %v1687_v46, %v6319_v63  ;;  %v1650_v19 = vsel %vm1647_vm3, %v1631_v5, %v6320_v61 }
 0x279   : > { %v1723_v21 = vsel %vm1666_vm4, %v1705_v18, %v6299_v44  ;;  %v1669_v22 = vsel %vm1666_vm4, %v1650_v19, %v6300_v16  ;;  %v6330_v0 = vunpack.i.h.bf16 %v6328_v15  ;;  %v6329_v61 = vunpack.i.l.bf16 %v6328_v15 }
 0x27a   : > { %1894 = vmatprep.mubr.f32.mxu0 %v1723_v21  ;;  %v6348_v29 = vpop.permute.xlu1 %6347 }
 0x27b   : > { %1895 = vmatmul.mubr.f32.gmra.mxu0 %v1669_v22  ;;  %v6350_v51 = vunpack.i.h.bf16 %v6348_v29  ;;  %v6349_v59 = vunpack.i.l.bf16 %v6348_v29 }
 0x27c   : > { %v6333_v32 = vpop.permute.xlu0 %6332 }
 0x27d   : > { %v6335_v30 = vunpack.i.h.bf16 %v6333_v32  ;;  %v6334_v38 = vunpack.i.l.bf16 %v6333_v32 }
 0x27e   : > { %v6353_v34 = vpop.permute.xlu1 %6352 }
 0x27f   : > { %v1706_v53 = vsel %vm1647_vm3, %v1688_v37, %v6334_v38  ;;  %v1651_v57 = vsel %vm1647_vm3, %v1632_v49, %v6335_v30  ;;  %v6355_v18 = vunpack.i.h.bf16 %v6353_v34  ;;  %v6354_v19 = vunpack.i.l.bf16 %v6353_v34 }
 0x280   : > { %v6343_v43 = vpop.permute.xlu0 %6342  ;;  %v1724_v50 = vsel %vm1666_vm4, %v1706_v53, %v6339_v40  ;;  %v1670_v39 = vsel %vm1666_vm4, %v1651_v57, %v6340_v31 }
 0x281   : > { %v6345_v48 = vunpack.i.h.bf16 %v6343_v43  ;;  %v6344_v45 = vunpack.i.l.bf16 %v6343_v43  ;;  %1899 = vmatprep.mubr.f32.mxu0 %v1724_v50  ;;  %v1690_v29 = vsel %vm788_vm2, %v7852_v54, %v6354_v19  ;;  %v1634_v32 = vsel %vm788_vm2, %v7813_v25, %v6355_v18 }
 0x282   : > { %v6368_v13 = vpop.permute.xlu1 %6367  ;;  %1900 = vmatmul.mubr.f32.gmra.mxu0 %v1670_v39 }
 0x283   : > { %v1689_v7 = vsel %vm788_vm2, %v7787_v8, %v6344_v45  ;;  %v1633_v63 = vsel %vm788_vm2, %v7762_v56, %v6345_v48  ;;  %v6370_v33 = vunpack.i.h.bf16 %v6368_v13  ;;  %v6369_v27 = vunpack.i.l.bf16 %v6368_v13 }
 0x284   : > { %v6358_v3 = vpop.permute.xlu0 %6357  ;;  %v1707_v16 = vsel %vm1647_vm3, %v1689_v7, %v6349_v59  ;;  %v1652_v44 = vsel %vm1647_vm3, %v1633_v63, %v6350_v51 }
 0x285   : > { %v1725_v46 = vsel %vm1666_vm4, %v1707_v16, %v6329_v61  ;;  %v1671_v5 = vsel %vm1666_vm4, %v1652_v44, %v6330_v0  ;;  %v6360_v54 = vunpack.i.h.bf16 %v6358_v3  ;;  %v6359_v50 = vunpack.i.l.bf16 %v6358_v3 }
 0x286   : > { %v6378_v21 = vpop.permute.xlu1 %6377  ;;  %1904 = vmatprep.mubr.f32.mxu0 %v1725_v46 }
 0x287   : > { %1905 = vmatmul.mubr.f32.gmra.mxu0 %v1671_v5  ;;  %v6380_v53 = vunpack.i.h.bf16 %v6378_v21  ;;  %v6379_v57 = vunpack.i.l.bf16 %v6378_v21 }
 0x288   : > { %v6363_v15 = vpop.permute.xlu0 %6362 }
 0x289   : > { %v6365_v22 = vunpack.i.h.bf16 %v6363_v15  ;;  %v6364_v8 = vunpack.i.l.bf16 %v6363_v15 }
 0x28a   : > { %v6383_v56 = vpop.permute.xlu1 %6382 }
 0x28b   : > { %v1708_v30 = vsel %vm1647_vm3, %v1690_v29, %v6364_v8  ;;  %v1653_v38 = vsel %vm1647_vm3, %v1634_v32, %v6365_v22  ;;  %v6385_v0 = vunpack.i.h.bf16 %v6383_v56  ;;  %v6384_v61 = vunpack.i.l.bf16 %v6383_v56 }
 0x28c   : > { %v6373_v31 = vpop.permute.xlu0 %6372  ;;  %v1726_v40 = vsel %vm1666_vm4, %v1708_v30, %v6369_v27  ;;  %v1672_v34 = vsel %vm1666_vm4, %v1653_v38, %v6370_v33 }
 0x28d   : > { %v6375_v37 = vunpack.i.h.bf16 %v6373_v31  ;;  %v6374_v49 = vunpack.i.l.bf16 %v6373_v31  ;;  %1909 = vmatprep.mubr.f32.mxu0 %v1726_v40  ;;  %v1692_v46 = vsel %vm788_vm2, %v7927_v41, %v6384_v61  ;;  %v1636_v5 = vsel %vm788_vm2, %v7896_v24, %v6385_v0 }
 0x28e   : > { %1910 = vmatmul.mubr.f32.gmra.mxu0 %v1672_v34  ;;  %v6398_v43 = vpop.permute.xlu1 %6397 }
 0x28f   : > { %v1691_v25 = vsel %vm788_vm2, %v7868_v1, %v6374_v49  ;;  %v1635_v39 = vsel %vm788_vm2, %v7799_v17, %v6375_v37  ;;  %v6400_v16 = vunpack.i.h.bf16 %v6398_v43  ;;  %v6399_v44 = vunpack.i.l.bf16 %v6398_v43 }
 0x290   : > { %v6388_v48 = vpop.permute.xlu0 %6387  ;;  %v1709_v45 = vsel %vm1647_vm3, %v1691_v25, %v6379_v57  ;;  %v1654_v51 = vsel %vm1647_vm3, %v1635_v39, %v6380_v53 }
 0x291   : > { %v1727_v59 = vsel %vm1666_vm4, %v1709_v45, %v6359_v50  ;;  %v1673_v13 = vsel %vm1666_vm4, %v1654_v51, %v6360_v54  ;;  %v6390_v41 = vunpack.i.h.bf16 %v6388_v48  ;;  %v6389_v32 = vunpack.i.l.bf16 %v6388_v48 }
 0x292   : > { %1914 = vmatprep.mubr.f32.mxu0 %v1727_v59  ;;  %v6408_v7 = vpop.permute.xlu1 %6407 }
 0x293   : > { %1915 = vmatmul.mubr.f32.gmra.mxu0 %v1673_v13  ;;  %v6410_v27 = vunpack.i.h.bf16 %v6408_v7  ;;  %v6409_v56 = vunpack.i.l.bf16 %v6408_v7 }
 0x294   : > { %v6393_v63 = vpop.permute.xlu0 %6392 }
 0x295   : > { %v6395_v3 = vunpack.i.h.bf16 %v6393_v63  ;;  %v6394_v1 = vunpack.i.l.bf16 %v6393_v63 }
 0x296   : > { %v6413_v17 = vpop.permute.xlu1 %6412 }
 0x297   : > { %v1710_v18 = vsel %vm1647_vm3, %v1692_v46, %v6394_v1  ;;  %v1655_v19 = vsel %vm1647_vm3, %v1636_v5, %v6395_v3  ;;  %v6415_v49 = vunpack.i.h.bf16 %v6413_v17  ;;  %v6414_v53 = vunpack.i.l.bf16 %v6413_v17 }
 0x298   : > { %v6403_v21 = vpop.permute.xlu0 %6402  ;;  %v1728_v15 = vsel %vm1666_vm4, %v1710_v18, %v6399_v44  ;;  %v1674_v22 = vsel %vm1666_vm4, %v1655_v19, %v6400_v16 }
 0x299   : > { %v6405_v8 = vunpack.i.h.bf16 %v6403_v21  ;;  %v6404_v33 = vunpack.i.l.bf16 %v6403_v21  ;;  %1919 = vmatprep.mubr.f32.mxu0 %v1728_v15  ;;  %v1694_v39 = vsel %vm788_vm2, %v7972_v4, %v6414_v53  ;;  %v1638_v48 = vsel %vm788_vm2, %v7957_v58, %v6415_v49 }
 0x29a   : > { %v6428_v29 = vpop.permute.xlu1 %6427  ;;  %1920 = vmatmul.mubr.f32.gmra.mxu0 %v1674_v22 }
 0x29b   : > { %v1693_v24 = vsel %vm788_vm2, %v7939_v47, %v6404_v33  ;;  %v1637_v30 = vsel %vm788_vm2, %v7880_v12, %v6405_v8  ;;  %v6430_v50 = vunpack.i.h.bf16 %v6428_v29  ;;  %v6429_v25 = vunpack.i.l.bf16 %v6428_v29 }
 0x29c   : > { %v6418_v38 = vpop.permute.xlu0 %6417  ;;  %v1711_v31 = vsel %vm1647_vm3, %v1693_v24, %v6409_v56  ;;  %v1656_v40 = vsel %vm1647_vm3, %v1637_v30, %v6410_v27 }
 0x29d   : > { %v1729_v34 = vsel %vm1666_vm4, %v1711_v31, %v6389_v32  ;;  %v1675_v37 = vsel %vm1666_vm4, %v1656_v40, %v6390_v41  ;;  %v6420_v4 = vunpack.i.h.bf16 %v6418_v38  ;;  %v6419_v16 = vunpack.i.l.bf16 %v6418_v38 }
 0x29e   : > { %v6438_v57 = vpop.permute.xlu1 %6437  ;;  %1924 = vmatprep.mubr.f32.mxu0 %v1729_v34 }
 0x29f   : > { %1925 = vmatmul.mubr.f32.gmra.mxu0 %v1675_v37  ;;  %v6440_v63 = vunpack.i.h.bf16 %v6438_v57  ;;  %v6439_v3 = vunpack.i.l.bf16 %v6438_v57 }
 0x2a0   : > { %v6423_v43 = vpop.permute.xlu0 %6422 }
 0x2a1   : > { %v6425_v54 = vunpack.i.h.bf16 %v6423_v43  ;;  %v6424_v47 = vunpack.i.l.bf16 %v6423_v43 }
 0x2a2   : > { %v6443_v12 = vpop.permute.xlu1 %6442 }
 0x2a3   : > { %v1712_v45 = vsel %vm1647_vm3, %v1694_v39, %v6424_v47  ;;  %v1657_v51 = vsel %vm1647_vm3, %v1638_v48, %v6425_v54  ;;  %v6445_v21 = vunpack.i.h.bf16 %v6443_v12  ;;  %v6444_v15 = vunpack.i.l.bf16 %v6443_v12 }
 0x2a4   : > { %v6433_v59 = vpop.permute.xlu0 %6432  ;;  %v1730_v13 = vsel %vm1666_vm4, %v1712_v45, %v6429_v25  ;;  %v1676_v0 = vsel %vm1666_vm4, %v1657_v51, %v6430_v50 }
 0x2a5   : > { %v6435_v61 = vunpack.i.h.bf16 %v6433_v59  ;;  %v6434_v7 = vunpack.i.l.bf16 %v6433_v59  ;;  %1929 = vmatprep.mubr.f32.mxu0 %v1730_v13  ;;  %v1696_v29 = vsel %vm788_vm2, %v7998_v20, %v6444_v15  ;;  %v1640_v41 = vsel %vm788_vm2, %v7987_v14, %v6445_v21  ;;  %v5481_v13 = vld [vmem:[%s10083_s4 + $0x28] sm:$0xff] }
 0x2a6   : > { %1930 = vmatmul.mubr.f32.gmra.mxu0 %v1676_v0  ;;  %v6458_v1 = vpop.permute.xlu1 %6457 }
 0x2a7   : > { %v1695_v58 = vsel %vm788_vm2, %v7977_v6, %v6434_v7  ;;  %v1639_v44 = vsel %vm788_vm2, %v7946_v52, %v6435_v61  ;;  %v6460_v27 = vunpack.i.h.bf16 %v6458_v1  ;;  %v6459_v56 = vunpack.i.l.bf16 %v6458_v1 }
 0x2a8   : > { %v6448_v17 = vpop.permute.xlu0 %6447  ;;  %v1713_v46 = vsel %vm1647_vm3, %v1695_v58, %v6439_v3  ;;  %v1658_v5 = vsel %vm1647_vm3, %v1639_v44, %v6440_v63 }
 0x2a9   : > { %v1731_v18 = vsel %vm1666_vm4, %v1713_v46, %v6419_v16  ;;  %v1677_v19 = vsel %vm1666_vm4, %v1658_v5, %v6420_v4  ;;  %v6450_v20 = vunpack.i.h.bf16 %v6448_v17  ;;  %v6449_v57 = vunpack.i.l.bf16 %v6448_v17  ;;  %v5480_v16 = vld [vmem:[%s10083_s4 + $0x20] sm:$0xff] }
 0x2aa   : > { %1934 = vmatprep.mubr.f32.mxu0 %v1731_v18  ;;  %v6468_v22 = vpop.permute.xlu1 %6467 }
 0x2ab   : > { %1935 = vmatmul.mubr.f32.gmra.mxu0 %v1677_v19  ;;  %v6470_v37 = vunpack.i.h.bf16 %v6468_v22  ;;  %v6469_v49 = vunpack.i.l.bf16 %v6468_v22 }
 0x2ac   : > { %v6453_v8 = vpop.permute.xlu0 %6452 }
 0x2ad   : > { %v6455_v33 = vunpack.i.h.bf16 %v6453_v8  ;;  %v6454_v6 = vunpack.i.l.bf16 %v6453_v8 }
 0x2ae   : > { %v6473_v52 = vpop.permute.xlu1 %6472 }
 0x2af   : > { %v1714_v32 = vsel %vm1647_vm3, %v1696_v29, %v6454_v6  ;;  %v1659_v24 = vsel %vm1647_vm3, %v1640_v41, %v6455_v33  ;;  %v6475_v39 = vunpack.i.h.bf16 %v6473_v52  ;;  %v6474_v48 = vunpack.i.l.bf16 %v6473_v52  ;;  %v2204_v41 = vld [vmem:[#allocation2 + $0x10] sm:$0xff] }
 0x2b0   : > { %v6463_v30 = vpop.permute.xlu0 %6462  ;;  %v1732_v38 = vsel %vm1666_vm4, %v1714_v32, %v6459_v56  ;;  %v1678_v31 = vsel %vm1666_vm4, %v1659_v24, %v6460_v27 }
 0x2b1   : > { %v6465_v40 = vunpack.i.h.bf16 %v6463_v30  ;;  %v6464_v34 = vunpack.i.l.bf16 %v6463_v30  ;;  %1939 = vmatprep.mubr.f32.mxu0 %v1732_v38  ;;  %v1698_v63 = vsel %vm788_vm2, %v8024_v36, %v6474_v48  ;;  %v1642_v3 = vsel %vm788_vm2, %v8013_v28, %v6475_v39  ;;  %v2202_v36 = vld [vmem:[#allocation2] sm:$0xff]  ;;  %v2203_v28 = vld [vmem:[#allocation2 + $0x8] sm:$0xff] }
 0x2b2   : > { %v6488_v53 = vpop.permute.xlu1 %6487  ;;  %1940 = vmatmul.mubr.f32.gmra.mxu0 %v1678_v31  ;;  %6031 = vmatprep.mubr.msk.f32.mxu1 %vm788_vm2, %v2202_v36 }
 0x2b3   : > { %v1697_v14 = vsel %vm788_vm2, %v8003_v26, %v6464_v34  ;;  %v1641_v43 = vsel %vm788_vm2, %v7982_v10, %v6465_v40  ;;  %v5482_v26 = vld [vmem:[%s10083_s4 + $0x30] sm:$0xff]  ;;  %v6490_v0 = vunpack.i.h.bf16 %v6488_v53  ;;  %v6489_v61 = vunpack.i.l.bf16 %v6488_v53 }
 0x2b4   : > { %v6478_v54 = vpop.permute.xlu0 %6477  ;;  %v1715_v47 = vsel %vm1647_vm3, %v1697_v14, %v6469_v49  ;;  %v1660_v50 = vsel %vm1647_vm3, %v1641_v43, %v6470_v37  ;;  %6025 = vmatprep.subr.mxu1 %v5482_v26 }
 0x2b5   : > { %v1733_v25 = vsel %vm1666_vm4, %v1715_v47, %v6449_v57  ;;  %v1679_v12 = vsel %vm1666_vm4, %v1660_v50, %v6450_v20  ;;  %6026 = vmatpush3.msra.mxu1 %v5482_v26  ;;  %v6480_v8 = vunpack.i.h.bf16 %v6478_v54  ;;  %v6479_v33 = vunpack.i.l.bf16 %v6478_v54 }
 0x2b6   : > { %v6498_v45 = vpop.permute.xlu1 %6497  ;;  %1944 = vmatprep.mubr.f32.mxu0 %v1733_v25  ;;  %6027 = vmatprep.subr.mxu1 %v5481_v13 }
 0x2b7   : > { %1945 = vmatmul.mubr.f32.gmra.mxu0 %v1679_v12  ;;  %6028 = vmatpush3.msra.mxu1 %v5481_v13  ;;  %v6500_v18 = vunpack.i.h.bf16 %v6498_v45  ;;  %v6499_v19 = vunpack.i.l.bf16 %v6498_v45 }
 0x2b8   : > { %v6483_v51 = vpop.permute.xlu0 %6482  ;;  %6029 = vmatprep.subr.mxu1 %v5480_v16 }
 0x2b9   : > { %v6485_v10 = vunpack.i.h.bf16 %v6483_v51  ;;  %v6484_v59 = vunpack.i.l.bf16 %v6483_v51  ;;  %6030 = vmatpush3.msra.mxu1 %v5480_v16 }
 0x2ba   : > { %v6503_v7 = vpop.permute.xlu1 %6502  ;;  %6032 = vmatmul.mubr.msk.f32.vlgmr.msra.gmra.mxu1 %vm788_vm2, %v2203_v28 }
 0x2bb   : > { %v1716_v1 = vsel %vm1647_vm3, %v1698_v63, %v6484_v59  ;;  %v1661_v4 = vsel %vm1647_vm3, %v1642_v3, %v6485_v10  ;;  %v6505_v21 = vunpack.i.h.bf16 %v6503_v7  ;;  %v6504_v15 = vunpack.i.l.bf16 %v6503_v7  ;;  %6034 = vmatprep.mubr.msk.f32.mxu1 %vm788_vm2, %v2204_v41 }
 0x2bc   : > { %v6493_v58 = vpop.permute.xlu0 %6492  ;;  %v1734_v44 = vsel %vm1666_vm4, %v1716_v1, %v6489_v61  ;;  %v1680_v17 = vsel %vm1666_vm4, %v1661_v4, %v6490_v0 }
 0x2bd   : > { %v6495_v46 = vunpack.i.h.bf16 %v6493_v58  ;;  %v6494_v5 = vunpack.i.l.bf16 %v6493_v58  ;;  %1949 = vmatprep.mubr.f32.mxu0 %v1734_v44  ;;  %v1644_v40 = vsel %vm788_vm2, %v8039_v9, %v6505_v21  ;;  %v5998_v44 = vpop.f32.mrf.mxu1 }
 0x2be   : > { %v6513_v22 = vpop.permute.xlu1 %6512  ;;  %1950 = vmatmul.mubr.f32.gmra.mxu0 %v1680_v17  ;;  %v8256_v17 = vld [vmem:[%s10086_s7] ss:$0 sm:$0xff] }
 0x2bf   : > { %v1699_v6 = vsel %vm788_vm2, %v8029_v62, %v6494_v5  ;;  %v1643_v27 = vsel %vm788_vm2, %v8008_v23, %v6495_v46  ;;  %v6514_v62 = vunpack.i.l.bf16 %v6513_v22  ;;  %v1700_v23 = vsel %vm788_vm2, %v8050_v55, %v6504_v15  ;;  %v7087_v15 = vld [vmem:[#allocation2 + $0x18] sm:$0xff] }
 0x2c0   : > { %v6508_v56 = vpop.permute.xlu0 %6507  ;;  %v1717_v52 = vsel %vm1647_vm3, %v1699_v6, %v6499_v19  ;;  %v1662_v29 = vsel %vm1647_vm3, %v1643_v27, %v6500_v18  ;;  %v6515_v49 = vunpack.i.h.bf16 %v6513_v22  ;;  %v8262_v18 = vld [vmem:[%s10093_s0 + $0x18] sm:$0xff] }
 0x2c1   : > { %v6510_v32 = vunpack.i.h.bf16 %v6508_v56  ;;  %v6509_v24 = vunpack.i.l.bf16 %v6508_v56  ;;  %v1735_v30 = vsel %vm1666_vm4, %v1717_v52, %v6479_v33  ;;  %v1681_v38 = vsel %vm1666_vm4, %v1662_v29, %v6480_v8 }
 0x2c2   : > { %v6528_v31 = vpop.permute.xlu1 %6527  ;;  %1954 = vmatprep.mubr.f32.mxu0 %v1735_v30 }
 0x2c3   : > { %1955 = vmatmul.mubr.f32.gmra.mxu0 %v1681_v38  ;;  %v1718_v34 = vsel %vm1647_vm3, %v1700_v23, %v6509_v24  ;;  %v1663_v37 = vsel %vm1647_vm3, %v1644_v40, %v6510_v32  ;;  %v6530_v47 = vunpack.i.h.bf16 %v6528_v31  ;;  %v6529_v50 = vunpack.i.l.bf16 %v6528_v31  ;;  %v8271_v32 = vld [vmem:[%s10093_s0 + $0x20] sm:$0xff] }
 0x2c4   : > { %v6518_v53 = vpop.permute.xlu0 %6517  ;;  %v1736_v20 = vsel %vm1666_vm4, %v1718_v34, %v6514_v62  ;;  %v1682_v54 = vsel %vm1666_vm4, %v1663_v37, %v6515_v49  ;;  %v7089_v62 = vld [vmem:[#allocation2 + $0x20] sm:$0xff]  ;;  %v8279_v34 = vld [vmem:[%s10093_s0 + $0x28] sm:$0xff] }
 0x2c5   : > { %v6520_v57 = vunpack.i.h.bf16 %v6518_v53  ;;  %v6519_v14 = vunpack.i.l.bf16 %v6518_v53  ;;  %1959 = vmatprep.mubr.f32.mxu0 %v1736_v20  ;;  %v7091_v20 = vld [vmem:[#allocation2 + $0x28] sm:$0xff] }
 0x2c6   : > { %v6533_v43 = vpop.permute.xlu1 %6532 }
 0x2c7   : > { %1960 = vmatmul.mubr.f32.gmra.mxu0 %v1682_v54  ;;  %v1701_v55 = vsel %vm788_vm2, %v8055_v60, %v6519_v14  ;;  %v1645_v9 = vsel %vm788_vm2, %v8034_v42, %v6520_v57  ;;  %v6535_v48 = vunpack.i.h.bf16 %v6533_v43  ;;  %v6534_v45 = vunpack.i.l.bf16 %v6533_v43 }
 0x2c8   : > { %v6523_v25 = vpop.permute.xlu0 %6522  ;;  %v1719_v26 = vsel %vm1647_vm3, %v1701_v55, %v6529_v50  ;;  %v1664_v51 = vsel %vm1647_vm3, %v1645_v9, %v6530_v47 }
 0x2c9   : > { %v6525_v12 = vunpack.i.h.bf16 %v6523_v25  ;;  %v6524_v39 = vunpack.i.l.bf16 %v6523_v25  ;;  %v1702_v63 = vsel %vm788_vm2, %v8073_v11, %v6534_v45  ;;  %v1646_v3 = vsel %vm788_vm2, %v8063_v2, %v6535_v48  ;;  %v2041_v2 = vpop.f32.mrf.mxu1 }
 0x2ca   : > { %v6543_v10 = vpop.permute.xlu1 %6542 }
 0x2cb   : > { %v1737_v59 = vsel %vm1666_vm4, %v1719_v26, %v6524_v39  ;;  %v1683_v13 = vsel %vm1666_vm4, %v1664_v51, %v6525_v12  ;;  %v6545_v61 = vunpack.i.h.bf16 %v6543_v10  ;;  %v6544_v7 = vunpack.i.l.bf16 %v6543_v10  ;;  %v6001_v6 = vpop.f32.mrf.mxu1  ;;  %v8288_v12 = vld [vmem:[%s10093_s0 + $0x30] sm:$0xff] }
 0x2cc   : > { %v6538_v60 = vpop.permute.xlu0 %6537  ;;  %1964 = vmatprep.mubr.f32.mxu0 %v1737_v59  ;;  %v7093_v26 = vld [vmem:[#allocation2 + $0x30] sm:$0xff] }
 0x2cd   : > { %v6540_v0 = vunpack.i.h.bf16 %v6538_v60  ;;  %v6539_v42 = vunpack.i.l.bf16 %v6538_v60  ;;  %1965 = vmatmul.mubr.f32.gmra.mxu0 %v1683_v13  ;;  %v2051_v41 = vpop.f32.mrf.mxu1  ;;  %v8296_v13 = vld [vmem:[%s10093_s0 + $0x38] sm:$0xff] }
 0x2cf   : > { %v1720_v1 = vsel %vm1647_vm3, %v1702_v63, %v6539_v42  ;;  %v1665_v4 = vsel %vm1647_vm3, %v1646_v3, %v6540_v0  ;;  %v6004_v43 = vpop.f32.mrf.mxu1 }
 0x2d0   : > { %v1738_v16 = vsel %vm1666_vm4, %v1720_v1, %v6544_v7  ;;  %v1684_v58 = vsel %vm1666_vm4, %v1665_v4, %v6545_v61  ;;  %v7095_v61 = vld [vmem:[#allocation2 + $0x38] sm:$0xff] }
 0x2d1   : > { %1969 = vmatprep.mubr.f32.mxu0 %v1738_v16  ;;  %v2061_v25 = vpop.f32.mrf.mxu1 }
 0x2d2   : > { %1970 = vmatmul.mubr.f32.gmra.mxu0 %v1684_v58 }
 0x2d3   : > { %v6007_v3 = vpop.f32.mrf.mxu1 }
 0x32e   : > { %v1886_v11 = vpop.f32.mrf.mxu0 }
 0x32f   : > { %v1887_v36 = vadd.f32 %v8256_v17, %v1886_v11  ;;  %v2071_v11 = vpop.f32.mrf.mxu1 }
 0x330   : > { %v1888_v46 = vpop.f32.mrf.mxu0 }
 0x331   : > { %v2042_v5 = vadd.f32 %v2041_v2, %v1887_v36  ;;  %v8306_v36 = vld [vmem:[%s10093_s0 + $0x40] sm:$0xff] }
 0x333   : > { %v2130_v28 = vmax.f32 %v2042_v5, 0.0 }
 0x335   : > { %v2148_v19 = vmul.f32 %v8262_v18, %v2130_v28  ;;  %v7097_v28 = vld [vmem:[#allocation2 + $0x40] sm:$0xff] }
 0x336   : > { %v1891_v21 = vpop.f32.mrf.mxu0 }
 0x337   : > { %v2166_v22 = vadd.f32 %v7087_v15, %v2148_v19  ;;  %v1892_v8 = vadd.f32 %v8256_v17, %v1891_v21 }
 0x338   : > { %v1893_v33 = vpop.f32.mrf.mxu0 }
 0x339   : > { %2184 = vst.msk [vmem:[#allocation2 + $0x18] sm:$0xff] %vm788_vm2, %v2166_v22  ;;  %v2047_v27 = vadd.f32 %v5998_v44, %v1892_v8  ;;  %v8314_v22 = vld [vmem:[%s10093_s0 + $0x48] sm:$0xff] }
 0x33b   : > { %v2131_v56 = vmax.f32 %v2047_v27, 0.0  ;;  %v1896_v52 = vpop.f32.mrf.mxu0  ;;  %v7099_v27 = vld [vmem:[#allocation2 + $0x48] sm:$0xff] }
 0x33c   : > { %v1897_v29 = vadd.f32 %v8256_v17, %v1896_v52 }
 0x33d   : > { %v2149_v24 = vmul.f32 %v8271_v32, %v2131_v56  ;;  %v1898_v30 = vpop.f32.mrf.mxu0 }
 0x33e   : > { %v2052_v38 = vadd.f32 %v2051_v41, %v1897_v29  ;;  %v6010_v29 = vpop.f32.mrf.mxu1 }
 0x33f   : > { %v2167_v31 = vadd.f32 %v7089_v62, %v2149_v24 }
 0x340   : > { %v2132_v23 = vmax.f32 %v2052_v38, 0.0  ;;  %v2205_v40 = vld [vmem:[#allocation2 + $0x18] sm:$0xff] }
 0x341   : > { %2185 = vst.msk [vmem:[#allocation2 + $0x20] sm:$0xff] %vm788_vm2, %v2167_v31  ;;  %6035 = vmatmul.mubr.msk.f32.gmra.mxu1 %vm788_vm2, %v2205_v40  ;;  %v2081_v31 = vpop.f32.mrf.mxu1 }
 0x342   : > { %v2150_v37 = vmul.f32 %v8279_v34, %v2132_v23  ;;  %v1901_v49 = vpop.f32.mrf.mxu0  ;;  %v8324_v23 = vld [vmem:[%s10093_s0 + $0x50] sm:$0xff] }
 0x343   : > { %v1902_v53 = vadd.f32 %v8256_v17, %v1901_v49 }
 0x344   : > { %v2168_v57 = vadd.f32 %v7091_v20, %v2150_v37  ;;  %v1903_v14 = vpop.f32.mrf.mxu0 }
 0x345   : > { %v2057_v54 = vadd.f32 %v6001_v6, %v1902_v53  ;;  %v7101_v53 = vld [vmem:[#allocation2 + $0x50] sm:$0xff] }
 0x346   : > { %2186 = vst.msk [vmem:[#allocation2 + $0x28] sm:$0xff] %vm788_vm2, %v2168_v57 }
 0x347   : > { %v2133_v55 = vmax.f32 %v2057_v54, 0.0  ;;  %v1906_v9 = vpop.f32.mrf.mxu0 }
 0x348   : > { %v1907_v47 = vadd.f32 %v8256_v17, %v1906_v9  ;;  %v2206_v50 = vld [vmem:[#allocation2 + $0x20] sm:$0xff]  ;;  %v6013_v9 = vpop.f32.mrf.mxu1 }
 0x349   : > { %v2151_v39 = vmul.f32 %v8288_v12, %v2133_v55  ;;  %v1908_v48 = vpop.f32.mrf.mxu0  ;;  %6037 = vmatprep.mubr.msk.f32.mxu1 %vm788_vm2, %v2206_v50  ;;  %v7103_v50 = vld [vmem:[#allocation2 + $0x58] sm:$0xff] }
 0x34a   : > { %v2062_v45 = vadd.f32 %v2061_v25, %v1907_v47 }
 0x34b   : > { %v2169_v51 = vadd.f32 %v7093_v26, %v2151_v39 }
 0x34c   : > { %v2134_v10 = vmax.f32 %v2062_v45, 0.0  ;;  %v2091_v45 = vpop.f32.mrf.mxu1 }
 0x34d   : > { %2187 = vst.msk [vmem:[#allocation2 + $0x30] sm:$0xff] %vm788_vm2, %v2169_v51  ;;  %v2207_v59 = vld [vmem:[#allocation2 + $0x28] sm:$0xff] }
 0x34e   : > { %v2152_v60 = vmul.f32 %v8296_v13, %v2134_v10  ;;  %v1911_v0 = vpop.f32.mrf.mxu0  ;;  %6038 = vmatmul.mubr.msk.f32.gmra.mxu1 %vm788_vm2, %v2207_v59 }
 0x34f   : > { %v1912_v42 = vadd.f32 %v8256_v17, %v1911_v0  ;;  %v8342_v0 = vld [vmem:[%s10093_s0 + $0x60] sm:$0xff] }
 0x350   : > { %v2170_v7 = vadd.f32 %v7095_v61, %v2152_v60  ;;  %v1913_v63 = vpop.f32.mrf.mxu0  ;;  %v6016_v60 = vpop.f32.mrf.mxu1 }
 0x351   : > { %v2067_v1 = vadd.f32 %v6004_v43, %v1912_v42  ;;  %v8332_v43 = vld [vmem:[%s10093_s0 + $0x58] sm:$0xff]  ;;  %v7105_v63 = vld [vmem:[#allocation2 + $0x60] sm:$0xff] }
 0x352   : > { %2188 = vst.msk [vmem:[#allocation2 + $0x38] sm:$0xff] %vm788_vm2, %v2170_v7 }
 0x353   : > { %v2135_v4 = vmax.f32 %v2067_v1, 0.0  ;;  %v1916_v16 = vpop.f32.mrf.mxu0 }
 0x354   : > { %v1917_v58 = vadd.f32 %v8256_v17, %v1916_v16  ;;  %v2208_v44 = vld [vmem:[#allocation2 + $0x30] sm:$0xff] }
 0x355   : > { %v2153_v2 = vmul.f32 %v8306_v36, %v2135_v4  ;;  %v1918_v46 = vpop.f32.mrf.mxu0  ;;  %6040 = vmatprep.mubr.msk.f32.mxu1 %vm788_vm2, %v2208_v44  ;;  %v2101_v4 = vpop.f32.mrf.mxu1 }
 0x356   : > { %v2072_v5 = vadd.f32 %v2071_v11, %v1917_v58  ;;  %v8350_v58 = vld [vmem:[%s10093_s0 + $0x68] sm:$0xff] }
 0x357   : > { %v2171_v19 = vadd.f32 %v7097_v28, %v2153_v2  ;;  %v8354_v2 = vpop.f32.mrf.mxu1 }
 0x358   : > { %v2136_v21 = vmax.f32 %v2072_v5, 0.0  ;;  %v7107_v5 = vld [vmem:[#allocation2 + $0x68] sm:$0xff] }
 0x359   : > { %2189 = vst.msk [vmem:[#allocation2 + $0x40] sm:$0xff] %vm788_vm2, %v2171_v19  ;;  %v2209_v15 = vld [vmem:[#allocation2 + $0x38] sm:$0xff] }
 0x35a   : > { %v2154_v8 = vmul.f32 %v8314_v22, %v2136_v21  ;;  %v1921_v33 = vpop.f32.mrf.mxu0  ;;  %6041 = vmatmul.mubr.msk.f32.gmra.mxu1 %vm788_vm2, %v2209_v15  ;;  %v2111_v15 = vpop.f32.mrf.mxu1 }
 0x35b   : > { %v1922_v6 = vadd.f32 %v8256_v17, %v1921_v33 }
 0x35c   : > { %v2172_v56 = vadd.f32 %v7099_v27, %v2154_v8  ;;  %v1923_v52 = vpop.f32.mrf.mxu0 }
 0x35d   : > { %v2077_v41 = vadd.f32 %v6007_v3, %v1922_v6  ;;  %v8364_v52 = vld [vmem:[%s10093_s0 + $0x70] sm:$0xff] }
 0x35e   : > { %2190 = vst.msk [vmem:[#allocation2 + $0x48] sm:$0xff] %vm788_vm2, %v2172_v56  ;;  %v8359_v56 = vpop.f32.mrf.mxu1 }
 0x35f   : > { %v2137_v24 = vmax.f32 %v2077_v41, 0.0  ;;  %v1926_v30 = vpop.f32.mrf.mxu0 }
 0x360   : > { %v1927_v38 = vadd.f32 %v8256_v17, %v1926_v30  ;;  %v2210_v62 = vld [vmem:[#allocation2 + $0x40] sm:$0xff]  ;;  %v7109_v30 = vld [vmem:[#allocation2 + $0x70] sm:$0xff] }
 0x361   : > { %v2155_v40 = vmul.f32 %v8324_v23, %v2137_v24  ;;  %v1928_v37 = vpop.f32.mrf.mxu0  ;;  %6043 = vmatprep.mubr.msk.f32.mxu1 %vm788_vm2, %v2210_v62 }
 0x362   : > { %v2082_v49 = vadd.f32 %v2081_v31, %v1927_v38  ;;  %v2121_v31 = vpop.f32.mrf.mxu1  ;;  %v8372_v37 = vld [vmem:[%s10093_s0 + $0x78] sm:$0xff] }
 0x363   : > { %v2173_v20 = vadd.f32 %v7101_v53, %v2155_v40 }
 0x364   : > { %v2138_v57 = vmax.f32 %v2082_v49, 0.0 }
 0x365   : > { %2191 = vst.msk [vmem:[#allocation2 + $0x50] sm:$0xff] %vm788_vm2, %v2173_v20  ;;  %v2211_v14 = vld [vmem:[#allocation2 + $0x48] sm:$0xff] }
 0x366   : > { %v2156_v54 = vmul.f32 %v8332_v43, %v2138_v57  ;;  %v1931_v55 = vpop.f32.mrf.mxu0  ;;  %6044 = vmatmul.mubr.msk.f32.gmra.mxu1 %vm788_vm2, %v2211_v14  ;;  %v8380_v14 = vld [vmem:[%s10084_s5 + $0x1] ss:$0 sm:$0xff] }
 0x367   : > { %v1932_v47 = vadd.f32 %v8256_v17, %v1931_v55 }
 0x368   : > { %v2174_v25 = vadd.f32 %v7103_v50, %v2156_v54  ;;  %v1933_v39 = vpop.f32.mrf.mxu0  ;;  %v7111_v54 = vld [vmem:[#allocation2 + $0x78] sm:$0xff] }
 0x369   : > { %v2087_v48 = vadd.f32 %v6010_v29, %v1932_v47 }
 0x36a   : > { %2192 = vst.msk [vmem:[#allocation2 + $0x58] sm:$0xff] %vm788_vm2, %v2174_v25 }
 0x36b   : > { %v2139_v26 = vmax.f32 %v2087_v48, 0.0  ;;  %v1936_v51 = vpop.f32.mrf.mxu0 }
 0x36c   : > { %v1937_v10 = vadd.f32 %v8256_v17, %v1936_v51  ;;  %v2212_v59 = vld [vmem:[#allocation2 + $0x50] sm:$0xff] }
 0x36d   : > { %v2157_v42 = vmul.f32 %v8342_v0, %v2139_v26  ;;  %v1938_v61 = vpop.f32.mrf.mxu0  ;;  %6046 = vmatprep.mubr.msk.f32.mxu1 %vm788_vm2, %v2212_v59  ;;  %v7112_v59 = vld [vmem:[%s10093_s0 + $0x8] sm:$0xff] }
 0x36e   : > { %v2092_v7 = vadd.f32 %v2091_v45, %v1937_v10 }
 0x36f   : > { %v2175_v3 = vadd.f32 %v7105_v63, %v2157_v42 }
 0x370   : > { %v2140_v1 = vmax.f32 %v2092_v7, 0.0 }
 0x371   : > { %2193 = vst.msk [vmem:[#allocation2 + $0x60] sm:$0xff] %vm788_vm2, %v2175_v3  ;;  %v2213_v16 = vld [vmem:[#allocation2 + $0x58] sm:$0xff] }
 0x372   : > { %v2158_v44 = vmul.f32 %v8350_v58, %v2140_v1  ;;  %v1941_v11 = vpop.f32.mrf.mxu0  ;;  %6047 = vmatmul.mubr.msk.f32.gmra.mxu1 %vm788_vm2, %v2213_v16  ;;  %v7114_v1 = vld [vmem:[%s10093_s0] sm:$0xff] }
 0x373   : > { %v1942_v46 = vadd.f32 %v8256_v17, %v1941_v11  ;;  %v7115_v16 = vld [vmem:[#allocation2 + $0x80] sm:$0xff] }
 0x374   : > { %v2176_v28 = vadd.f32 %v7107_v5, %v2158_v44  ;;  %v1943_v19 = vpop.f32.mrf.mxu0 }
 0x375   : > { %v2097_v21 = vadd.f32 %v6013_v9, %v1942_v46 }
 0x376   : > { %2194 = vst.msk [vmem:[#allocation2 + $0x68] sm:$0xff] %vm788_vm2, %v2176_v28 }
 0x377   : > { %v2141_v8 = vmax.f32 %v2097_v21, 0.0  ;;  %v1946_v33 = vpop.f32.mrf.mxu0  ;;  %v8406_v21 = vld [vmem:[%s10093_s0 + $0x88] sm:$0xff] }
 0x378   : > { %v1947_v6 = vadd.f32 %v8256_v17, %v1946_v33  ;;  %v2214_v27 = vld [vmem:[#allocation2 + $0x60] sm:$0xff]  ;;  %v7117_v33 = vld [vmem:[#allocation2 + $0x88] sm:$0xff] }
 0x379   : > { %v2159_v29 = vmul.f32 %v8364_v52, %v2141_v8  ;;  %v1948_v41 = vpop.f32.mrf.mxu0  ;;  %6049 = vmatprep.mubr.msk.f32.mxu1 %vm788_vm2, %v2214_v27 }
 0x37a   : > { %v2102_v24 = vadd.f32 %v2101_v4, %v1947_v6  ;;  %v6033_v57 = vpop.f32.mrf.mxu1  ;;  %v8415_v41 = vld [vmem:[%s10093_s0 + $0x90] sm:$0xff] }
 0x37b   : > { %v2177_v38 = vadd.f32 %v7109_v30, %v2159_v29  ;;  %v2383_v47 = vadd.f32 %v6033_v57, %v8380_v14 }
 0x37c   : > { %v2142_v62 = vmax.f32 %v2102_v24, 0.0  ;;  %v2377_v25 = vpop.f32.mrf.mxu1 }
 0x37d   : > { %2195 = vst.msk [vmem:[#allocation2 + $0x70] sm:$0xff] %vm788_vm2, %v2177_v38  ;;  %v2215_v40 = vld [vmem:[#allocation2 + $0x68] sm:$0xff]  ;;  %v2497_v39 = vmax.f32 %v2383_v47, 0.0  ;;  %v2378_v48 = vadd.f32 %v8380_v14, %v2377_v25 }
 0x37e   : > { %v2160_v49 = vmul.f32 %v8372_v37, %v2142_v62  ;;  %v1951_v53 = vpop.f32.mrf.mxu0  ;;  %6050 = vmatmul.mubr.msk.f32.gmra.mxu1 %vm788_vm2, %v2215_v40  ;;  %v7119_v62 = vld [vmem:[#allocation2 + $0x90] sm:$0xff] }
 0x37f   : > { %v1952_v20 = vadd.f32 %v8256_v17, %v1951_v53  ;;  %v2521_v42 = vmul.f32 %v7112_v59, %v2497_v39  ;;  %v2496_v61 = vmax.f32 %v2378_v48, 0.0  ;;  %v5545_v59 = vld [vmem:[%s10085_s6 + $0x238] sm:$0xff] }
 0x380   : > { %v2178_v55 = vadd.f32 %v7111_v54, %v2160_v49  ;;  %v1953_v9 = vpop.f32.mrf.mxu0  ;;  %v8425_v54 = vld [vmem:[%s10093_s0 + $0x98] sm:$0xff]  ;;  %6067 = vmatprep.subr.mxu1 %v5545_v59 }
 0x381   : > { %v2107_v50 = vadd.f32 %v6016_v60, %v1952_v20  ;;  %v8392_v60 = vld [vmem:[%s10093_s0 + $0x80] sm:$0xff]  ;;  %2545 = vst.msk [vmem:[#allocation3 + $0x8] sm:$0xff] %vm788_vm2, %v2521_v42  ;;  %v2520_v4 = vmul.f32 %v7114_v1, %v2496_v61  ;;  %v2224_v61 = vld [vmem:[#allocation2 + $0xb0] sm:$0xff]  ;;  %6068 = vmatpush3.msra.mxu1 %v5545_v59 }
 0x382   : > { %2196 = vst.msk [vmem:[#allocation2 + $0x78] sm:$0xff] %vm788_vm2, %v2178_v55  ;;  %v5542_v1 = vld [vmem:[%s10085_s6 + $0x220] sm:$0xff] }
 0x383   : > { %v2143_v45 = vmax.f32 %v2107_v50, 0.0  ;;  %v1956_v26 = vpop.f32.mrf.mxu0  ;;  %2544 = vst.msk [vmem:[#allocation3] sm:$0xff] %vm788_vm2, %v2520_v4  ;;  %v7121_v50 = vld [vmem:[#allocation2 + $0x98] sm:$0xff] }
 0x384   : > { %v1957_v51 = vadd.f32 %v8256_v17, %v1956_v26  ;;  %v2216_v10 = vld [vmem:[#allocation2 + $0x70] sm:$0xff]  ;;  %v7123_v26 = vld [vmem:[#allocation2 + $0xa0] sm:$0xff]  ;;  %v5525_v4 = vld [vmem:[%s10085_s6 + $0x198] sm:$0xff] }
 0x385   : > { %v2161_v7 = vmul.f32 %v8392_v60, %v2143_v45  ;;  %v1958_v63 = vpop.f32.mrf.mxu0  ;;  %6052 = vmatprep.mubr.msk.f32.mxu1 %vm788_vm2, %v2216_v10  ;;  %v2223_v10 = vld [vmem:[#allocation2 + $0xa8] sm:$0xff]  ;;  %3212 = vmatpush1.msra.mxu0 %v5525_v4 }
 0x386   : > { %v2112_v3 = vadd.f32 %v2111_v15, %v1957_v51  ;;  %v2225_v63 = vld [vmem:[#allocation2 + $0xb8] sm:$0xff]  ;;  %3213 = vmatprep.subr.mxu0 %v7272_v35 }
 0x387   : > { %v2179_v44 = vadd.f32 %v7115_v16, %v2161_v7  ;;  %v1961_v11 = vpop.f32.mrf.mxu0  ;;  %v5544_v7 = vld [vmem:[%s10085_s6 + $0x230] sm:$0xff] }
 0x388   : > { %v2144_v46 = vmax.f32 %v2112_v3, 0.0  ;;  %v1962_v5 = vadd.f32 %v8256_v17, %v1961_v11  ;;  %6069 = vmatprep.subr.mxu1 %v5544_v7  ;;  %v5543_v3 = vld [vmem:[%s10085_s6 + $0x228] sm:$0xff]  ;;  %v5524_v16 = vld [vmem:[%s10085_s6 + $0x190] sm:$0xff]  ;;  %v5522_v11 = vld [vmem:[%s10085_s6 + $0x180] sm:$0xff] }
 0x389   : > { %2197 = vst.msk [vmem:[#allocation2 + $0x80] sm:$0xff] %vm788_vm2, %v2179_v44  ;;  %v1963_v28 = vpop.f32.mrf.mxu0  ;;  %v2217_v19 = vld [vmem:[#allocation2 + $0x78] sm:$0xff]  ;;  %6070 = vmatpush3.msra.mxu1 %v5544_v7  ;;  %3214 = vmatpush1.msra.mxu0 %v5524_v16  ;;  %v5523_v44 = vld [vmem:[%s10085_s6 + $0x188] sm:$0xff]  ;;  %v5530_v7 = vld [vmem:[%s10085_s6 + $0x1c0] sm:$0xff] }
 0x38a   : > { %v2162_v15 = vmul.f32 %v8406_v21, %v2144_v46  ;;  %v2117_v8 = vadd.f32 %v8354_v2, %v1962_v5  ;;  %6053 = vmatmul.mubr.msk.f32.gmra.mxu1 %vm788_vm2, %v2217_v19  ;;  %6071 = vmatprep.subr.mxu1 %v5543_v3  ;;  %v5521_v46 = vld [vmem:[%s10085_s6 + $0x178] sm:$0xff]  ;;  %v5520_v5 = vld [vmem:[%s10085_s6 + $0x170] sm:$0xff]  ;;  %v5519_v28 = vld [vmem:[%s10085_s6 + $0x168] sm:$0xff] }
 0x38b   : > { %6072 = vmatpush3.msra.mxu1 %v5543_v3  ;;  %3215 = vmatprep.subr.mxu0 %v7272_v35  ;;  %v5518_v19 = vld [vmem:[%s10085_s6 + $0x160] sm:$0xff]  ;;  %v5527_v16 = vld [vmem:[%s10085_s6 + $0x1a8] sm:$0xff] }
 0x38c   : > { %v2180_v6 = vadd.f32 %v7117_v33, %v2162_v15  ;;  %v2145_v27 = vmax.f32 %v2117_v8, 0.0  ;;  %6073 = vmatprep.subr.mxu1 %v5542_v1  ;;  %3216 = vmatpush1.msra.mxu0 %v5523_v44  ;;  %v5517_v15 = vld [vmem:[%s10085_s6 + $0x158] sm:$0xff]  ;;  %v5516_v8 = vld [vmem:[%s10085_s6 + $0x150] sm:$0xff]  ;;  %v5515_v33 = vld [vmem:[%s10085_s6 + $0x148] sm:$0xff] }
 0x38d   : > { %v1966_v29 = vpop.f32.mrf.mxu0  ;;  %6074 = vmatpush3.msra.mxu1 %v5542_v1  ;;  %3217 = vmatprep.subr.mxu0 %v7272_v35  ;;  %v5529_v1 = vld [vmem:[%s10085_s6 + $0x1b8] sm:$0xff] }
 0x38e   : > { %2198 = vst.msk [vmem:[#allocation2 + $0x88] sm:$0xff] %vm788_vm2, %v2180_v6  ;;  %v2163_v24 = vmul.f32 %v8415_v41, %v2145_v27  ;;  %v1967_v30 = vadd.f32 %v8256_v17, %v1966_v29  ;;  %3218 = vmatpush1.msra.mxu0 %v5522_v11  ;;  %v5514_v6 = vld [vmem:[%s10085_s6 + $0x140] sm:$0xff]  ;;  %v5513_v27 = vld [vmem:[%s10085_s6 + $0x138] sm:$0xff]  ;;  %v5512_v29 = vld [vmem:[%s10085_s6 + $0x130] sm:$0xff] }
 0x38f   : > { %v1968_v38 = vpop.f32.mrf.mxu0  ;;  %3219 = vmatprep.subr.mxu0 %v7272_v35 }
 0x390   : > { %v2181_v2 = vadd.f32 %v7119_v62, %v2163_v24  ;;  %v2122_v40 = vadd.f32 %v2121_v31, %v1967_v30  ;;  %v2218_v49 = vld [vmem:[#allocation2 + $0x80] sm:$0xff]  ;;  %3220 = vmatpush1.msra.mxu0 %v5521_v46  ;;  %v5511_v24 = vld [vmem:[%s10085_s6 + $0x128] sm:$0xff]  ;;  %v5541_v38 = vld [vmem:[%s10085_s6 + $0x218] sm:$0xff] }
 0x391   : > { %6055 = vmatprep.mubr.msk.f32.mxu1 %vm788_vm2, %v2218_v49  ;;  %3221 = vmatprep.subr.mxu0 %v7272_v35  ;;  %v5510_v30 = vld [vmem:[%s10085_s6 + $0x120] sm:$0xff]  ;;  %v5540_v62 = vld [vmem:[%s10085_s6 + $0x210] sm:$0xff] }
 0x392   : > { %2199 = vst.msk [vmem:[#allocation2 + $0x90] sm:$0xff] %vm788_vm2, %v2181_v2  ;;  %v2146_v53 = vmax.f32 %v2122_v40, 0.0  ;;  %v1971_v20 = vpop.f32.mrf.mxu0  ;;  %3222 = vmatpush1.msra.mxu0 %v5520_v5  ;;  %v5539_v2 = vld [vmem:[%s10085_s6 + $0x208] sm:$0xff]  ;;  %v5538_v49 = vld [vmem:[%s10085_s6 + $0x200] sm:$0xff] }
 0x393   : > { %v1972_v57 = vadd.f32 %v8256_v17, %v1971_v20  ;;  %v8434_v17 = vld [vmem:[%s10093_s0 + $0xa0] sm:$0xff]  ;;  %3223 = vmatprep.subr.mxu0 %v7272_v35 }
 0x394   : > { %v2164_v55 = vmul.f32 %v8425_v54, %v2146_v53  ;;  %v1973_v9 = vpop.f32.mrf.mxu0  ;;  %3224 = vmatpush1.msra.mxu0 %v5519_v28 }
 0x395   : > { %v2127_v47 = vadd.f32 %v8359_v56, %v1972_v57  ;;  %v2219_v31 = vld [vmem:[#allocation2 + $0x88] sm:$0xff]  ;;  %3225 = vmatprep.subr.mxu0 %v7272_v35  ;;  %v5537_v57 = vld [vmem:[%s10085_s6 + $0x1f8] sm:$0xff] }
 0x396   : > { %v2182_v25 = vadd.f32 %v7121_v50, %v2164_v55  ;;  %6056 = vmatmul.mubr.msk.f32.gmra.mxu1 %vm788_vm2, %v2219_v31  ;;  %3226 = vmatpush1.msra.mxu0 %v5518_v19 }
 0x397   : > { %v2147_v39 = vmax.f32 %v2127_v47, 0.0  ;;  %3227 = vmatprep.subr.mxu0 %v7272_v35  ;;  %v5536_v47 = vld [vmem:[%s10085_s6 + $0x1f0] sm:$0xff] }
 0x398   : > { %2200 = vst.msk [vmem:[#allocation2 + $0x98] sm:$0xff] %vm788_vm2, %v2182_v25  ;;  %3228 = vmatpush1.msra.mxu0 %v5517_v15  ;;  %v5535_v25 = vld [vmem:[%s10085_s6 + $0x1e8] sm:$0xff] }
 0x399   : > { %v2165_v48 = vmul.f32 %v8434_v17, %v2147_v39  ;;  %v2220_v45 = vld [vmem:[#allocation2 + $0x90] sm:$0xff]  ;;  %3229 = vmatprep.subr.mxu0 %v7272_v35 }
 0x39a   : > { %6058 = vmatprep.mubr.msk.f32.mxu1 %vm788_vm2, %v2220_v45  ;;  %3230 = vmatpush1.msra.mxu0 %v5516_v8  ;;  %v7124_v39 = vld [vmem:[%s10093_s0 + $0x10] sm:$0xff]  ;;  %v5533_v45 = vld [vmem:[%s10085_s6 + $0x1d8] sm:$0xff] }
 0x39b   : > { %v2183_v56 = vadd.f32 %v7123_v26, %v2165_v48  ;;  %3231 = vmatprep.subr.mxu0 %v7272_v35  ;;  %v5532_v26 = vld [vmem:[%s10085_s6 + $0x1d0] sm:$0xff] }
 0x39c   : > { %3232 = vmatpush1.msra.mxu0 %v5515_v33 }
 0x39d   : > { %2201 = vst.msk [vmem:[#allocation2 + $0xa0] sm:$0xff] %vm788_vm2, %v2183_v56  ;;  %3233 = vmatprep.subr.mxu0 %v7272_v35 }
 0x39e   : > { %3234 = vmatpush1.msra.mxu0 %v5514_v6 }
 0x39f   : > { %v2221_v51 = vld [vmem:[#allocation2 + $0x98] sm:$0xff]  ;;  %3235 = vmatprep.subr.mxu0 %v7272_v35 }
 0x3a0   : > { %6059 = vmatmul.mubr.msk.f32.gmra.mxu1 %vm788_vm2, %v2221_v51  ;;  %3236 = vmatpush1.msra.mxu0 %v5513_v27 }
 0x3a1   : > { %3237 = vmatprep.subr.mxu0 %v7272_v35 }
 0x3a2   : > { %3238 = vmatpush1.msra.mxu0 %v5512_v29 }
 0x3a3   : > { %3239 = vmatprep.subr.mxu0 %v7272_v35 }
 0x3a4   : > { %v2222_v42 = vld [vmem:[#allocation2 + $0xa0] sm:$0xff]  ;;  %3240 = vmatpush1.msra.mxu0 %v5511_v24 }
 0x3a5   : > { %6061 = vmatprep.mubr.msk.f32.mxu1 %vm788_vm2, %v2222_v42  ;;  %3241 = vmatprep.subr.mxu0 %v7272_v35 }
 0x3a6   : > { %6062 = vmatmul.mubr.msk.f32.gmra.mxu1 %vm788_vm2, %v2223_v10  ;;  %3242 = vmatpush1.msra.mxu0 %v5510_v30  ;;  %v5531_v10 = vld [vmem:[%s10085_s6 + $0x1c8] sm:$0xff] }
 0x3a7   : > { %6064 = vmatprep.mubr.msk.f32.mxu1 %vm788_vm2, %v2224_v61  ;;  %3243 = vmatprep.subr.mxu0 %v7272_v35 }
 0x3a8   : > { %3244 = vmatpush2.msra.mxu0 %v5541_v38  ;;  %v2586_v38 = vld [vmem:[#allocation3 + $0x8] sm:$0xff] }
 0x3a9   : > { %3245 = vmatprep.subr.mxu0 %v7272_v35 }
 0x3aa   : > { %6065 = vmatmul.mubr.msk.f32.gmra.mxu1 %vm788_vm2, %v2225_v63  ;;  %3246 = vmatpush2.msra.mxu0 %v5540_v62 }
 0x3ab   : > { %3247 = vmatprep.subr.mxu0 %v7272_v35 }
 0x3ac   : > { %3248 = vmatpush2.msra.mxu0 %v5539_v2 }
 0x3ad   : > { %3249 = vmatprep.subr.mxu0 %v7272_v35 }
 0x3ae   : > { %3250 = vmatpush2.msra.mxu0 %v5538_v49 }
 0x3af   : > { %3251 = vmatprep.subr.mxu0 %v7272_v35 }
 0x3b0   : > { %3252 = vmatpush2.msra.mxu0 %v5537_v57 }
 0x3b1   : > { %3253 = vmatprep.subr.mxu0 %v7272_v35 }
 0x3b2   : > { %3254 = vmatpush2.msra.mxu0 %v5536_v47 }
 0x3b3   : > { %3255 = vmatprep.subr.mxu0 %v7272_v35 }
 0x3b4   : > { %3256 = vmatpush2.msra.mxu0 %v5535_v25 }
 0x3b5   : > { %3257 = vmatprep.subr.mxu0 %v7272_v35 }
 0x401   : > { %v6036_v40 = vpop.f32.mrf.mxu1 }
 0x402   : > { %v2393_v53 = vadd.f32 %v6036_v40, %v8380_v14 }
 0x403   : > { %v2387_v20 = vpop.f32.mrf.mxu1 }
 0x404   : > { %v2499_v55 = vmax.f32 %v2393_v53, 0.0  ;;  %v2388_v9 = vadd.f32 %v8380_v14, %v2387_v20 }
 0x406   : > { %v2523_v31 = vmul.f32 %v8262_v18, %v2499_v55  ;;  %v2498_v50 = vmax.f32 %v2388_v9, 0.0  ;;  %v5534_v18 = vld [vmem:[%s10085_s6 + $0x1e0] sm:$0xff] }
 0x407   : > { %3258 = vmatpush2.msra.mxu0 %v5534_v18 }
 0x408   : > { %2547 = vst.msk [vmem:[#allocation3 + $0x18] sm:$0xff] %vm788_vm2, %v2523_v31  ;;  %v2522_v48 = vmul.f32 %v7124_v39, %v2498_v50  ;;  %3259 = vmatprep.subr.mxu0 %v7272_v35 }
 0x409   : > { %3260 = vmatpush2.msra.mxu0 %v5533_v45 }
 0x40a   : > { %2546 = vst.msk [vmem:[#allocation3 + $0x10] sm:$0xff] %vm788_vm2, %v2522_v48  ;;  %3261 = vmatprep.subr.mxu0 %v7272_v35 }
 0x40b   : > { %3262 = vmatpush2.msra.mxu0 %v5532_v26 }
 0x40c   : > { %3263 = vmatprep.subr.mxu0 %v7272_v35 }
 0x40d   : > { %3264 = vmatpush2.msra.mxu0 %v5531_v10 }
 0x40e   : > { %v6039_v56 = vpop.f32.mrf.mxu1  ;;  %3265 = vmatprep.subr.mxu0 %v7272_v35 }
 0x40f   : > { %v2403_v51 = vadd.f32 %v6039_v56, %v8380_v14  ;;  %3266 = vmatpush2.msra.mxu0 %v5530_v7 }
 0x410   : > { %v2397_v59 = vpop.f32.mrf.mxu1  ;;  %3267 = vmatprep.subr.mxu0 %v7272_v35 }
 0x411   : > { %v2501_v42 = vmax.f32 %v2403_v51, 0.0  ;;  %v2398_v61 = vadd.f32 %v8380_v14, %v2397_v59  ;;  %3268 = vmatpush2.msra.mxu0 %v5529_v1  ;;  %v8598_v5 = vld [vmem:[#allocation3 + $0x17] sm:$0xff]  ;;  %v2604_v6 = vld [vmem:[#allocation3 + $0x9] sm:$0xff] }
 0x412   : > { %3269 = vmatprep.subr.mxu0 %v7272_v35  ;;  %v2587_v49 = vld [vmem:[#allocation3 + $0x10] sm:$0xff] }
 0x413   : > { %v2525_v63 = vmul.f32 %v8279_v34, %v2501_v42  ;;  %v2500_v3 = vmax.f32 %v2398_v61, 0.0  ;;  %v5528_v34 = vld [vmem:[%s10085_s6 + $0x1b0] sm:$0xff]  ;;  %v8650_v42 = vld [vmem:[#allocation3 + $0x18] sm:$0xff] }
 0x414   : > { %3270 = vmatpush2.msra.mxu0 %v5528_v34  ;;  %v2605_v56 = vld [vmem:[#allocation3 + $0x11] sm:$0xff] }
 0x415   : > { %2549 = vst.msk [vmem:[#allocation3 + $0x28] sm:$0xff] %vm788_vm2, %v2525_v63  ;;  %v2524_v4 = vmul.f32 %v8271_v32, %v2500_v3  ;;  %3271 = vmatprep.subr.mxu0 %v7272_v35  ;;  %v5526_v32 = vld [vmem:[%s10085_s6 + $0x1a0] sm:$0xff] }
 0x416   : > { %3272 = vmatpush2.msra.mxu0 %v5527_v16 }
 0x417   : > { %2548 = vst.msk [vmem:[#allocation3 + $0x20] sm:$0xff] %vm788_vm2, %v2524_v4  ;;  %3273 = vmatprep.subr.mxu0 %v7272_v35 }
 0x418   : > { %3274 = vmatpush2.msra.mxu0 %v5526_v32 }
 0x419   : > { %4602 = vmatprep.subr.mxu0 %v7272_v35 }
 0x41a   : > { %v6042_v44 = vpop.f32.mrf.mxu1 }
 0x41b   : > { %v2413_v11 = vadd.f32 %v6042_v44, %v8380_v14 }
 0x41c   : > { %v2407_v46 = vpop.f32.mrf.mxu1  ;;  %v8600_v28 = vld [vmem:[#allocation3 + $0x28] sm:$0xff] }
 0x41d   : > { %v2503_v19 = vmax.f32 %v2413_v11, 0.0  ;;  %v2408_v15 = vadd.f32 %v8380_v14, %v2407_v46  ;;  %v6546_v8 = vpack.i.bf16 %v8598_v5, %v8600_v28 }
 0x41e   : > { %v8606_v33 = vld [vmem:[#allocation3 + $0x27] sm:$0xff]  ;;  %v2606_v27 = vld [vmem:[#allocation3 + $0x19] sm:$0xff] }
 0x41f   : > { %v2527_v29 = vmul.f32 %v8296_v13, %v2503_v19  ;;  %v2502_v24 = vmax.f32 %v2408_v15, 0.0  ;;  %6547 = vrot.lane.b32.xlu0 %v6546_v8, %s7273_s12  ;;  %v6556_v30 = vpack.i.bf16 %v2604_v6, %v8606_v33  ;;  %v8611_v62 = vld [vmem:[#allocation3 + $0x21] sm:$0xff]  ;;  %v6551_v40 = vpack.i.bf16 %v2586_v38, %v2606_v27 }
 0x420   : > { %v6561_v13 = vpack.i.bf16 %v2587_v49, %v8611_v62  ;;  %v8626_v31 = vld [vmem:[#allocation3 + $0x1f] sm:$0xff] }
 0x421   : > { %2551 = vst.msk [vmem:[#allocation3 + $0x38] sm:$0xff] %vm788_vm2, %v2527_v29  ;;  %v2526_v2 = vmul.f32 %v8288_v12, %v2502_v24  ;;  %6557 = vrot.lane.b32.xlu1 %v6556_v30, %s7275_s29  ;;  %v8654_v63 = vld [vmem:[#allocation3 + $0x20] sm:$0xff] }
 0x423   : > { %2550 = vst.msk [vmem:[#allocation3 + $0x30] sm:$0xff] %vm788_vm2, %v2526_v2  ;;  %6552 = vrot.lane.b32.xlu0 %v6551_v40, %s7274_s21 }
 0x425   : > { %6562 = vrot.lane.b32.xlu1 %v6561_v13, %s7274_s21 }
 0x426   : > { %v6045_v53 = vpop.f32.mrf.mxu1 }
 0x427   : > { %v2423_v20 = vadd.f32 %v6045_v53, %v8380_v14 }
 0x428   : > { %v2417_v57 = vpop.f32.mrf.mxu1  ;;  %v8621_v55 = vld [vmem:[#allocation3 + $0x38] sm:$0xff] }
 0x429   : > { %v2505_v9 = vmax.f32 %v2423_v20, 0.0  ;;  %v2418_v12 = vadd.f32 %v8380_v14, %v2417_v57  ;;  %v6566_v47 = vpack.i.bf16 %v8606_v33, %v8621_v55 }
 0x42a   : > { %v2608_v50 = vld [vmem:[#allocation3 + $0x29] sm:$0xff]  ;;  %v8628_v25 = vld [vmem:[#allocation3 + $0x31] sm:$0xff] }
 0x42b   : > { %v8630_v39 = vld [vmem:[#allocation3 + $0x30] sm:$0xff]  ;;  %v2529_v48 = vmul.f32 %v8314_v22, %v2505_v9  ;;  %v2504_v18 = vmax.f32 %v2418_v12, 0.0  ;;  %6567 = vrot.lane.b32.xlu0 %v6566_v47, %s7273_s12  ;;  %6075 = vmatprep.mubr.msk.f32.mxu1 %vm788_vm2, %v2608_v50  ;;  %v6581_v61 = vpack.i.bf16 %v8650_v42, %v2608_v50  ;;  %v6591_v3 = vpack.i.bf16 %v8654_v63, %v8628_v25 }
 0x42c   : > { %v6576_v45 = vpack.i.bf16 %v8626_v31, %v8630_v39  ;;  %v8637_v26 = vld [vmem:[#allocation3 + $0x2f] sm:$0xff]  ;;  %6076 = vmatmul.mubr.msk.f32.vlgmr.msra.gmra.mxu1 %vm788_vm2, %v8628_v25  ;;  %v8641_v51 = vld [vmem:[#allocation3 + $0x37] sm:$0xff] }
 0x42d   : > { %2553 = vst.msk [vmem:[#allocation3 + $0x48] sm:$0xff] %vm788_vm2, %v2529_v48  ;;  %v2528_v22 = vmul.f32 %v8306_v36, %v2504_v18  ;;  %v6571_v10 = vpack.i.bf16 %v2605_v56, %v8637_v26  ;;  %v6586_v59 = vpack.i.bf16 %v2606_v27, %v8641_v51 }
 0x42e   : > { %6577 = vrot.lane.b32.xlu1 %v6576_v45, %s7273_s12 }
 0x42f   : > { %2552 = vst.msk [vmem:[#allocation3 + $0x40] sm:$0xff] %vm788_vm2, %v2528_v22  ;;  %6572 = vrot.lane.b32.xlu0 %v6571_v10, %s7275_s29 }
 0x432   : > { %6587 = vrot.lane.b32.xlu1 %v6586_v59, %s7275_s29  ;;  %v6048_v7 = vpop.f32.mrf.mxu1 }
 0x433   : > { %v2433_v36 = vadd.f32 %v6048_v7, %v8380_v14  ;;  %6582 = vrot.lane.b32.xlu0 %v6581_v61, %s7274_s21 }
 0x434   : > { %v2427_v1 = vpop.f32.mrf.mxu1  ;;  %v8660_v4 = vld [vmem:[#allocation3 + $0x48] sm:$0xff] }
 0x435   : > { %v2507_v34 = vmax.f32 %v2433_v36, 0.0  ;;  %v2428_v16 = vadd.f32 %v8380_v14, %v2427_v1  ;;  %v6596_v32 = vpack.i.bf16 %v8641_v51, %v8660_v4 }
 0x436   : > { %6592 = vrot.lane.b32.xlu1 %v6591_v3, %s7274_s21  ;;  %v2610_v44 = vld [vmem:[#allocation3 + $0x39] sm:$0xff]  ;;  %v8666_v11 = vld [vmem:[#allocation3 + $0x41] sm:$0xff] }
 0x437   : > { %v8668_v46 = vld [vmem:[#allocation3 + $0x40] sm:$0xff]  ;;  %v2531_v19 = vmul.f32 %v8332_v43, %v2507_v34  ;;  %v2506_v15 = vmax.f32 %v2428_v16, 0.0  ;;  %6597 = vrot.lane.b32.xlu0 %v6596_v32, %s7273_s12  ;;  %6078 = vmatprep.mubr.msk.f32.mxu1 %vm788_vm2, %v2610_v44  ;;  %v6611_v30 = vpack.i.bf16 %v8600_v28, %v2610_v44 }
 0x438   : > { %v6606_v8 = vpack.i.bf16 %v8637_v26, %v8668_v46  ;;  %v8675_v6 = vld [vmem:[#allocation3 + $0x3f] sm:$0xff]  ;;  %6079 = vmatmul.mubr.msk.f32.gmra.mxu1 %vm788_vm2, %v8666_v11  ;;  %v8679_v27 = vld [vmem:[#allocation3 + $0x47] sm:$0xff] }
 0x439   : > { %2555 = vst.msk [vmem:[#allocation3 + $0x58] sm:$0xff] %vm788_vm2, %v2531_v19  ;;  %v2530_v29 = vmul.f32 %v8324_v23, %v2506_v15  ;;  %v6601_v43 = vpack.i.bf16 %v8611_v62, %v8675_v6  ;;  %v6616_v24 = vpack.i.bf16 %v2608_v50, %v8679_v27  ;;  %v6621_v23 = vpack.i.bf16 %v8630_v39, %v8666_v11 }
 0x43a   : > { %6607 = vrot.lane.b32.xlu1 %v6606_v8, %s7273_s12 }
 0x43b   : > { %2554 = vst.msk [vmem:[#allocation3 + $0x50] sm:$0xff] %vm788_vm2, %v2530_v29  ;;  %6602 = vrot.lane.b32.xlu0 %v6601_v43, %s7275_s29 }
 0x43e   : > { %6617 = vrot.lane.b32.xlu1 %v6616_v24, %s7275_s29  ;;  %v6051_v38 = vpop.f32.mrf.mxu1 }
 0x43f   : > { %v2443_v2 = vadd.f32 %v6051_v38, %v8380_v14  ;;  %6612 = vrot.lane.b32.xlu0 %v6611_v30, %s7274_s21 }
 0x440   : > { %v2437_v40 = vpop.f32.mrf.mxu1  ;;  %v8695_v62 = vld [vmem:[#allocation3 + $0x58] sm:$0xff] }
 0x441   : > { %v2509_v49 = vmax.f32 %v2443_v2, 0.0  ;;  %v2438_v13 = vadd.f32 %v8380_v14, %v2437_v40  ;;  %v6626_v53 = vpack.i.bf16 %v8679_v27, %v8695_v62 }
 0x442   : > { %6622 = vrot.lane.b32.xlu1 %v6621_v23, %s7274_s21  ;;  %v2612_v20 = vld [vmem:[#allocation3 + $0x49] sm:$0xff]  ;;  %v8701_v57 = vld [vmem:[#allocation3 + $0x51] sm:$0xff] }
 0x443   : > { %v8703_v9 = vld [vmem:[#allocation3 + $0x50] sm:$0xff]  ;;  %v2533_v12 = vmul.f32 %v8350_v58, %v2509_v49  ;;  %v2508_v47 = vmax.f32 %v2438_v13, 0.0  ;;  %6627 = vrot.lane.b32.xlu0 %v6626_v53, %s7273_s12  ;;  %6081 = vmatprep.mubr.msk.f32.mxu1 %vm788_vm2, %v2612_v20  ;;  %v6641_v22 = vpack.i.bf16 %v8621_v55, %v2612_v20 }
 0x444   : > { %v6636_v50 = vpack.i.bf16 %v8675_v6, %v8703_v9  ;;  %v8710_v48 = vld [vmem:[#allocation3 + $0x4f] sm:$0xff]  ;;  %6082 = vmatmul.mubr.msk.f32.gmra.mxu1 %vm788_vm2, %v8701_v57  ;;  %v8714_v18 = vld [vmem:[#allocation3 + $0x57] sm:$0xff] }
 0x445   : > { %2557 = vst.msk [vmem:[#allocation3 + $0x68] sm:$0xff] %vm788_vm2, %v2533_v12  ;;  %v2532_v45 = vmul.f32 %v8342_v0, %v2508_v47  ;;  %v6631_v58 = vpack.i.bf16 %v8628_v25, %v8710_v48  ;;  %v6646_v56 = vpack.i.bf16 %v2610_v44, %v8714_v18  ;;  %v6651_v0 = vpack.i.bf16 %v8668_v46, %v8701_v57 }
 0x446   : > { %6637 = vrot.lane.b32.xlu1 %v6636_v50, %s7273_s12 }
 0x447   : > { %2556 = vst.msk [vmem:[#allocation3 + $0x60] sm:$0xff] %vm788_vm2, %v2532_v45  ;;  %6632 = vrot.lane.b32.xlu0 %v6631_v58, %s7275_s29 }
 0x44a   : > { %6647 = vrot.lane.b32.xlu1 %v6646_v56, %s7275_s29  ;;  %v6054_v10 = vpop.f32.mrf.mxu1 }
 0x44b   : > { %v2453_v59 = vadd.f32 %v6054_v10, %v8380_v14  ;;  %6642 = vrot.lane.b32.xlu0 %v6641_v22, %s7274_s21 }
 0x44c   : > { %v2447_v61 = vpop.f32.mrf.mxu1  ;;  %v8730_v25 = vld [vmem:[#allocation3 + $0x68] sm:$0xff] }
 0x44d   : > { %v2511_v7 = vmax.f32 %v2453_v59, 0.0  ;;  %v2448_v36 = vadd.f32 %v8380_v14, %v2447_v61  ;;  %v6656_v3 = vpack.i.bf16 %v8714_v18, %v8730_v25 }
 0x44e   : > { %6652 = vrot.lane.b32.xlu1 %v6651_v0, %s7274_s21  ;;  %v2614_v1 = vld [vmem:[#allocation3 + $0x59] sm:$0xff]  ;;  %v8736_v34 = vld [vmem:[#allocation3 + $0x61] sm:$0xff] }
 0x44f   : > { %v8738_v16 = vld [vmem:[#allocation3 + $0x60] sm:$0xff]  ;;  %v2535_v32 = vmul.f32 %v8372_v37, %v2511_v7  ;;  %v2510_v44 = vmax.f32 %v2448_v36, 0.0  ;;  %6657 = vrot.lane.b32.xlu0 %v6656_v3, %s7273_s12  ;;  %6084 = vmatprep.mubr.msk.f32.mxu1 %vm788_vm2, %v2614_v1  ;;  %v6671_v24 = vpack.i.bf16 %v8660_v4, %v2614_v1 }
 0x450   : > { %v6666_v19 = vpack.i.bf16 %v8710_v48, %v8738_v16  ;;  %v8745_v15 = vld [vmem:[#allocation3 + $0x5f] sm:$0xff]  ;;  %6085 = vmatmul.mubr.msk.f32.gmra.mxu1 %vm788_vm2, %v8736_v34  ;;  %v8749_v8 = vld [vmem:[#allocation3 + $0x67] sm:$0xff] }
 0x451   : > { %2559 = vst.msk [vmem:[#allocation3 + $0x78] sm:$0xff] %vm788_vm2, %v2535_v32  ;;  %v2534_v29 = vmul.f32 %v8364_v52, %v2510_v44  ;;  %v6661_v37 = vpack.i.bf16 %v8666_v11, %v8745_v15  ;;  %v6676_v43 = vpack.i.bf16 %v2612_v20, %v8749_v8  ;;  %v6681_v52 = vpack.i.bf16 %v8703_v9, %v8736_v34 }
 0x452   : > { %6667 = vrot.lane.b32.xlu1 %v6666_v19, %s7273_s12 }
 0x453   : > { %2558 = vst.msk [vmem:[#allocation3 + $0x70] sm:$0xff] %vm788_vm2, %v2534_v29  ;;  %6662 = vrot.lane.b32.xlu0 %v6661_v37, %s7275_s29 }
 0x456   : > { %6677 = vrot.lane.b32.xlu1 %v6676_v43, %s7275_s29  ;;  %v6057_v30 = vpop.f32.mrf.mxu1 }
 0x457   : > { %v2463_v38 = vadd.f32 %v6057_v30, %v8380_v14  ;;  %6672 = vrot.lane.b32.xlu0 %v6671_v24, %s7274_s21 }
 0x458   : > { %v2457_v2 = vpop.f32.mrf.mxu1  ;;  %v8765_v11 = vld [vmem:[#allocation3 + $0x78] sm:$0xff] }
 0x459   : > { %v2513_v23 = vmax.f32 %v2463_v38, 0.0  ;;  %v2458_v40 = vadd.f32 %v8380_v14, %v2457_v2  ;;  %v6686_v49 = vpack.i.bf16 %v8749_v8, %v8765_v11 }
 0x45a   : > { %6682 = vrot.lane.b32.xlu1 %v6681_v52, %s7274_s21  ;;  %v8771_v13 = vld [vmem:[#allocation3 + $0x69] sm:$0xff]  ;;  %v8773_v53 = vld [vmem:[#allocation3 + $0x71] sm:$0xff] }
 0x45b   : > { %v8775_v20 = vld [vmem:[#allocation3 + $0x70] sm:$0xff]  ;;  %v2537_v12 = vmul.f32 %v8406_v21, %v2513_v23  ;;  %v2512_v47 = vmax.f32 %v2458_v40, 0.0  ;;  %6687 = vrot.lane.b32.xlu0 %v6686_v49, %s7273_s12  ;;  %6087 = vmatprep.mubr.msk.f32.mxu1 %vm788_vm2, %v8771_v13  ;;  %v6701_v0 = vpack.i.bf16 %v8695_v62, %v8771_v13  ;;  %v7125_v49 = vld [vmem:[%s10093_s0 + $0xa8] sm:$0xff] }
 0x45c   : > { %v6696_v50 = vpack.i.bf16 %v8745_v15, %v8775_v20  ;;  %v8783_v45 = vld [vmem:[#allocation3 + $0x6f] sm:$0xff]  ;;  %6088 = vmatmul.mubr.msk.f32.gmra.mxu1 %vm788_vm2, %v8773_v53  ;;  %v8787_v58 = vld [vmem:[#allocation3 + $0x77] sm:$0xff] }
 0x45d   : > { %2561 = vst.msk [vmem:[#allocation3 + $0x88] sm:$0xff] %vm788_vm2, %v2537_v12  ;;  %v2536_v21 = vmul.f32 %v8392_v60, %v2512_v47  ;;  %v6691_v56 = vpack.i.bf16 %v8701_v57, %v8783_v45  ;;  %v6706_v22 = vpack.i.bf16 %v2614_v1, %v8787_v58  ;;  %v6711_v57 = vpack.i.bf16 %v8738_v16, %v8773_v53 }
 0x45e   : > { %6697 = vrot.lane.b32.xlu1 %v6696_v50, %s7273_s12 }
 0x45f   : > { %2560 = vst.msk [vmem:[#allocation3 + $0x80] sm:$0xff] %vm788_vm2, %v2536_v21  ;;  %6692 = vrot.lane.b32.xlu0 %v6691_v56, %s7275_s29 }
 0x460   : > { %v6060_v10 = vpop.f32.mrf.mxu1 }
 0x461   : > { %v2473_v59 = vadd.f32 %v6060_v10, %v8380_v14 }
 0x462   : > { %6707 = vrot.lane.b32.xlu1 %v6706_v22, %s7275_s29  ;;  %v2467_v60 = vpop.f32.mrf.mxu1 }
 0x463   : > { %v2515_v61 = vmax.f32 %v2473_v59, 0.0  ;;  %v2468_v7 = vadd.f32 %v8380_v14, %v2467_v60  ;;  %6702 = vrot.lane.b32.xlu0 %v6701_v0, %s7274_s21 }
 0x464   : > { %v8805_v36 = vld [vmem:[#allocation3 + $0x88] sm:$0xff] }
 0x465   : > { %v2539_v3 = vmul.f32 %v8425_v54, %v2515_v61  ;;  %v2514_v1 = vmax.f32 %v2468_v7, 0.0  ;;  %v6716_v32 = vpack.i.bf16 %v8787_v58, %v8805_v36 }
 0x466   : > { %6712 = vrot.lane.b32.xlu1 %v6711_v57, %s7274_s21  ;;  %v6063_v44 = vpop.f32.mrf.mxu1  ;;  %v2618_v19 = vld [vmem:[#allocation3 + $0x79] sm:$0xff]  ;;  %v8811_v29 = vld [vmem:[#allocation3 + $0x81] sm:$0xff] }
 0x467   : > { %v8813_v37 = vld [vmem:[#allocation3 + $0x80] sm:$0xff]  ;;  %2563 = vst.msk [vmem:[#allocation3 + $0x98] sm:$0xff] %vm788_vm2, %v2539_v3  ;;  %v2538_v43 = vmul.f32 %v8415_v41, %v2514_v1  ;;  %v2483_v24 = vadd.f32 %v6063_v44, %v8380_v14  ;;  %6090 = vmatprep.mubr.msk.f32.mxu1 %vm788_vm2, %v2618_v19  ;;  %6717 = vrot.lane.b32.xlu0 %v6716_v32, %s7273_s12  ;;  %v7127_v3 = vld [vmem:[%s10093_s0 + $0xb0] sm:$0xff] }
 0x468   : > { %v6726_v54 = vpack.i.bf16 %v8783_v45, %v8813_v37  ;;  %v8822_v30 = vld [vmem:[#allocation3 + $0x7f] sm:$0xff]  ;;  %v2477_v38 = vpop.f32.mrf.mxu1  ;;  %6091 = vmatmul.mubr.msk.f32.gmra.mxu1 %vm788_vm2, %v8811_v29  ;;  %v8826_v52 = vld [vmem:[#allocation3 + $0x87] sm:$0xff]  ;;  %v6731_v59 = vpack.i.bf16 %v8730_v25, %v2618_v19 }
 0x469   : > { %2562 = vst.msk [vmem:[#allocation3 + $0x90] sm:$0xff] %vm788_vm2, %v2538_v43  ;;  %v2517_v41 = vmax.f32 %v2483_v24, 0.0  ;;  %v2478_v2 = vadd.f32 %v8380_v14, %v2477_v38  ;;  %v6721_v23 = vpack.i.bf16 %v8736_v34, %v8822_v30  ;;  %v6736_v21 = vpack.i.bf16 %v8771_v13, %v8826_v52  ;;  %v7126_v13 = vld [vmem:[%s10093_s0 + $0xb8] sm:$0xff] }
 0x46a   : > { %6727 = vrot.lane.b32.xlu1 %v6726_v54, %s7273_s12  ;;  %v6066_v40 = vpop.f32.mrf.mxu1 }
 0x46b   : > { %v2541_v12 = vmul.f32 %v7125_v49, %v2517_v41  ;;  %v2516_v47 = vmax.f32 %v2478_v2, 0.0  ;;  %v2493_v50 = vadd.f32 %v6066_v40, %v8380_v14  ;;  %6722 = vrot.lane.b32.xlu0 %v6721_v23, %s7275_s29 }
 0x46c   : > { %v2487_v56 = vpop.f32.mrf.mxu1 }
 0x46d   : > { %2565 = vst.msk [vmem:[#allocation3 + $0xa8] sm:$0xff] %vm788_vm2, %v2541_v12  ;;  %v2540_v22 = vmul.f32 %v8434_v17, %v2516_v47  ;;  %v2519_v34 = vmax.f32 %v2493_v50, 0.0  ;;  %v2488_v10 = vadd.f32 %v8380_v14, %v2487_v56  ;;  %v6741_v17 = vpack.i.bf16 %v8775_v20, %v8811_v29 }
 0x46e   : > { %6737 = vrot.lane.b32.xlu1 %v6736_v21, %s7275_s29  ;;  %v8845_v0 = vld [vmem:[#allocation3 + $0x98] sm:$0xff] }
 0x46f   : > { %2564 = vst.msk [vmem:[#allocation3 + $0xa0] sm:$0xff] %vm788_vm2, %v2540_v22  ;;  %v2543_v60 = vmul.f32 %v7126_v13, %v2519_v34  ;;  %v2518_v61 = vmax.f32 %v2488_v10, 0.0  ;;  %6732 = vrot.lane.b32.xlu0 %v6731_v59, %s7274_s21  ;;  %v6746_v32 = vpack.i.bf16 %v8826_v52, %v8845_v0 }
 0x470   : > { %v2620_v14 = vld [vmem:[#allocation3 + $0x89] sm:$0xff]  ;;  %v2621_v7 = vld [vmem:[#allocation3 + $0x91] sm:$0xff] }
 0x471   : > { %v8854_v57 = vld [vmem:[#allocation3 + $0x90] sm:$0xff]  ;;  %2567 = vst.msk [vmem:[#allocation3 + $0xb8] sm:$0xff] %vm788_vm2, %v2543_v60  ;;  %v2542_v1 = vmul.f32 %v7127_v3, %v2518_v61  ;;  %6093 = vmatprep.mubr.msk.f32.mxu1 %vm788_vm2, %v2620_v14  ;;  %v6761_v23 = vpack.i.bf16 %v8765_v11, %v2620_v14 }
 0x472   : > { %6742 = vrot.lane.b32.xlu1 %v6741_v17, %s7274_s21  ;;  %6094 = vmatmul.mubr.msk.f32.gmra.mxu1 %vm788_vm2, %v2621_v7  ;;  %v8865_v44 = vld [vmem:[#allocation3 + $0x8f] sm:$0xff]  ;;  %v6756_v43 = vpack.i.bf16 %v8822_v30, %v8854_v57  ;;  %v2622_v24 = vld [vmem:[#allocation3 + $0x97] sm:$0xff] }
 0x473   : > { %2566 = vst.msk [vmem:[#allocation3 + $0xb0] sm:$0xff] %vm788_vm2, %v2542_v1  ;;  %6747 = vrot.lane.b32.xlu0 %v6746_v32, %s7273_s12  ;;  %v6751_v54 = vpack.i.bf16 %v8773_v53, %v8865_v44  ;;  %v6766_v41 = vpack.i.bf16 %v2618_v19, %v2622_v24  ;;  %v6771_v53 = vpack.i.bf16 %v8813_v37, %v2621_v7 }
 0x474   : > { %v2630_v22 = vld [vmem:[#allocation3 + $0xa8] sm:$0xff] }
 0x475   : > { %v6791_v10 = vpack.i.bf16 %v2622_v24, %v2630_v22 }
 0x476   : > { %6757 = vrot.lane.b32.xlu1 %v6756_v43, %s7273_s12  ;;  %v2626_v38 = vld [vmem:[#allocation3 + $0x99] sm:$0xff]  ;;  %v2627_v2 = vld [vmem:[#allocation3 + $0xa1] sm:$0xff] }
 0x477   : > { %6096 = vmatprep.mubr.msk.f32.mxu1 %vm788_vm2, %v2626_v38  ;;  %6752 = vrot.lane.b32.xlu0 %v6751_v54, %s7275_s29  ;;  %v2623_v49 = vld [vmem:[#allocation3 + $0x9f] sm:$0xff]  ;;  %v2628_v21 = vld [vmem:[#allocation3 + $0xa7] sm:$0xff]  ;;  %v6786_v56 = vpack.i.bf16 %v8805_v36, %v2626_v38 }
 0x478   : > { %6097 = vmatmul.mubr.msk.f32.gmra.mxu1 %vm788_vm2, %v2627_v2  ;;  %v8882_v47 = vld [vmem:[#allocation3 + $0xa0] sm:$0xff]  ;;  %v6776_v19 = vpack.i.bf16 %v8811_v29, %v2623_v49  ;;  %v6796_v34 = vpack.i.bf16 %v2620_v14, %v2628_v21  ;;  %v6801_v29 = vpack.i.bf16 %v8854_v57, %v2627_v2 }
 0x479   : > { %v6781_v50 = vpack.i.bf16 %v8865_v44, %v8882_v47  ;;  %v2568_v54 = vld [vmem:[#allocation3 + $0x7] sm:$0xff] }
 0x47a   : > { %6767 = vrot.lane.b32.xlu1 %v6766_v41, %s7275_s29  ;;  %v2632_v40 = vld [vmem:[#allocation3 + $0xa9] sm:$0xff]  ;;  %v2633_v12 = vld [vmem:[#allocation3 + $0xb1] sm:$0xff] }
 0x47b   : > { %6762 = vrot.lane.b32.xlu0 %v6761_v23, %s7274_s21  ;;  %6099 = vmatprep.mubr.msk.f32.mxu1 %vm788_vm2, %v2632_v40  ;;  %v2629_v59 = vld [vmem:[#allocation3 + $0xaf] sm:$0xff] }
 0x47c   : > { %6100 = vmatmul.mubr.msk.f32.gmra.mxu1 %vm788_vm2, %v2633_v12  ;;  %v2631_v13 = vld [vmem:[#allocation3 + $0xb0] sm:$0xff]  ;;  %v6806_v60 = vpack.i.bf16 %v2621_v7, %v2629_v59 }
 0x47d   : > { %v6811_v61 = vpack.i.bf16 %v2623_v49, %v2631_v13  ;;  %v2569_v59 = vld [vmem:[#allocation3 + $0xf] sm:$0xff] }
 0x47e   : > { %6772 = vrot.lane.b32.xlu1 %v6771_v53, %s7274_s21 }
 0x47f   : > { %6777 = vrot.lane.b32.xlu0 %v6776_v19, %s7275_s29 }
 0x482   : > { %6782 = vrot.lane.b32.xlu1 %v6781_v50, %s7273_s12 }
 0x483   : > { %6787 = vrot.lane.b32.xlu0 %v6786_v56, %s7274_s21 }
 0x486   : > { %6797 = vrot.lane.b32.xlu1 %v6796_v34, %s7275_s29 }
 0x487   : > { %6792 = vrot.lane.b32.xlu0 %v6791_v10, %s7273_s12 }
 0x48a   : > { %6802 = vrot.lane.b32.xlu1 %v6801_v29, %s7274_s21 }
 0x48b   : > { %6807 = vrot.lane.b32.xlu0 %v6806_v60, %s7275_s29 }
 0x48e   : > { %6812 = vrot.lane.b32.xlu1 %v6811_v61, %s7273_s12 }
 0x491   : > { %v6548_v17 = vpop.permute.xlu0 %6547 }
 0x492   : > { %v6550_v38 = vunpack.i.h.bf16 %v6548_v17  ;;  %v6549_v41 = vunpack.i.l.bf16 %v6548_v17 }
 0x493   : > { %v6558_v3 = vpop.permute.xlu1 %6557 }
 0x494   : > { %v6560_v43 = vunpack.i.h.bf16 %v6558_v3  ;;  %v6559_v24 = vunpack.i.l.bf16 %v6558_v3 }
 0x495   : > { %v6553_v14 = vpop.permute.xlu0 %6552 }
 0x496   : > { %v6555_v1 = vunpack.i.h.bf16 %v6553_v14  ;;  %v6554_v32 = vunpack.i.l.bf16 %v6553_v14 }
 0x497   : > { %v6563_v53 = vpop.permute.xlu1 %6562 }
 0x498   : > { %v3020_v2 = vsel %vm788_vm2, %v2568_v54, %v6555_v1  ;;  %v3074_v7 = vsel %vm788_vm2, %v8650_v42, %v6554_v32  ;;  %v6565_v50 = vunpack.i.h.bf16 %v6563_v53  ;;  %v6564_v21 = vunpack.i.l.bf16 %v6563_v53 }
 0x499   : > { %v3092_v23 = vsel %vm1647_vm3, %v3074_v7, %v6559_v24  ;;  %v3038_v40 = vsel %vm1647_vm3, %v3020_v2, %v6560_v43 }
 0x49a   : > { %v3110_v49 = vsel %vm1666_vm4, %v3092_v23, %v6549_v41  ;;  %v3056_v12 = vsel %vm1666_vm4, %v3038_v40, %v6550_v38  ;;  %v3075_v60 = vsel %vm788_vm2, %v8654_v63, %v6564_v21  ;;  %v3021_v61 = vsel %vm788_vm2, %v2569_v59, %v6565_v50 }
 0x49b   : > { %3275 = vmatprep.mubr.f32.mxu0 %v3110_v49 }
 0x49c   : > { %3276 = vmatmul.mubr.f32.vlgmr.msra.gmra.mxu0 %v3056_v12 }
 0x49d   : > { %v6568_v19 = vpop.permute.xlu0 %6567 }
 0x49e   : > { %v6570_v2 = vunpack.i.h.bf16 %v6568_v19  ;;  %v6569_v63 = vunpack.i.l.bf16 %v6568_v19 }
 0x4a0   : > { %v6578_v56 = vpop.permute.xlu1 %6577 }
 0x4a1   : > { %v6573_v22 = vpop.permute.xlu0 %6572  ;;  %v6580_v42 = vunpack.i.h.bf16 %v6578_v56  ;;  %v6579_v29 = vunpack.i.l.bf16 %v6578_v56 }
 0x4a2   : > { %v6575_v34 = vunpack.i.h.bf16 %v6573_v22  ;;  %v6574_v10 = vunpack.i.l.bf16 %v6573_v22 }
 0x4a4   : > { %v6588_v13 = vpop.permute.xlu1 %6587  ;;  %v3093_v17 = vsel %vm1647_vm3, %v3075_v60, %v6574_v10  ;;  %v3039_v3 = vsel %vm1647_vm3, %v3021_v61, %v6575_v34 }
 0x4a5   : > { %v6583_v14 = vpop.permute.xlu0 %6582  ;;  %v3111_v1 = vsel %vm1666_vm4, %v3093_v17, %v6579_v29  ;;  %v3057_v32 = vsel %vm1666_vm4, %v3039_v3, %v6580_v42  ;;  %v6590_v54 = vunpack.i.h.bf16 %v6588_v13  ;;  %v6589_v38 = vunpack.i.l.bf16 %v6588_v13 }
 0x4a6   : > { %v6585_v43 = vunpack.i.h.bf16 %v6583_v14  ;;  %v6584_v24 = vunpack.i.l.bf16 %v6583_v14  ;;  %3280 = vmatprep.mubr.f32.mxu0 %v3111_v1 }
 0x4a7   : > { %3281 = vmatmul.mubr.f32.gmra.mxu0 %v3057_v32 }
 0x4a8   : > { %v6593_v41 = vpop.permute.xlu1 %6592  ;;  %v3076_v7 = vsel %vm788_vm2, %v8600_v28, %v6584_v24  ;;  %v3022_v23 = vsel %vm788_vm2, %v8598_v5, %v6585_v43 }
 0x4a9   : > { %v6598_v40 = vpop.permute.xlu0 %6597  ;;  %v3094_v49 = vsel %vm1647_vm3, %v3076_v7, %v6589_v38  ;;  %v3040_v12 = vsel %vm1647_vm3, %v3022_v23, %v6590_v54  ;;  %v6595_v21 = vunpack.i.h.bf16 %v6593_v41  ;;  %v6594_v56 = vunpack.i.l.bf16 %v6593_v41 }
 0x4aa   : > { %v3112_v53 = vsel %vm1666_vm4, %v3094_v49, %v6569_v63  ;;  %v3058_v50 = vsel %vm1666_vm4, %v3040_v12, %v6570_v2  ;;  %v6599_v54 = vunpack.i.l.bf16 %v6598_v40 }
 0x4ab   : > { %3285 = vmatprep.mubr.f32.mxu0 %v3112_v53  ;;  %v3077_v42 = vsel %vm788_vm2, %v8630_v39, %v6594_v56  ;;  %v3023_v29 = vsel %vm788_vm2, %v8626_v31, %v6595_v21  ;;  %v6600_v39 = vunpack.i.h.bf16 %v6598_v40 }
 0x4ac   : > { %v6608_v22 = vpop.permute.xlu1 %6607  ;;  %3286 = vmatmul.mubr.f32.gmra.mxu0 %v3058_v50 }
 0x4ad   : > { %v6603_v19 = vpop.permute.xlu0 %6602  ;;  %v6610_v10 = vunpack.i.h.bf16 %v6608_v22  ;;  %v6609_v59 = vunpack.i.l.bf16 %v6608_v22 }
 0x4ae   : > { %v6605_v34 = vunpack.i.h.bf16 %v6603_v19  ;;  %v6604_v28 = vunpack.i.l.bf16 %v6603_v19 }
 0x4b0   : > { %v6618_v5 = vpop.permute.xlu1 %6617  ;;  %v3095_v13 = vsel %vm1647_vm3, %v3077_v42, %v6604_v28  ;;  %v3041_v60 = vsel %vm1647_vm3, %v3023_v29, %v6605_v34 }
 0x4b1   : > { %v6613_v61 = vpop.permute.xlu0 %6612  ;;  %v3113_v17 = vsel %vm1666_vm4, %v3095_v13, %v6609_v59  ;;  %v3059_v3 = vsel %vm1666_vm4, %v3041_v60, %v6610_v10  ;;  %v6620_v32 = vunpack.i.h.bf16 %v6618_v5  ;;  %v6619_v43 = vunpack.i.l.bf16 %v6618_v5  ;;  %v5569_v13 = vld [vmem:[%s10083_s4 + $0x58] sm:$0xff] }
 0x4b2   : > { %v6615_v14 = vunpack.i.h.bf16 %v6613_v61  ;;  %v6614_v1 = vunpack.i.l.bf16 %v6613_v61  ;;  %3290 = vmatprep.mubr.f32.mxu0 %v3113_v17  ;;  %6102 = vmatprep.subr.mxu1 %v5569_v13 }
 0x4b3   : > { %3291 = vmatmul.mubr.f32.gmra.mxu0 %v3059_v3  ;;  %6103 = vmatpush3.msra.mxu1 %v5569_v13 }
 0x4b4   : > { %v6623_v24 = vpop.permute.xlu1 %6622  ;;  %v3078_v31 = vsel %vm788_vm2, %v8621_v55, %v6614_v1  ;;  %v3024_v38 = vsel %vm788_vm2, %v8606_v33, %v6615_v14 }
 0x4b5   : > { %v6628_v41 = vpop.permute.xlu0 %6627  ;;  %v3096_v2 = vsel %vm1647_vm3, %v3078_v31, %v6619_v43  ;;  %v3042_v63 = vsel %vm1647_vm3, %v3024_v38, %v6620_v32  ;;  %v6625_v49 = vunpack.i.h.bf16 %v6623_v24  ;;  %v6624_v12 = vunpack.i.l.bf16 %v6623_v24 }
 0x4b6   : > { %v3114_v7 = vsel %vm1666_vm4, %v3096_v2, %v6599_v54  ;;  %v3060_v23 = vsel %vm1666_vm4, %v3042_v63, %v6600_v39  ;;  %v6629_v17 = vunpack.i.l.bf16 %v6628_v41 }
 0x4b7   : > { %3295 = vmatprep.mubr.f32.mxu0 %v3114_v7  ;;  %v3079_v22 = vsel %vm788_vm2, %v8668_v46, %v6624_v12  ;;  %v3025_v19 = vsel %vm788_vm2, %v8637_v26, %v6625_v49  ;;  %v6630_v26 = vunpack.i.h.bf16 %v6628_v41 }
 0x4b8   : > { %v6638_v53 = vpop.permute.xlu1 %6637  ;;  %3296 = vmatmul.mubr.f32.gmra.mxu0 %v3060_v23 }
 0x4b9   : > { %v6633_v40 = vpop.permute.xlu0 %6632  ;;  %v6640_v21 = vunpack.i.h.bf16 %v6638_v53  ;;  %v6639_v56 = vunpack.i.l.bf16 %v6638_v53 }
 0x4ba   : > { %v6635_v50 = vunpack.i.h.bf16 %v6633_v40  ;;  %v6634_v55 = vunpack.i.l.bf16 %v6633_v40 }
 0x4bc   : > { %v6648_v33 = vpop.permute.xlu1 %6647  ;;  %v3097_v34 = vsel %vm1647_vm3, %v3079_v22, %v6634_v55  ;;  %v3043_v28 = vsel %vm1647_vm3, %v3025_v19, %v6635_v50 }
 0x4bd   : > { %v6643_v10 = vpop.permute.xlu0 %6642  ;;  %v3115_v59 = vsel %vm1666_vm4, %v3097_v34, %v6639_v56  ;;  %v3061_v5 = vsel %vm1666_vm4, %v3043_v28, %v6640_v21  ;;  %v6650_v46 = vunpack.i.h.bf16 %v6648_v33  ;;  %v6649_v60 = vunpack.i.l.bf16 %v6648_v33 }
 0x4be   : > { %v6645_v42 = vunpack.i.h.bf16 %v6643_v10  ;;  %v6644_v29 = vunpack.i.l.bf16 %v6643_v10  ;;  %3300 = vmatprep.mubr.f32.mxu0 %v3115_v59 }
 0x4bf   : > { %3301 = vmatmul.mubr.f32.gmra.mxu0 %v3061_v5 }
 0x4c0   : > { %v6653_v61 = vpop.permute.xlu1 %6652  ;;  %v3080_v3 = vsel %vm788_vm2, %v8660_v4, %v6644_v29  ;;  %v3026_v14 = vsel %vm788_vm2, %v8641_v51, %v6645_v42 }
 0x4c1   : > { %v6658_v1 = vpop.permute.xlu0 %6657  ;;  %v3098_v32 = vsel %vm1647_vm3, %v3080_v3, %v6649_v60  ;;  %v3044_v43 = vsel %vm1647_vm3, %v3026_v14, %v6650_v46  ;;  %v6655_v54 = vunpack.i.h.bf16 %v6653_v61  ;;  %v6654_v31 = vunpack.i.l.bf16 %v6653_v61 }
 0x4c2   : > { %v3116_v24 = vsel %vm1666_vm4, %v3098_v32, %v6629_v17  ;;  %v3062_v39 = vsel %vm1666_vm4, %v3044_v43, %v6630_v26  ;;  %v6659_v34 = vunpack.i.l.bf16 %v6658_v1 }
 0x4c3   : > { %3305 = vmatprep.mubr.f32.mxu0 %v3116_v24  ;;  %v3081_v23 = vsel %vm788_vm2, %v8703_v9, %v6654_v31  ;;  %v3027_v49 = vsel %vm788_vm2, %v8675_v6, %v6655_v54  ;;  %v6660_v9 = vunpack.i.h.bf16 %v6658_v1 }
 0x4c4   : > { %v6668_v38 = vpop.permute.xlu1 %6667  ;;  %3306 = vmatmul.mubr.f32.gmra.mxu0 %v3062_v39 }
 0x4c5   : > { %v6663_v41 = vpop.permute.xlu0 %6662  ;;  %v6670_v63 = vunpack.i.h.bf16 %v6668_v38  ;;  %v6669_v51 = vunpack.i.l.bf16 %v6668_v38 }
 0x4c6   : > { %v6665_v4 = vunpack.i.h.bf16 %v6663_v41  ;;  %v6664_v2 = vunpack.i.l.bf16 %v6663_v41 }
 0x4c8   : > { %v6678_v7 = vpop.permute.xlu1 %6677  ;;  %v3099_v12 = vsel %vm1647_vm3, %v3081_v23, %v6664_v2  ;;  %v3045_v53 = vsel %vm1647_vm3, %v3027_v49, %v6665_v4 }
 0x4c9   : > { %v6673_v40 = vpop.permute.xlu0 %6672  ;;  %v3117_v50 = vsel %vm1666_vm4, %v3099_v12, %v6669_v51  ;;  %v3063_v55 = vsel %vm1666_vm4, %v3045_v53, %v6670_v63  ;;  %v6680_v33 = vunpack.i.h.bf16 %v6678_v7  ;;  %v6679_v22 = vunpack.i.l.bf16 %v6678_v7 }
 0x4ca   : > { %v6675_v21 = vunpack.i.h.bf16 %v6673_v40  ;;  %v6674_v56 = vunpack.i.l.bf16 %v6673_v40  ;;  %3310 = vmatprep.mubr.f32.mxu0 %v3117_v50 }
 0x4cb   : > { %3311 = vmatmul.mubr.f32.gmra.mxu0 %v3063_v55 }
 0x4cc   : > { %v6683_v19 = vpop.permute.xlu1 %6682  ;;  %v3082_v6 = vsel %vm788_vm2, %v8695_v62, %v6674_v56  ;;  %v3028_v28 = vsel %vm788_vm2, %v8679_v27, %v6675_v21 }
 0x4cd   : > { %v6688_v10 = vpop.permute.xlu0 %6687  ;;  %v3100_v59 = vsel %vm1647_vm3, %v3082_v6, %v6679_v22  ;;  %v3046_v5 = vsel %vm1647_vm3, %v3028_v28, %v6680_v33  ;;  %v6685_v13 = vunpack.i.h.bf16 %v6683_v19  ;;  %v6684_v46 = vunpack.i.l.bf16 %v6683_v19 }
 0x4ce   : > { %v3118_v42 = vsel %vm1666_vm4, %v3100_v59, %v6659_v34  ;;  %v3064_v29 = vsel %vm1666_vm4, %v3046_v5, %v6660_v9  ;;  %v6689_v63 = vunpack.i.l.bf16 %v6688_v10 }
 0x4cf   : > { %3315 = vmatprep.mubr.f32.mxu0 %v3118_v42  ;;  %v3083_v14 = vsel %vm788_vm2, %v8738_v16, %v6684_v46  ;;  %v3029_v1 = vsel %vm788_vm2, %v8710_v48, %v6685_v13  ;;  %v6690_v16 = vunpack.i.h.bf16 %v6688_v10 }
 0x4d0   : > { %v6698_v60 = vpop.permute.xlu1 %6697  ;;  %3316 = vmatmul.mubr.f32.gmra.mxu0 %v3064_v29 }
 0x4d1   : > { %v6693_v61 = vpop.permute.xlu0 %6692  ;;  %v6700_v17 = vunpack.i.h.bf16 %v6698_v60  ;;  %v6699_v3 = vunpack.i.l.bf16 %v6698_v60 }
 0x4d2   : > { %v6695_v26 = vunpack.i.h.bf16 %v6693_v61  ;;  %v6694_v62 = vunpack.i.l.bf16 %v6693_v61 }
 0x4d4   : > { %v6708_v27 = vpop.permute.xlu1 %6707  ;;  %v3101_v32 = vsel %vm1647_vm3, %v3083_v14, %v6694_v62  ;;  %v3047_v43 = vsel %vm1647_vm3, %v3029_v1, %v6695_v26 }
 0x4d5   : > { %v6703_v24 = vpop.permute.xlu0 %6702  ;;  %v3119_v39 = vsel %vm1666_vm4, %v3101_v32, %v6699_v3  ;;  %v3065_v54 = vsel %vm1666_vm4, %v3047_v43, %v6700_v17  ;;  %v6710_v41 = vunpack.i.h.bf16 %v6708_v27  ;;  %v6709_v4 = vunpack.i.l.bf16 %v6708_v27  ;;  %v5568_v3 = vld [vmem:[%s10083_s4 + $0x50] sm:$0xff] }
 0x4d6   : > { %v6705_v31 = vunpack.i.h.bf16 %v6703_v24  ;;  %v6704_v38 = vunpack.i.l.bf16 %v6703_v24  ;;  %3320 = vmatprep.mubr.f32.mxu0 %v3119_v39  ;;  %6104 = vmatprep.subr.mxu1 %v5568_v3  ;;  %v5566_v24 = vld [vmem:[%s10083_s4 + $0x40] sm:$0xff] }
 0x4d7   : > { %3321 = vmatmul.mubr.f32.gmra.mxu0 %v3065_v54  ;;  %6105 = vmatpush3.msra.mxu1 %v5568_v3 }
 0x4d8   : > { %v6713_v2 = vpop.permute.xlu1 %6712  ;;  %v3084_v48 = vsel %vm788_vm2, %v8730_v25, %v6704_v38  ;;  %v3030_v51 = vsel %vm788_vm2, %v8714_v18, %v6705_v31  ;;  %v3593_v31 = vld [vmem:[#allocation2] sm:$0xff] }
 0x4d9   : > { %v6718_v7 = vpop.permute.xlu0 %6717  ;;  %v3102_v23 = vsel %vm1647_vm3, %v3084_v48, %v6709_v4  ;;  %v3048_v49 = vsel %vm1647_vm3, %v3030_v51, %v6710_v41  ;;  %v6715_v40 = vunpack.i.h.bf16 %v6713_v2  ;;  %v6714_v50 = vunpack.i.l.bf16 %v6713_v2  ;;  %6110 = vmatprep.mubr.msk.f32.mxu1 %vm788_vm2, %v3593_v31 }
 0x4da   : > { %v3120_v12 = vsel %vm1666_vm4, %v3102_v23, %v6689_v63  ;;  %v3066_v53 = vsel %vm1666_vm4, %v3048_v49, %v6690_v16  ;;  %v6719_v60 = vunpack.i.l.bf16 %v6718_v7  ;;  %v3594_v63 = vld [vmem:[#allocation2 + $0x8] sm:$0xff] }
 0x4db   : > { %3325 = vmatprep.mubr.f32.mxu0 %v3120_v12  ;;  %v3085_v19 = vsel %vm788_vm2, %v8775_v20, %v6714_v50  ;;  %v3031_v9 = vsel %vm788_vm2, %v8745_v15, %v6715_v40  ;;  %v6720_v20 = vunpack.i.h.bf16 %v6718_v7 }
 0x4dc   : > { %v6728_v55 = vpop.permute.xlu1 %6727  ;;  %3326 = vmatmul.mubr.f32.gmra.mxu0 %v3066_v53  ;;  %v3595_v53 = vld [vmem:[#allocation2 + $0x10] sm:$0xff] }
 0x4dd   : > { %v6723_v21 = vpop.permute.xlu0 %6722  ;;  %v6730_v33 = vunpack.i.h.bf16 %v6728_v55  ;;  %v6729_v22 = vunpack.i.l.bf16 %v6728_v55 }
 0x4de   : > { %v6725_v56 = vunpack.i.h.bf16 %v6723_v21  ;;  %v6724_v25 = vunpack.i.l.bf16 %v6723_v21 }
 0x4e0   : > { %v6738_v18 = vpop.permute.xlu1 %6737  ;;  %v3103_v34 = vsel %vm1647_vm3, %v3085_v19, %v6724_v25  ;;  %v3049_v6 = vsel %vm1647_vm3, %v3031_v9, %v6725_v56 }
 0x4e1   : > { %v6733_v28 = vpop.permute.xlu0 %6732  ;;  %v3121_v10 = vsel %vm1666_vm4, %v3103_v34, %v6729_v22  ;;  %v3067_v59 = vsel %vm1666_vm4, %v3049_v6, %v6730_v33  ;;  %v6740_v29 = vunpack.i.h.bf16 %v6738_v18  ;;  %v6739_v13 = vunpack.i.l.bf16 %v6738_v18 }
 0x4e2   : > { %v6735_v5 = vunpack.i.h.bf16 %v6733_v28  ;;  %v6734_v42 = vunpack.i.l.bf16 %v6733_v28  ;;  %3330 = vmatprep.mubr.f32.mxu0 %v3121_v10 }
 0x4e3   : > { %3331 = vmatmul.mubr.f32.gmra.mxu0 %v3067_v59 }
 0x4e4   : > { %v6743_v46 = vpop.permute.xlu1 %6742  ;;  %v3086_v15 = vsel %vm788_vm2, %v8765_v11, %v6734_v42  ;;  %v3032_v61 = vsel %vm788_vm2, %v8749_v8, %v6735_v5  ;;  %v5567_v8 = vld [vmem:[%s10083_s4 + $0x48] sm:$0xff] }
 0x4e5   : > { %v6748_v26 = vpop.permute.xlu0 %6747  ;;  %v3104_v62 = vsel %vm1647_vm3, %v3086_v15, %v6739_v13  ;;  %v3050_v17 = vsel %vm1647_vm3, %v3032_v61, %v6740_v29  ;;  %v6745_v1 = vunpack.i.h.bf16 %v6743_v46  ;;  %v6744_v32 = vunpack.i.l.bf16 %v6743_v46  ;;  %6106 = vmatprep.subr.mxu1 %v5567_v8 }
 0x4e6   : > { %v3122_v27 = vsel %vm1666_vm4, %v3104_v62, %v6719_v60  ;;  %v3068_v14 = vsel %vm1666_vm4, %v3050_v17, %v6720_v20  ;;  %6107 = vmatpush3.msra.mxu1 %v5567_v8  ;;  %v6749_v40 = vunpack.i.l.bf16 %v6748_v26 }
 0x4e7   : > { %3335 = vmatprep.mubr.f32.mxu0 %v3122_v27  ;;  %6108 = vmatprep.subr.mxu1 %v5566_v24  ;;  %v3087_v2 = vsel %vm788_vm2, %v8813_v37, %v6744_v32  ;;  %v3033_v16 = vsel %vm788_vm2, %v8783_v45, %v6745_v1  ;;  %v6750_v45 = vunpack.i.h.bf16 %v6748_v26 }
 0x4e8   : > { %v6758_v11 = vpop.permute.xlu1 %6757  ;;  %3336 = vmatmul.mubr.f32.gmra.mxu0 %v3068_v14  ;;  %6109 = vmatpush3.msra.mxu1 %v5566_v24 }
 0x4e9   : > { %v6753_v43 = vpop.permute.xlu0 %6752  ;;  %v6760_v38 = vunpack.i.h.bf16 %v6758_v11  ;;  %v6759_v41 = vunpack.i.l.bf16 %v6758_v11  ;;  %6111 = vmatmul.mubr.msk.f32.vlgmr.msra.gmra.mxu1 %vm788_vm2, %v3594_v63 }
 0x4ea   : > { %v6755_v39 = vunpack.i.h.bf16 %v6753_v43  ;;  %v6754_v54 = vunpack.i.l.bf16 %v6753_v43  ;;  %6113 = vmatprep.mubr.msk.f32.mxu1 %vm788_vm2, %v3595_v53 }
 0x4ec   : > { %v6768_v4 = vpop.permute.xlu1 %6767  ;;  %v3105_v48 = vsel %vm1647_vm3, %v3087_v2, %v6754_v54  ;;  %v3051_v51 = vsel %vm1647_vm3, %v3033_v16, %v6755_v39 }
 0x4ed   : > { %v6763_v7 = vpop.permute.xlu0 %6762  ;;  %v3123_v23 = vsel %vm1666_vm4, %v3105_v48, %v6759_v41  ;;  %v3069_v49 = vsel %vm1666_vm4, %v3051_v51, %v6760_v38  ;;  %v6770_v50 = vunpack.i.h.bf16 %v6768_v4  ;;  %v6769_v55 = vunpack.i.l.bf16 %v6768_v4 }
 0x4ee   : > { %v6765_v12 = vunpack.i.h.bf16 %v6763_v7  ;;  %v6764_v37 = vunpack.i.l.bf16 %v6763_v7  ;;  %3340 = vmatprep.mubr.f32.mxu0 %v3123_v23  ;;  %v6077_v7 = vpop.f32.mrf.mxu1 }
 0x4ef   : > { %3341 = vmatmul.mubr.f32.gmra.mxu0 %v3069_v49 }
 0x4f0   : > { %v6773_v21 = vpop.permute.xlu1 %6772  ;;  %v3088_v33 = vsel %vm788_vm2, %v8805_v36, %v6764_v37  ;;  %v3034_v22 = vsel %vm788_vm2, %v8787_v58, %v6765_v12  ;;  %v3432_v49 = vpop.f32.mrf.mxu1 }
 0x4f1   : > { %v6775_v56 = vunpack.i.h.bf16 %v6773_v21  ;;  %v6774_v25 = vunpack.i.l.bf16 %v6773_v21  ;;  %v6778_v18 = vpop.permute.xlu0 %6777  ;;  %v3106_v19 = vsel %vm1647_vm3, %v3088_v33, %v6769_v55  ;;  %v3052_v9 = vsel %vm1647_vm3, %v3034_v22, %v6770_v50  ;;  %v7129_v50 = vld [vmem:[#allocation2 + $0x18] sm:$0xff] }
 0x4f2   : > { %v6780_v34 = vunpack.i.h.bf16 %v6778_v18  ;;  %v6779_v6 = vunpack.i.l.bf16 %v6778_v18  ;;  %v3124_v28 = vsel %vm1666_vm4, %v3106_v19, %v6749_v40  ;;  %v3070_v10 = vsel %vm1666_vm4, %v3052_v9, %v6750_v45  ;;  %v9065_v45 = vld [vmem:[%s10093_s0 + $0x18] sm:$0xff] }
 0x4f3   : > { %3345 = vmatprep.mubr.f32.mxu0 %v3124_v28  ;;  %v3089_v5 = vsel %vm788_vm2, %v8854_v57, %v6774_v25  ;;  %v3035_v36 = vsel %vm788_vm2, %v8822_v30, %v6775_v56 }
 0x4f4   : > { %v6783_v59 = vpop.permute.xlu1 %6782  ;;  %3346 = vmatmul.mubr.f32.gmra.mxu0 %v3070_v10  ;;  %v3107_v29 = vsel %vm1647_vm3, %v3089_v5, %v6779_v6  ;;  %v3053_v13 = vsel %vm1647_vm3, %v3035_v36, %v6780_v34  ;;  %v9074_v6 = vld [vmem:[%s10093_s0 + $0x20] sm:$0xff] }
 0x4f5   : > { %v6785_v58 = vunpack.i.h.bf16 %v6783_v59  ;;  %v6784_v42 = vunpack.i.l.bf16 %v6783_v59  ;;  %v6788_v46 = vpop.permute.xlu0 %6787  ;;  %v7131_v36 = vld [vmem:[#allocation2 + $0x20] sm:$0xff] }
 0x4f6   : > { %v6790_v20 = vunpack.i.h.bf16 %v6788_v46  ;;  %v6789_v60 = vunpack.i.l.bf16 %v6788_v46 }
 0x4f7   : > { %v3125_v15 = vsel %vm1666_vm4, %v3107_v29, %v6784_v42  ;;  %v3071_v61 = vsel %vm1666_vm4, %v3053_v13, %v6785_v58  ;;  %v9082_v29 = vld [vmem:[%s10093_s0 + $0x28] sm:$0xff] }
 0x4f8   : > { %v6798_v26 = vpop.permute.xlu1 %6797  ;;  %3350 = vmatprep.mubr.f32.mxu0 %v3125_v15  ;;  %v3090_v30 = vsel %vm788_vm2, %v8845_v0, %v6789_v60  ;;  %v3036_v17 = vsel %vm788_vm2, %v8826_v52, %v6790_v20  ;;  %v6080_v33 = vpop.f32.mrf.mxu1  ;;  %v7133_v60 = vld [vmem:[#allocation2 + $0x28] sm:$0xff] }
 0x4f9   : > { %v6800_v57 = vunpack.i.h.bf16 %v6798_v26  ;;  %v6799_v62 = vunpack.i.l.bf16 %v6798_v26  ;;  %3351 = vmatmul.mubr.f32.gmra.mxu0 %v3071_v61  ;;  %v6793_v3 = vpop.permute.xlu0 %6792 }
 0x4fa   : > { %v6795_v27 = vunpack.i.h.bf16 %v6793_v3  ;;  %v6794_v14 = vunpack.i.l.bf16 %v6793_v3  ;;  %v3442_v34 = vpop.f32.mrf.mxu1 }
 0x4fb   : > { %v3108_v1 = vsel %vm1647_vm3, %v3090_v30, %v6799_v62  ;;  %v3054_v32 = vsel %vm1647_vm3, %v3036_v17, %v6800_v57 }
 0x4fc   : > { %v6803_v11 = vpop.permute.xlu1 %6802  ;;  %v3126_v24 = vsel %vm1666_vm4, %v3108_v1, %v6794_v14  ;;  %v3072_v39 = vsel %vm1666_vm4, %v3054_v32, %v6795_v27  ;;  %v9091_v14 = vld [vmem:[%s10093_s0 + $0x30] sm:$0xff] }
 0x4fd   : > { %v6805_v8 = vunpack.i.h.bf16 %v6803_v11  ;;  %v6804_v43 = vunpack.i.l.bf16 %v6803_v11  ;;  %v6808_v54 = vpop.permute.xlu0 %6807  ;;  %3355 = vmatprep.mubr.f32.mxu0 %v3126_v24 }
 0x4fe   : > { %v6810_v0 = vunpack.i.h.bf16 %v6808_v54  ;;  %v6809_v31 = vunpack.i.l.bf16 %v6808_v54  ;;  %3356 = vmatmul.mubr.f32.gmra.mxu0 %v3072_v39  ;;  %v9099_v54 = vld [vmem:[%s10093_s0 + $0x38] sm:$0xff] }
 0x4ff   : > { %v3091_v52 = vsel %vm788_vm2, %v8882_v47, %v6804_v43  ;;  %v3037_v38 = vsel %vm788_vm2, %v8865_v44, %v6805_v8  ;;  %v9059_v47 = vld [vmem:[%s10086_s7 + $0x1] ss:$0 sm:$0xff]  ;;  %v7135_v8 = vld [vmem:[#allocation2 + $0x30] sm:$0xff] }
 0x500   : > { %v6813_v41 = vpop.permute.xlu1 %6812  ;;  %v3109_v16 = vsel %vm1647_vm3, %v3091_v52, %v6809_v31  ;;  %v3055_v63 = vsel %vm1647_vm3, %v3037_v38, %v6810_v0  ;;  %v7137_v38 = vld [vmem:[#allocation2 + $0x38] sm:$0xff] }
 0x501   : > { %v6815_v4 = vunpack.i.h.bf16 %v6813_v41  ;;  %v6814_v2 = vunpack.i.l.bf16 %v6813_v41 }
 0x503   : > { %v3127_v48 = vsel %vm1666_vm4, %v3109_v16, %v6814_v2  ;;  %v3073_v51 = vsel %vm1666_vm4, %v3055_v63, %v6815_v4 }
 0x504   : > { %3360 = vmatprep.mubr.f32.mxu0 %v3127_v48  ;;  %v6083_v26 = vpop.f32.mrf.mxu1 }
 0x505   : > { %3361 = vmatmul.mubr.f32.gmra.mxu0 %v3073_v51 }
 0x506   : > { %v3452_v27 = vpop.f32.mrf.mxu1 }
 0x510   : > { %v6086_v2 = vpop.f32.mrf.mxu1 }
 0x55c   : > { %v3277_v44 = vpop.f32.mrf.mxu0 }
 0x55d   : > { %v3278_v23 = vadd.f32 %v9059_v47, %v3277_v44  ;;  %v3462_v44 = vpop.f32.mrf.mxu1 }
 0x55e   : > { %v3279_v12 = vpop.f32.mrf.mxu0 }
 0x55f   : > { %v3433_v37 = vadd.f32 %v3432_v49, %v3278_v23  ;;  %v9109_v23 = vld [vmem:[%s10093_s0 + $0x40] sm:$0xff] }
 0x561   : > { %v3521_v53 = vmax.f32 %v3433_v37, 0.0 }
 0x563   : > { %v3539_v40 = vmul.f32 %v9065_v45, %v3521_v53  ;;  %v7139_v53 = vld [vmem:[#allocation2 + $0x40] sm:$0xff] }
 0x565   : > { %v3557_v55 = vadd.f32 %v7129_v50, %v3539_v40 }
 0x567   : > { %3575 = vst.msk [vmem:[#allocation2 + $0x18] sm:$0xff] %vm788_vm2, %v3557_v55  ;;  %v3282_v21 = vpop.f32.mrf.mxu0 }
 0x568   : > { %v3283_v56 = vadd.f32 %v9059_v47, %v3282_v21  ;;  %v9117_v21 = vld [vmem:[%s10093_s0 + $0x48] sm:$0xff] }
 0x569   : > { %v3284_v25 = vpop.f32.mrf.mxu0 }
 0x56a   : > { %v3438_v22 = vadd.f32 %v6077_v7, %v3283_v56 }
 0x56c   : > { %v3522_v18 = vmax.f32 %v3438_v22, 0.0  ;;  %v3287_v19 = vpop.f32.mrf.mxu0  ;;  %v7141_v22 = vld [vmem:[#allocation2 + $0x48] sm:$0xff] }
 0x56d   : > { %v3288_v9 = vadd.f32 %v9059_v47, %v3287_v19 }
 0x56e   : > { %v3540_v28 = vmul.f32 %v9074_v6, %v3522_v18  ;;  %v3289_v10 = vpop.f32.mrf.mxu0  ;;  %v3596_v59 = vld [vmem:[#allocation2 + $0x18] sm:$0xff] }
 0x56f   : > { %v3443_v5 = vadd.f32 %v3442_v34, %v3288_v9  ;;  %6114 = vmatmul.mubr.msk.f32.gmra.mxu1 %vm788_vm2, %v3596_v59  ;;  %v6089_v9 = vpop.f32.mrf.mxu1 }
 0x570   : > { %v3558_v58 = vadd.f32 %v7131_v36, %v3540_v28 }
 0x571   : > { %v3523_v42 = vmax.f32 %v3443_v5, 0.0  ;;  %v3472_v36 = vpop.f32.mrf.mxu1 }
 0x572   : > { %3576 = vst.msk [vmem:[#allocation2 + $0x20] sm:$0xff] %vm788_vm2, %v3558_v58  ;;  %v9127_v58 = vld [vmem:[%s10093_s0 + $0x50] sm:$0xff] }
 0x573   : > { %v3541_v13 = vmul.f32 %v9082_v29, %v3523_v42  ;;  %v3292_v46 = vpop.f32.mrf.mxu0 }
 0x574   : > { %v3293_v20 = vadd.f32 %v9059_v47, %v3292_v46 }
 0x575   : > { %v3559_v15 = vadd.f32 %v7133_v60, %v3541_v13  ;;  %v3294_v61 = vpop.f32.mrf.mxu0  ;;  %v7143_v60 = vld [vmem:[#allocation2 + $0x50] sm:$0xff] }
 0x576   : > { %v3448_v57 = vadd.f32 %v6080_v33, %v3293_v20  ;;  %v6092_v20 = vpop.f32.mrf.mxu1 }
 0x577   : > { %3577 = vst.msk [vmem:[#allocation2 + $0x28] sm:$0xff] %vm788_vm2, %v3559_v15 }
 0x578   : > { %v3524_v62 = vmax.f32 %v3448_v57, 0.0  ;;  %v3297_v30 = vpop.f32.mrf.mxu0  ;;  %v9135_v57 = vld [vmem:[%s10093_s0 + $0x58] sm:$0xff] }
 0x579   : > { %v3298_v17 = vadd.f32 %v9059_v47, %v3297_v30  ;;  %v3597_v3 = vld [vmem:[#allocation2 + $0x20] sm:$0xff] }
 0x57a   : > { %v3542_v1 = vmul.f32 %v9091_v14, %v3524_v62  ;;  %v3299_v32 = vpop.f32.mrf.mxu0  ;;  %6116 = vmatprep.mubr.msk.f32.mxu1 %vm788_vm2, %v3597_v3 }
 0x57b   : > { %v3453_v11 = vadd.f32 %v3452_v27, %v3298_v17  ;;  %v3482_v17 = vpop.f32.mrf.mxu1  ;;  %v7145_v27 = vld [vmem:[#allocation2 + $0x58] sm:$0xff] }
 0x57c   : > { %v3560_v43 = vadd.f32 %v7135_v8, %v3542_v1 }
 0x57d   : > { %v3525_v24 = vmax.f32 %v3453_v11, 0.0  ;;  %v9140_v11 = vpop.f32.mrf.mxu1 }
 0x57e   : > { %3578 = vst.msk [vmem:[#allocation2 + $0x30] sm:$0xff] %vm788_vm2, %v3560_v43  ;;  %v3598_v39 = vld [vmem:[#allocation2 + $0x28] sm:$0xff] }
 0x57f   : > { %v3543_v0 = vmul.f32 %v9099_v54, %v3525_v24  ;;  %v3302_v31 = vpop.f32.mrf.mxu0  ;;  %6117 = vmatmul.mubr.msk.f32.gmra.mxu1 %vm788_vm2, %v3598_v39 }
 0x580   : > { %v3303_v52 = vadd.f32 %v9059_v47, %v3302_v31  ;;  %v3492_v31 = vpop.f32.mrf.mxu1 }
 0x581   : > { %v3561_v41 = vadd.f32 %v7137_v38, %v3543_v0  ;;  %v3304_v4 = vpop.f32.mrf.mxu0 }
 0x582   : > { %v3458_v16 = vadd.f32 %v6083_v26, %v3303_v52  ;;  %v9147_v52 = vld [vmem:[%s10093_s0 + $0x60] sm:$0xff] }
 0x583   : > { %3579 = vst.msk [vmem:[#allocation2 + $0x38] sm:$0xff] %vm788_vm2, %v3561_v41 }
 0x584   : > { %v3526_v63 = vmax.f32 %v3458_v16, 0.0  ;;  %v3307_v48 = vpop.f32.mrf.mxu0  ;;  %v7147_v16 = vld [vmem:[#allocation2 + $0x60] sm:$0xff] }
 0x585   : > { %v3308_v51 = vadd.f32 %v9059_v47, %v3307_v48  ;;  %v3599_v7 = vld [vmem:[#allocation2 + $0x30] sm:$0xff] }
 0x586   : > { %v3544_v49 = vmul.f32 %v9109_v23, %v3526_v63  ;;  %v3309_v12 = vpop.f32.mrf.mxu0  ;;  %6119 = vmatprep.mubr.msk.f32.mxu1 %vm788_vm2, %v3599_v7  ;;  %v9157_v7 = vld [vmem:[%s10093_s0 + $0x68] sm:$0xff] }
 0x587   : > { %v3463_v37 = vadd.f32 %v3462_v44, %v3308_v51 }
 0x588   : > { %v3562_v40 = vadd.f32 %v7139_v53, %v3544_v49  ;;  %v7149_v53 = vld [vmem:[#allocation2 + $0x68] sm:$0xff] }
 0x589   : > { %v3527_v50 = vmax.f32 %v3463_v37, 0.0 }
 0x58a   : > { %3580 = vst.msk [vmem:[#allocation2 + $0x40] sm:$0xff] %vm788_vm2, %v3562_v40  ;;  %v3600_v55 = vld [vmem:[#allocation2 + $0x38] sm:$0xff] }
 0x58b   : > { %v3545_v56 = vmul.f32 %v9117_v21, %v3527_v50  ;;  %v3312_v25 = vpop.f32.mrf.mxu0  ;;  %6120 = vmatmul.mubr.msk.f32.gmra.mxu1 %vm788_vm2, %v3600_v55 }
 0x58c   : > { %v3313_v33 = vadd.f32 %v9059_v47, %v3312_v25 }
 0x58d   : > { %v3563_v18 = vadd.f32 %v7141_v22, %v3545_v56  ;;  %v3314_v19 = vpop.f32.mrf.mxu0 }
 0x58e   : > { %v3468_v34 = vadd.f32 %v6086_v2, %v3313_v33  ;;  %v9151_v2 = vpop.f32.mrf.mxu1 }
 0x58f   : > { %3581 = vst.msk [vmem:[#allocation2 + $0x48] sm:$0xff] %vm788_vm2, %v3563_v18 }
 0x590   : > { %v3528_v28 = vmax.f32 %v3468_v34, 0.0  ;;  %v3317_v10 = vpop.f32.mrf.mxu0  ;;  %v3502_v12 = vpop.f32.mrf.mxu1 }
 0x591   : > { %v3318_v59 = vadd.f32 %v9059_v47, %v3317_v10  ;;  %v3601_v5 = vld [vmem:[#allocation2 + $0x40] sm:$0xff] }
 0x592   : > { %v3546_v42 = vmul.f32 %v9127_v58, %v3528_v28  ;;  %v3319_v13 = vpop.f32.mrf.mxu0  ;;  %6122 = vmatprep.mubr.msk.f32.mxu1 %vm788_vm2, %v3601_v5  ;;  %v9162_v55 = vpop.f32.mrf.mxu1 }
 0x593   : > { %v3473_v46 = vadd.f32 %v3472_v36, %v3318_v59  ;;  %v7151_v59 = vld [vmem:[#allocation2 + $0x70] sm:$0xff] }
 0x594   : > { %v3564_v15 = vadd.f32 %v7143_v60, %v3546_v42  ;;  %v9166_v19 = vpop.f32.mrf.mxu1  ;;  %v9178_v42 = vld [vmem:[%s10084_s5 + $0x2] ss:$0 sm:$0xff] }
 0x595   : > { %v3529_v61 = vmax.f32 %v3473_v46, 0.0 }
 0x596   : > { %3582 = vst.msk [vmem:[#allocation2 + $0x50] sm:$0xff] %vm788_vm2, %v3564_v15  ;;  %v3602_v26 = vld [vmem:[#allocation2 + $0x48] sm:$0xff]  ;;  %v9185_v15 = vld [vmem:[%s10093_s0 + $0x78] sm:$0xff] }
 0x597   : > { %v3547_v62 = vmul.f32 %v9135_v57, %v3529_v61  ;;  %v3322_v30 = vpop.f32.mrf.mxu0  ;;  %6123 = vmatmul.mubr.msk.f32.gmra.mxu1 %vm788_vm2, %v3602_v26 }
 0x598   : > { %v3323_v3 = vadd.f32 %v9059_v47, %v3322_v30 }
 0x599   : > { %v3565_v1 = vadd.f32 %v7145_v27, %v3547_v62  ;;  %v3324_v32 = vpop.f32.mrf.mxu0 }
 0x59a   : > { %v3478_v8 = vadd.f32 %v6089_v9, %v3323_v3  ;;  %v9171_v9 = vld [vmem:[%s10093_s0 + $0x70] sm:$0xff]  ;;  %v7153_v3 = vld [vmem:[#allocation2 + $0x78] sm:$0xff]  ;;  %v7154_v32 = vld [vmem:[%s10093_s0 + $0x8] sm:$0xff] }
 0x59b   : > { %3583 = vst.msk [vmem:[#allocation2 + $0x58] sm:$0xff] %vm788_vm2, %v3565_v1 }
 0x59c   : > { %v3530_v43 = vmax.f32 %v3478_v8, 0.0  ;;  %v3327_v24 = vpop.f32.mrf.mxu0 }
 0x59d   : > { %v3328_v39 = vadd.f32 %v9059_v47, %v3327_v24  ;;  %v3603_v0 = vld [vmem:[#allocation2 + $0x50] sm:$0xff] }
 0x59e   : > { %v3548_v38 = vmul.f32 %v9147_v52, %v3530_v43  ;;  %v3329_v41 = vpop.f32.mrf.mxu0  ;;  %6125 = vmatprep.mubr.msk.f32.mxu1 %vm788_vm2, %v3603_v0 }
 0x59f   : > { %v3483_v4 = vadd.f32 %v3482_v17, %v3328_v39  ;;  %v7155_v39 = vld [vmem:[%s10093_s0] sm:$0xff] }
 0x5a0   : > { %v3566_v63 = vadd.f32 %v7147_v16, %v3548_v38 }
 0x5a1   : > { %v3531_v48 = vmax.f32 %v3483_v4, 0.0 }
 0x5a2   : > { %3584 = vst.msk [vmem:[#allocation2 + $0x60] sm:$0xff] %vm788_vm2, %v3566_v63  ;;  %v3604_v51 = vld [vmem:[#allocation2 + $0x58] sm:$0xff] }
 0x5a3   : > { %v3549_v44 = vmul.f32 %v9157_v7, %v3531_v48  ;;  %v3332_v49 = vpop.f32.mrf.mxu0  ;;  %6126 = vmatmul.mubr.msk.f32.gmra.mxu1 %vm788_vm2, %v3604_v51  ;;  %v7157_v51 = vld [vmem:[#allocation2 + $0x80] sm:$0xff] }
 0x5a4   : > { %v3333_v37 = vadd.f32 %v9059_v47, %v3332_v49 }
 0x5a5   : > { %v3567_v40 = vadd.f32 %v7149_v53, %v3549_v44  ;;  %v3334_v50 = vpop.f32.mrf.mxu0 }
 0x5a6   : > { %v3488_v56 = vadd.f32 %v6092_v20, %v3333_v37 }
 0x5a7   : > { %3585 = vst.msk [vmem:[#allocation2 + $0x68] sm:$0xff] %vm788_vm2, %v3567_v40 }
 0x5a8   : > { %v3532_v25 = vmax.f32 %v3488_v56, 0.0  ;;  %v3337_v33 = vpop.f32.mrf.mxu0  ;;  %v9214_v56 = vld [vmem:[%s10093_s0 + $0x88] sm:$0xff] }
 0x5a9   : > { %v3338_v22 = vadd.f32 %v9059_v47, %v3337_v33  ;;  %v3605_v18 = vld [vmem:[#allocation2 + $0x60] sm:$0xff]  ;;  %v6112_v36 = vpop.f32.mrf.mxu1 }
 0x5aa   : > { %v3550_v34 = vmul.f32 %v9171_v9, %v3532_v25  ;;  %v3339_v28 = vpop.f32.mrf.mxu0  ;;  %6128 = vmatprep.mubr.msk.f32.mxu1 %vm788_vm2, %v3605_v18  ;;  %v3774_v46 = vadd.f32 %v6112_v36, %v9178_v42  ;;  %v7161_v36 = vld [vmem:[#allocation2 + $0x90] sm:$0xff] }
 0x5ab   : > { %v3493_v10 = vadd.f32 %v3492_v31, %v3338_v22  ;;  %v3768_v60 = vpop.f32.mrf.mxu1  ;;  %v9223_v28 = vld [vmem:[%s10093_s0 + $0x90] sm:$0xff] }
 0x5ac   : > { %v3568_v5 = vadd.f32 %v7151_v59, %v3550_v34  ;;  %v3888_v62 = vmax.f32 %v3774_v46, 0.0  ;;  %v3769_v30 = vadd.f32 %v9178_v42, %v3768_v60 }
 0x5ad   : > { %v3533_v13 = vmax.f32 %v3493_v10, 0.0 }
 0x5ae   : > { %3586 = vst.msk [vmem:[#allocation2 + $0x70] sm:$0xff] %vm788_vm2, %v3568_v5  ;;  %v3606_v20 = vld [vmem:[#allocation2 + $0x68] sm:$0xff]  ;;  %v3912_v8 = vmul.f32 %v7154_v32, %v3888_v62  ;;  %v3887_v43 = vmax.f32 %v3769_v30, 0.0 }
 0x5af   : > { %v3551_v61 = vmul.f32 %v9185_v15, %v3533_v13  ;;  %v3342_v26 = vpop.f32.mrf.mxu0  ;;  %6129 = vmatmul.mubr.msk.f32.gmra.mxu1 %vm788_vm2, %v3606_v20 }
 0x5b0   : > { %v3343_v17 = vadd.f32 %v9059_v47, %v3342_v26  ;;  %3936 = vst.msk [vmem:[#allocation3 + $0x8] sm:$0xff] %vm788_vm2, %v3912_v8  ;;  %v3911_v0 = vmul.f32 %v7155_v39, %v3887_v43  ;;  %v9243_v8 = vld [vmem:[%s10093_s0 + $0xa0] sm:$0xff]  ;;  %v3614_v39 = vld [vmem:[#allocation2 + $0xa8] sm:$0xff] }
 0x5b1   : > { %v3569_v27 = vadd.f32 %v7153_v3, %v3551_v61  ;;  %v3344_v1 = vpop.f32.mrf.mxu0  ;;  %v9233_v61 = vld [vmem:[%s10093_s0 + $0x98] sm:$0xff] }
 0x5b2   : > { %v3498_v24 = vadd.f32 %v9140_v11, %v3343_v17  ;;  %3935 = vst.msk [vmem:[#allocation3] sm:$0xff] %vm788_vm2, %v3911_v0  ;;  %v9205_v11 = vld [vmem:[%s10093_s0 + $0x80] sm:$0xff]  ;;  %v7163_v3 = vld [vmem:[#allocation2 + $0x98] sm:$0xff] }
 0x5b3   : > { %3587 = vst.msk [vmem:[#allocation2 + $0x78] sm:$0xff] %vm788_vm2, %v3569_v27 }
 0x5b4   : > { %v3534_v31 = vmax.f32 %v3498_v24, 0.0  ;;  %v3347_v38 = vpop.f32.mrf.mxu0 }
 0x5b5   : > { %v3348_v41 = vadd.f32 %v9059_v47, %v3347_v38  ;;  %v3607_v4 = vld [vmem:[#allocation2 + $0x70] sm:$0xff]  ;;  %v3616_v38 = vld [vmem:[#allocation2 + $0xb8] sm:$0xff] }
 0x5b6   : > { %v3552_v16 = vmul.f32 %v9205_v11, %v3534_v31  ;;  %v3349_v63 = vpop.f32.mrf.mxu0  ;;  %6131 = vmatprep.mubr.msk.f32.mxu1 %vm788_vm2, %v3607_v4  ;;  %v3615_v31 = vld [vmem:[#allocation2 + $0xb0] sm:$0xff] }
 0x5b7   : > { %v3503_v48 = vadd.f32 %v3502_v12, %v3348_v41  ;;  %v7159_v12 = vld [vmem:[#allocation2 + $0x88] sm:$0xff]  ;;  %v9256_v41 = vld [vmem:[%s10085_s6 + $0x358] sm:$0xff]  ;;  %v9263_v4 = vld [vmem:[%s10085_s6 + $0x350] sm:$0xff] }
 0x5b8   : > { %v3570_v44 = vadd.f32 %v7157_v51, %v3552_v16  ;;  %6225 = vmatprep.subr.mxu1 %v9256_v41  ;;  %v9270_v16 = vld [vmem:[%s10085_s6 + $0x348] sm:$0xff]  ;;  %v9277_v63 = vld [vmem:[%s10085_s6 + $0x340] sm:$0xff]  ;;  %v5610_v51 = vld [vmem:[%s10085_s6 + $0x2b0] sm:$0xff] }
 0x5b9   : > { %v3352_v49 = vpop.f32.mrf.mxu0  ;;  %v3535_v37 = vmax.f32 %v3503_v48, 0.0  ;;  %6229 = vmatpush3.msra.mxu1 %v9256_v41  ;;  %v5611_v48 = vld [vmem:[%s10085_s6 + $0x2b8] sm:$0xff] }
 0x5ba   : > { %v3353_v53 = vadd.f32 %v9059_v47, %v3352_v49  ;;  %3588 = vst.msk [vmem:[#allocation2 + $0x80] sm:$0xff] %vm788_vm2, %v3570_v44  ;;  %v3608_v50 = vld [vmem:[#allocation2 + $0x78] sm:$0xff]  ;;  %6226 = vmatprep.subr.mxu1 %v9263_v4  ;;  %4603 = vmatpush1.msra.mxu0 %v5611_v48  ;;  %v5609_v44 = vld [vmem:[%s10085_s6 + $0x2a8] sm:$0xff]  ;;  %v5608_v49 = vld [vmem:[%s10085_s6 + $0x2a0] sm:$0xff] }
 0x5bb   : > { %v3354_v40 = vpop.f32.mrf.mxu0  ;;  %v3553_v25 = vmul.f32 %v9214_v56, %v3535_v37  ;;  %6132 = vmatmul.mubr.msk.f32.gmra.mxu1 %vm788_vm2, %v3608_v50  ;;  %4604 = vmatprep.subr.mxu0 %v7272_v35  ;;  %v5607_v37 = vld [vmem:[%s10085_s6 + $0x298] sm:$0xff]  ;;  %v5604_v50 = vld [vmem:[%s10085_s6 + $0x280] sm:$0xff] }
 0x5bc   : > { %v3508_v33 = vadd.f32 %v9151_v2, %v3353_v53  ;;  %6230 = vmatpush3.msra.mxu1 %v9263_v4  ;;  %4605 = vmatpush1.msra.mxu0 %v5610_v51  ;;  %v5606_v53 = vld [vmem:[%s10085_s6 + $0x290] sm:$0xff]  ;;  %v5605_v40 = vld [vmem:[%s10085_s6 + $0x288] sm:$0xff]  ;;  %v5616_v48 = vld [vmem:[%s10085_s6 + $0x2e0] sm:$0xff] }
 0x5bd   : > { %v3571_v22 = vadd.f32 %v7159_v12, %v3553_v25  ;;  %6227 = vmatprep.subr.mxu1 %v9270_v16  ;;  %4606 = vmatprep.subr.mxu0 %v7272_v35  ;;  %v5603_v25 = vld [vmem:[%s10085_s6 + $0x278] sm:$0xff]  ;;  %v5601_v12 = vld [vmem:[%s10085_s6 + $0x268] sm:$0xff] }
 0x5be   : > { %v3536_v18 = vmax.f32 %v3508_v33, 0.0  ;;  %v3357_v34 = vpop.f32.mrf.mxu0  ;;  %6231 = vmatpush3.msra.mxu1 %v9270_v16  ;;  %4607 = vmatpush1.msra.mxu0 %v5609_v44  ;;  %v5602_v33 = vld [vmem:[%s10085_s6 + $0x270] sm:$0xff] }
 0x5bf   : > { %3589 = vst.msk [vmem:[#allocation2 + $0x88] sm:$0xff] %vm788_vm2, %v3571_v22  ;;  %v3358_v59 = vadd.f32 %v9059_v47, %v3357_v34  ;;  %6228 = vmatprep.subr.mxu1 %v9277_v63  ;;  %4608 = vmatprep.subr.mxu0 %v7272_v35  ;;  %v5600_v22 = vld [vmem:[%s10085_s6 + $0x260] sm:$0xff]  ;;  %v5598_v34 = vld [vmem:[%s10085_s6 + $0x250] sm:$0xff] }
 0x5c0   : > { %v3554_v10 = vmul.f32 %v9223_v28, %v3536_v18  ;;  %v3359_v5 = vpop.f32.mrf.mxu0  ;;  %6232 = vmatpush3.msra.mxu1 %v9277_v63  ;;  %4609 = vmatpush1.msra.mxu0 %v5608_v49  ;;  %v5599_v18 = vld [vmem:[%s10085_s6 + $0x258] sm:$0xff] }
 0x5c1   : > { %v3513_v13 = vadd.f32 %v9166_v19, %v3358_v59  ;;  %v3609_v46 = vld [vmem:[#allocation2 + $0x80] sm:$0xff]  ;;  %4610 = vmatprep.subr.mxu0 %v7272_v35  ;;  %v5627_v5 = vld [vmem:[%s10085_s6 + $0x338] sm:$0xff] }
 0x5c2   : > { %v3572_v2 = vadd.f32 %v7161_v36, %v3554_v10  ;;  %6134 = vmatprep.mubr.msk.f32.mxu1 %vm788_vm2, %v3609_v46  ;;  %4611 = vmatpush1.msra.mxu0 %v5607_v37  ;;  %v5597_v10 = vld [vmem:[%s10085_s6 + $0x248] sm:$0xff]  ;;  %v5596_v59 = vld [vmem:[%s10085_s6 + $0x240] sm:$0xff]  ;;  %v5615_v49 = vld [vmem:[%s10085_s6 + $0x2d8] sm:$0xff] }
 0x5c3   : > { %v3537_v20 = vmax.f32 %v3513_v13, 0.0  ;;  %4612 = vmatprep.subr.mxu0 %v7272_v35  ;;  %v5625_v46 = vld [vmem:[%s10085_s6 + $0x328] sm:$0xff] }
 0x5c4   : > { %3590 = vst.msk [vmem:[#allocation2 + $0x90] sm:$0xff] %vm788_vm2, %v3572_v2  ;;  %4613 = vmatpush1.msra.mxu0 %v5606_v53  ;;  %v5626_v2 = vld [vmem:[%s10085_s6 + $0x330] sm:$0xff]  ;;  %v5613_v53 = vld [vmem:[%s10085_s6 + $0x2c8] sm:$0xff] }
 0x5c5   : > { %v3362_v60 = vpop.f32.mrf.mxu0  ;;  %v3555_v26 = vmul.f32 %v9233_v61, %v3537_v20  ;;  %4614 = vmatprep.subr.mxu0 %v7272_v35 }
 0x5c6   : > { %v3363_v62 = vadd.f32 %v9059_v47, %v3362_v60  ;;  %v3610_v17 = vld [vmem:[#allocation2 + $0x88] sm:$0xff]  ;;  %v7165_v47 = vld [vmem:[#allocation2 + $0xa0] sm:$0xff]  ;;  %4615 = vmatpush1.msra.mxu0 %v5605_v40 }
 0x5c7   : > { %v3364_v30 = vpop.f32.mrf.mxu0  ;;  %v3573_v19 = vadd.f32 %v7163_v3, %v3555_v26  ;;  %6135 = vmatmul.mubr.msk.f32.gmra.mxu1 %vm788_vm2, %v3610_v17  ;;  %4616 = vmatprep.subr.mxu0 %v7272_v35  ;;  %v5623_v3 = vld [vmem:[%s10085_s6 + $0x318] sm:$0xff] }
 0x5c8   : > { %v3518_v27 = vadd.f32 %v9162_v55, %v3363_v62  ;;  %4617 = vmatpush1.msra.mxu0 %v5604_v50  ;;  %v5624_v62 = vld [vmem:[%s10085_s6 + $0x320] sm:$0xff] }
 0x5c9   : > { %3591 = vst.msk [vmem:[#allocation2 + $0x98] sm:$0xff] %vm788_vm2, %v3573_v19  ;;  %4618 = vmatprep.subr.mxu0 %v7272_v35  ;;  %v7166_v19 = vld [vmem:[%s10093_s0 + $0x10] sm:$0xff] }
 0x5ca   : > { %v3538_v1 = vmax.f32 %v3518_v27, 0.0  ;;  %4619 = vmatpush1.msra.mxu0 %v5603_v25 }
 0x5cb   : > { %v3611_v32 = vld [vmem:[#allocation2 + $0x90] sm:$0xff]  ;;  %4620 = vmatprep.subr.mxu0 %v7272_v35 }
 0x5cc   : > { %v3556_v43 = vmul.f32 %v9243_v8, %v3538_v1  ;;  %6137 = vmatprep.mubr.msk.f32.mxu1 %vm788_vm2, %v3611_v32  ;;  %4621 = vmatpush1.msra.mxu0 %v5602_v33  ;;  %v5621_v1 = vld [vmem:[%s10085_s6 + $0x308] sm:$0xff]  ;;  %v5620_v32 = vld [vmem:[%s10085_s6 + $0x300] sm:$0xff] }
 0x5cd   : > { %4622 = vmatprep.subr.mxu0 %v7272_v35 }
 0x5ce   : > { %v3574_v24 = vadd.f32 %v7165_v47, %v3556_v43  ;;  %4623 = vmatpush1.msra.mxu0 %v5601_v12  ;;  %v5619_v43 = vld [vmem:[%s10085_s6 + $0x2f8] sm:$0xff] }
 0x5cf   : > { %4624 = vmatprep.subr.mxu0 %v7272_v35 }
 0x5d0   : > { %3592 = vst.msk [vmem:[#allocation2 + $0xa0] sm:$0xff] %vm788_vm2, %v3574_v24  ;;  %v3612_v55 = vld [vmem:[#allocation2 + $0x98] sm:$0xff]  ;;  %4625 = vmatpush1.msra.mxu0 %v5600_v22 }
 0x5d1   : > { %6138 = vmatmul.mubr.msk.f32.gmra.mxu1 %vm788_vm2, %v3612_v55  ;;  %4626 = vmatprep.subr.mxu0 %v7272_v35  ;;  %v5618_v55 = vld [vmem:[%s10085_s6 + $0x2f0] sm:$0xff] }
 0x5d2   : > { %4627 = vmatpush1.msra.mxu0 %v5599_v18 }
 0x5d3   : > { %4628 = vmatprep.subr.mxu0 %v7272_v35 }
 0x5d4   : > { %4629 = vmatpush1.msra.mxu0 %v5598_v34 }
 0x5d5   : > { %4630 = vmatprep.subr.mxu0 %v7272_v35 }
 0x5d6   : > { %4631 = vmatpush1.msra.mxu0 %v5597_v10 }
 0x5d7   : > { %v3613_v0 = vld [vmem:[#allocation2 + $0xa0] sm:$0xff]  ;;  %4632 = vmatprep.subr.mxu0 %v7272_v35 }
 0x5d8   : > { %6140 = vmatprep.mubr.msk.f32.mxu1 %vm788_vm2, %v3613_v0  ;;  %4633 = vmatpush1.msra.mxu0 %v5596_v59 }
 0x5d9   : > { %6141 = vmatmul.mubr.msk.f32.gmra.mxu1 %vm788_vm2, %v3614_v39  ;;  %4634 = vmatprep.subr.mxu0 %v7272_v35  ;;  %v5617_v39 = vld [vmem:[%s10085_s6 + $0x2e8] sm:$0xff] }
 0x5da   : > { %6143 = vmatprep.mubr.msk.f32.mxu1 %vm788_vm2, %v3615_v31  ;;  %4635 = vmatpush2.msra.mxu0 %v5627_v5 }
 0x5db   : > { %4636 = vmatprep.subr.mxu0 %v7272_v35 }
 0x5dc   : > { %4637 = vmatpush2.msra.mxu0 %v5626_v2 }
 0x5dd   : > { %6144 = vmatmul.mubr.msk.f32.gmra.mxu1 %vm788_vm2, %v3616_v38  ;;  %4638 = vmatprep.subr.mxu0 %v7272_v35 }
 0x5de   : > { %4639 = vmatpush2.msra.mxu0 %v5625_v46 }
 0x5df   : > { %4640 = vmatprep.subr.mxu0 %v7272_v35 }
 0x5e0   : > { %4641 = vmatpush2.msra.mxu0 %v5624_v62 }
 0x5e1   : > { %4642 = vmatprep.subr.mxu0 %v7272_v35 }
 0x5e2   : > { %4643 = vmatpush2.msra.mxu0 %v5623_v3 }
 0x5e3   : > { %4644 = vmatprep.subr.mxu0 %v7272_v35 }
 0x62f   : > { %v6115_v36 = vpop.f32.mrf.mxu1 }
 0x630   : > { %v3784_v13 = vadd.f32 %v6115_v36, %v9178_v42 }
 0x631   : > { %v3778_v20 = vpop.f32.mrf.mxu1 }
 0x632   : > { %v3890_v60 = vmax.f32 %v3784_v13, 0.0  ;;  %v3779_v26 = vadd.f32 %v9178_v42, %v3778_v20  ;;  %v3977_v13 = vld [vmem:[#allocation3 + $0x8] sm:$0xff] }
 0x634   : > { %v3914_v30 = vmul.f32 %v9065_v45, %v3890_v60  ;;  %v3889_v17 = vmax.f32 %v3779_v26, 0.0  ;;  %v5622_v45 = vld [vmem:[%s10085_s6 + $0x310] sm:$0xff] }
 0x635   : > { %4645 = vmatpush2.msra.mxu0 %v5622_v45 }
 0x636   : > { %3938 = vst.msk [vmem:[#allocation3 + $0x18] sm:$0xff] %vm788_vm2, %v3914_v30  ;;  %v3913_v27 = vmul.f32 %v7166_v19, %v3889_v17  ;;  %4646 = vmatprep.subr.mxu0 %v7272_v35 }
 0x637   : > { %4647 = vmatpush2.msra.mxu0 %v5621_v1 }
 0x638   : > { %3937 = vst.msk [vmem:[#allocation3 + $0x10] sm:$0xff] %vm788_vm2, %v3913_v27  ;;  %4648 = vmatprep.subr.mxu0 %v7272_v35 }
 0x639   : > { %4649 = vmatpush2.msra.mxu0 %v5620_v32 }
 0x63a   : > { %4650 = vmatprep.subr.mxu0 %v7272_v35 }
 0x63b   : > { %4651 = vmatpush2.msra.mxu0 %v5619_v43 }
 0x63c   : > { %4652 = vmatprep.subr.mxu0 %v7272_v35 }
 0x63d   : > { %4653 = vmatpush2.msra.mxu0 %v5618_v55 }
 0x63e   : > { %4654 = vmatprep.subr.mxu0 %v7272_v35 }
 0x63f   : > { %v6118_v47 = vpop.f32.mrf.mxu1  ;;  %4655 = vmatpush2.msra.mxu0 %v5617_v39  ;;  %v9423_v33 = vld [vmem:[#allocation3 + $0x17] sm:$0xff]  ;;  %v3995_v59 = vld [vmem:[#allocation3 + $0x9] sm:$0xff] }
 0x640   : > { %v3794_v24 = vadd.f32 %v6118_v47, %v9178_v42  ;;  %4656 = vmatprep.subr.mxu0 %v7272_v35  ;;  %v3978_v26 = vld [vmem:[#allocation3 + $0x10] sm:$0xff] }
 0x641   : > { %v3788_v0 = vpop.f32.mrf.mxu1  ;;  %4657 = vmatpush2.msra.mxu0 %v5616_v48  ;;  %v3996_v55 = vld [vmem:[#allocation3 + $0x11] sm:$0xff] }
 0x642   : > { %v3892_v31 = vmax.f32 %v3794_v24, 0.0  ;;  %v3789_v38 = vadd.f32 %v9178_v42, %v3788_v0  ;;  %4658 = vmatprep.subr.mxu0 %v7272_v35  ;;  %v9467_v48 = vld [vmem:[#allocation3 + $0x18] sm:$0xff] }
 0x643   : > { %4659 = vmatpush2.msra.mxu0 %v5615_v49 }
 0x644   : > { %v3916_v51 = vmul.f32 %v9082_v29, %v3892_v31  ;;  %v3891_v44 = vmax.f32 %v3789_v38, 0.0  ;;  %4660 = vmatprep.subr.mxu0 %v7272_v35  ;;  %v5614_v29 = vld [vmem:[%s10085_s6 + $0x2d0] sm:$0xff] }
 0x645   : > { %4661 = vmatpush2.msra.mxu0 %v5614_v29 }
 0x646   : > { %3940 = vst.msk [vmem:[#allocation3 + $0x28] sm:$0xff] %vm788_vm2, %v3916_v51  ;;  %v3915_v37 = vmul.f32 %v9074_v6, %v3891_v44  ;;  %4662 = vmatprep.subr.mxu0 %v7272_v35  ;;  %v5612_v6 = vld [vmem:[%s10085_s6 + $0x2c0] sm:$0xff] }
 0x647   : > { %4663 = vmatpush2.msra.mxu0 %v5613_v53 }
 0x648   : > { %3939 = vst.msk [vmem:[#allocation3 + $0x20] sm:$0xff] %vm788_vm2, %v3915_v37  ;;  %4664 = vmatprep.subr.mxu0 %v7272_v35 }
 0x649   : > { %4665 = vmatpush2.msra.mxu0 %v5612_v6 }
 0x64a   : > { %6146 = vmatprep.subr.mxu0 %v9256_v41 }
 0x64b   : > { %v6121_v40 = vpop.f32.mrf.mxu1 }
 0x64c   : > { %v3804_v50 = vadd.f32 %v6121_v40, %v9178_v42 }
 0x64d   : > { %v3798_v25 = vpop.f32.mrf.mxu1  ;;  %v9425_v12 = vld [vmem:[#allocation3 + $0x28] sm:$0xff] }
 0x64e   : > { %v3894_v22 = vmax.f32 %v3804_v50, 0.0  ;;  %v3799_v18 = vadd.f32 %v9178_v42, %v3798_v25  ;;  %v6816_v34 = vpack.i.bf16 %v9423_v33, %v9425_v12 }
 0x64f   : > { %v9431_v10 = vld [vmem:[#allocation3 + $0x27] sm:$0xff]  ;;  %v3997_v5 = vld [vmem:[#allocation3 + $0x19] sm:$0xff] }
 0x650   : > { %v3918_v35 = vmul.f32 %v9099_v54, %v3894_v22  ;;  %v3893_v36 = vmax.f32 %v3799_v18, 0.0  ;;  %6817 = vrot.lane.b32.xlu0 %v6816_v34, %s7273_s12  ;;  %v6826_v2 = vpack.i.bf16 %v3995_v59, %v9431_v10  ;;  %v3998_v46 = vld [vmem:[#allocation3 + $0x21] sm:$0xff]  ;;  %v6821_v60 = vpack.i.bf16 %v3977_v13, %v3997_v5 }
 0x651   : > { %v6831_v54 = vpack.i.bf16 %v3978_v26, %v3998_v46  ;;  %v9448_v45 = vld [vmem:[#allocation3 + $0x1f] sm:$0xff] }
 0x652   : > { %3942 = vst.msk [vmem:[#allocation3 + $0x38] sm:$0xff] %vm788_vm2, %v3918_v35  ;;  %v3917_v20 = vmul.f32 %v9091_v14, %v3893_v36  ;;  %6827 = vrot.lane.b32.xlu1 %v6826_v2, %s7275_s29 }
 0x654   : > { %3941 = vst.msk [vmem:[#allocation3 + $0x30] sm:$0xff] %vm788_vm2, %v3917_v20  ;;  %6822 = vrot.lane.b32.xlu0 %v6821_v60, %s7274_s21 }
 0x656   : > { %6832 = vrot.lane.b32.xlu1 %v6831_v54, %s7274_s21 }
 0x657   : > { %v6124_v62 = vpop.f32.mrf.mxu1 }
 0x658   : > { %v3814_v30 = vadd.f32 %v6124_v62, %v9178_v42 }
 0x659   : > { %v3808_v17 = vpop.f32.mrf.mxu1  ;;  %v9443_v3 = vld [vmem:[#allocation3 + $0x38] sm:$0xff] }
 0x65a   : > { %v3896_v19 = vmax.f32 %v3814_v30, 0.0  ;;  %v3809_v14 = vadd.f32 %v9178_v42, %v3808_v17  ;;  %v6836_v27 = vpack.i.bf16 %v9431_v10, %v9443_v3 }
 0x65b   : > { %v9450_v1 = vld [vmem:[#allocation3 + $0x30] sm:$0xff] }
 0x65c   : > { %v9452_v32 = vld [vmem:[#allocation3 + $0x2f] sm:$0xff]  ;;  %v3920_v43 = vmul.f32 %v9117_v21, %v3896_v19  ;;  %v3895_v47 = vmax.f32 %v3809_v14, 0.0  ;;  %6837 = vrot.lane.b32.xlu0 %v6836_v27, %s7273_s12  ;;  %v6846_v24 = vpack.i.bf16 %v9448_v45, %v9450_v1  ;;  %v9458_v39 = vld [vmem:[#allocation3 + $0x37] sm:$0xff] }
 0x65d   : > { %v6841_v31 = vpack.i.bf16 %v3996_v55, %v9452_v32  ;;  %v3999_v38 = vld [vmem:[#allocation3 + $0x29] sm:$0xff]  ;;  %v6856_v21 = vpack.i.bf16 %v3997_v5, %v9458_v39  ;;  %v4000_v51 = vld [vmem:[#allocation3 + $0x31] sm:$0xff] }
 0x65e   : > { %3944 = vst.msk [vmem:[#allocation3 + $0x48] sm:$0xff] %vm788_vm2, %v3920_v43  ;;  %v3919_v0 = vmul.f32 %v9109_v23, %v3895_v47  ;;  %6847 = vrot.lane.b32.xlu1 %v6846_v24, %s7273_s12  ;;  %v6851_v44 = vpack.i.bf16 %v9467_v48, %v3999_v38  ;;  %v9471_v23 = vld [vmem:[#allocation3 + $0x20] sm:$0xff] }
 0x65f   : > { %v6861_v29 = vpack.i.bf16 %v9471_v23, %v4000_v51 }
 0x660   : > { %3943 = vst.msk [vmem:[#allocation3 + $0x40] sm:$0xff] %vm788_vm2, %v3919_v0  ;;  %6842 = vrot.lane.b32.xlu0 %v6841_v31, %s7275_s29 }
 0x662   : > { %6857 = vrot.lane.b32.xlu1 %v6856_v21, %s7275_s29 }
 0x663   : > { %v6127_v49 = vpop.f32.mrf.mxu1 }
 0x664   : > { %v3824_v37 = vadd.f32 %v6127_v49, %v9178_v42  ;;  %6852 = vrot.lane.b32.xlu0 %v6851_v44, %s7274_s21 }
 0x665   : > { %v3818_v53 = vpop.f32.mrf.mxu1  ;;  %v9476_v6 = vld [vmem:[#allocation3 + $0x48] sm:$0xff] }
 0x666   : > { %v3898_v40 = vmax.f32 %v3824_v37, 0.0  ;;  %v3819_v50 = vadd.f32 %v9178_v42, %v3818_v53  ;;  %6862 = vrot.lane.b32.xlu1 %v6861_v29, %s7274_s21  ;;  %v6866_v25 = vpack.i.bf16 %v9458_v39, %v9476_v6 }
 0x667   : > { %v9482_v22 = vld [vmem:[#allocation3 + $0x40] sm:$0xff] }
 0x668   : > { %v9484_v18 = vld [vmem:[#allocation3 + $0x3f] sm:$0xff]  ;;  %v3922_v34 = vmul.f32 %v9135_v57, %v3898_v40  ;;  %v3897_v59 = vmax.f32 %v3819_v50, 0.0  ;;  %6867 = vrot.lane.b32.xlu0 %v6866_v25, %s7273_s12  ;;  %v6876_v5 = vpack.i.bf16 %v9452_v32, %v9482_v22  ;;  %v9490_v35 = vld [vmem:[#allocation3 + $0x47] sm:$0xff] }
 0x669   : > { %v6871_v2 = vpack.i.bf16 %v3998_v46, %v9484_v18  ;;  %v4001_v13 = vld [vmem:[#allocation3 + $0x39] sm:$0xff]  ;;  %v6886_v57 = vpack.i.bf16 %v3999_v38, %v9490_v35  ;;  %v4002_v20 = vld [vmem:[#allocation3 + $0x41] sm:$0xff] }
 0x66a   : > { %3946 = vst.msk [vmem:[#allocation3 + $0x58] sm:$0xff] %vm788_vm2, %v3922_v34  ;;  %v3921_v36 = vmul.f32 %v9127_v58, %v3897_v59  ;;  %6877 = vrot.lane.b32.xlu1 %v6876_v5, %s7273_s12  ;;  %v6881_v60 = vpack.i.bf16 %v9425_v12, %v4001_v13  ;;  %v6891_v58 = vpack.i.bf16 %v9450_v1, %v4002_v20 }
 0x66c   : > { %3945 = vst.msk [vmem:[#allocation3 + $0x50] sm:$0xff] %vm788_vm2, %v3921_v36  ;;  %6872 = vrot.lane.b32.xlu0 %v6871_v2, %s7275_s29 }
 0x66e   : > { %6887 = vrot.lane.b32.xlu1 %v6886_v57, %s7275_s29 }
 0x66f   : > { %v6130_v26 = vpop.f32.mrf.mxu1 }
 0x670   : > { %v3834_v54 = vadd.f32 %v6130_v26, %v9178_v42  ;;  %6882 = vrot.lane.b32.xlu0 %v6881_v60, %s7274_s21 }
 0x671   : > { %v3828_v46 = vpop.f32.mrf.mxu1  ;;  %v9504_v62 = vld [vmem:[#allocation3 + $0x58] sm:$0xff] }
 0x672   : > { %v3900_v30 = vmax.f32 %v3834_v54, 0.0  ;;  %v3829_v17 = vadd.f32 %v9178_v42, %v3828_v46  ;;  %6892 = vrot.lane.b32.xlu1 %v6891_v58, %s7274_s21  ;;  %v6896_v19 = vpack.i.bf16 %v9490_v35, %v9504_v62 }
 0x673   : > { %v9510_v14 = vld [vmem:[#allocation3 + $0x50] sm:$0xff] }
 0x674   : > { %v9512_v27 = vld [vmem:[#allocation3 + $0x4f] sm:$0xff]  ;;  %v3924_v43 = vmul.f32 %v9157_v7, %v3900_v30  ;;  %v3899_v47 = vmax.f32 %v3829_v17, 0.0  ;;  %6897 = vrot.lane.b32.xlu0 %v6896_v19, %s7273_s12  ;;  %v6906_v24 = vpack.i.bf16 %v9484_v18, %v9510_v14  ;;  %v9518_v55 = vld [vmem:[#allocation3 + $0x57] sm:$0xff] }
 0x675   : > { %v6901_v31 = vpack.i.bf16 %v4000_v51, %v9512_v27  ;;  %v9524_v38 = vld [vmem:[#allocation3 + $0x49] sm:$0xff]  ;;  %v6916_v7 = vpack.i.bf16 %v4001_v13, %v9518_v55  ;;  %v9529_v21 = vld [vmem:[#allocation3 + $0x51] sm:$0xff] }
 0x676   : > { %3948 = vst.msk [vmem:[#allocation3 + $0x68] sm:$0xff] %vm788_vm2, %v3924_v43  ;;  %v3923_v0 = vmul.f32 %v9147_v52, %v3899_v47  ;;  %6907 = vrot.lane.b32.xlu1 %v6906_v24, %s7273_s12  ;;  %v6911_v44 = vpack.i.bf16 %v9443_v3, %v9524_v38  ;;  %v6921_v51 = vpack.i.bf16 %v9482_v22, %v9529_v21 }
 0x678   : > { %3947 = vst.msk [vmem:[#allocation3 + $0x60] sm:$0xff] %vm788_vm2, %v3923_v0  ;;  %6902 = vrot.lane.b32.xlu0 %v6901_v31, %s7275_s29 }
 0x67a   : > { %6917 = vrot.lane.b32.xlu1 %v6916_v7, %s7275_s29 }
 0x67b   : > { %v6133_v52 = vpop.f32.mrf.mxu1 }
 0x67c   : > { %v3844_v49 = vadd.f32 %v6133_v52, %v9178_v42  ;;  %6912 = vrot.lane.b32.xlu0 %v6911_v44, %s7274_s21 }
 0x67d   : > { %v3838_v37 = vpop.f32.mrf.mxu1  ;;  %v9538_v29 = vld [vmem:[#allocation3 + $0x68] sm:$0xff] }
 0x67e   : > { %v3902_v53 = vmax.f32 %v3844_v49, 0.0  ;;  %v3839_v40 = vadd.f32 %v9178_v42, %v3838_v37  ;;  %6922 = vrot.lane.b32.xlu1 %v6921_v51, %s7274_s21  ;;  %v6926_v50 = vpack.i.bf16 %v9518_v55, %v9538_v29 }
 0x67f   : > { %v4005_v25 = vld [vmem:[#allocation3 + $0x59] sm:$0xff]  ;;  %v9544_v34 = vld [vmem:[#allocation3 + $0x61] sm:$0xff] }
 0x680   : > { %v9546_v59 = vld [vmem:[#allocation3 + $0x60] sm:$0xff]  ;;  %v3926_v5 = vmul.f32 %v9185_v15, %v3902_v53  ;;  %v3901_v36 = vmax.f32 %v3839_v40, 0.0  ;;  %6927 = vrot.lane.b32.xlu0 %v6926_v50, %s7273_s12  ;;  %6163 = vmatprep.mubr.msk.f32.mxu1 %vm788_vm2, %v4005_v25  ;;  %v6941_v54 = vpack.i.bf16 %v9476_v6, %v4005_v25 }
 0x681   : > { %v6936_v2 = vpack.i.bf16 %v9512_v27, %v9546_v59  ;;  %v9553_v13 = vld [vmem:[#allocation3 + $0x5f] sm:$0xff]  ;;  %6164 = vmatmul.mubr.msk.f32.vlgmr.msra.gmra.mxu1 %vm788_vm2, %v9544_v34  ;;  %v9557_v57 = vld [vmem:[#allocation3 + $0x67] sm:$0xff] }
 0x682   : > { %3950 = vst.msk [vmem:[#allocation3 + $0x78] sm:$0xff] %vm788_vm2, %v3926_v5  ;;  %v3925_v60 = vmul.f32 %v9171_v9, %v3901_v36  ;;  %v6931_v15 = vpack.i.bf16 %v4002_v20, %v9553_v13  ;;  %v6946_v26 = vpack.i.bf16 %v9524_v38, %v9557_v57  ;;  %v6951_v9 = vpack.i.bf16 %v9510_v14, %v9544_v34 }
 0x683   : > { %6937 = vrot.lane.b32.xlu1 %v6936_v2, %s7273_s12 }
 0x684   : > { %3949 = vst.msk [vmem:[#allocation3 + $0x70] sm:$0xff] %vm788_vm2, %v3925_v60  ;;  %6932 = vrot.lane.b32.xlu0 %v6931_v15, %s7275_s29 }
 0x687   : > { %6947 = vrot.lane.b32.xlu1 %v6946_v26, %s7275_s29  ;;  %v6136_v58 = vpop.f32.mrf.mxu1 }
 0x688   : > { %v3854_v46 = vadd.f32 %v6136_v58, %v9178_v42  ;;  %6942 = vrot.lane.b32.xlu0 %v6941_v54, %s7274_s21 }
 0x689   : > { %v3848_v20 = vpop.f32.mrf.mxu1  ;;  %v9573_v30 = vld [vmem:[#allocation3 + $0x78] sm:$0xff] }
 0x68a   : > { %v3904_v17 = vmax.f32 %v3854_v46, 0.0  ;;  %v3849_v19 = vadd.f32 %v9178_v42, %v3848_v20  ;;  %v6956_v43 = vpack.i.bf16 %v9557_v57, %v9573_v30 }
 0x68b   : > { %6952 = vrot.lane.b32.xlu1 %v6951_v9, %s7274_s21  ;;  %v9579_v47 = vld [vmem:[#allocation3 + $0x69] sm:$0xff]  ;;  %v9581_v24 = vld [vmem:[#allocation3 + $0x71] sm:$0xff] }
 0x68c   : > { %v3928_v0 = vmul.f32 %v9214_v56, %v3904_v17  ;;  %v3903_v31 = vmax.f32 %v3849_v19, 0.0  ;;  %6166 = vmatprep.mubr.msk.f32.mxu1 %vm788_vm2, %v9579_v47  ;;  %6957 = vrot.lane.b32.xlu0 %v6956_v43, %s7273_s12  ;;  %v9587_v7 = vld [vmem:[#allocation3 + $0x70] sm:$0xff]  ;;  %v6971_v40 = vpack.i.bf16 %v9504_v62, %v9579_v47  ;;  %v6981_v2 = vpack.i.bf16 %v9546_v59, %v9581_v24 }
 0x68d   : > { %v9589_v44 = vld [vmem:[#allocation3 + $0x6f] sm:$0xff]  ;;  %6167 = vmatmul.mubr.msk.f32.gmra.mxu1 %vm788_vm2, %v9581_v24  ;;  %v6966_v52 = vpack.i.bf16 %v9553_v13, %v9587_v7  ;;  %v9595_v49 = vld [vmem:[#allocation3 + $0x77] sm:$0xff] }
 0x68e   : > { %3952 = vst.msk [vmem:[#allocation3 + $0x88] sm:$0xff] %vm788_vm2, %v3928_v0  ;;  %v3927_v56 = vmul.f32 %v9205_v11, %v3903_v31  ;;  %v6961_v51 = vpack.i.bf16 %v9529_v21, %v9589_v44  ;;  %v6976_v37 = vpack.i.bf16 %v4005_v25, %v9595_v49 }
 0x68f   : > { %6967 = vrot.lane.b32.xlu1 %v6966_v52, %s7273_s12 }
 0x690   : > { %3951 = vst.msk [vmem:[#allocation3 + $0x80] sm:$0xff] %vm788_vm2, %v3927_v56  ;;  %6962 = vrot.lane.b32.xlu0 %v6961_v51, %s7275_s29 }
 0x691   : > { %v6139_v53 = vpop.f32.mrf.mxu1 }
 0x692   : > { %v3864_v50 = vadd.f32 %v6139_v53, %v9178_v42 }
 0x693   : > { %6977 = vrot.lane.b32.xlu1 %v6976_v37, %s7275_s29  ;;  %v3858_v11 = vpop.f32.mrf.mxu1  ;;  %v7167_v37 = vld [vmem:[%s10093_s0 + $0xa8] sm:$0xff] }
 0x694   : > { %v3906_v5 = vmax.f32 %v3864_v50, 0.0  ;;  %v3859_v36 = vadd.f32 %v9178_v42, %v3858_v11  ;;  %6972 = vrot.lane.b32.xlu0 %v6971_v40, %s7274_s21 }
 0x695   : > { %v9613_v60 = vld [vmem:[#allocation3 + $0x88] sm:$0xff] }
 0x696   : > { %v3930_v25 = vmul.f32 %v9233_v61, %v3906_v5  ;;  %v3905_v15 = vmax.f32 %v3859_v36, 0.0  ;;  %v6986_v26 = vpack.i.bf16 %v9595_v49, %v9613_v60 }
 0x697   : > { %6982 = vrot.lane.b32.xlu1 %v6981_v2, %s7274_s21  ;;  %v9619_v54 = vld [vmem:[#allocation3 + $0x79] sm:$0xff]  ;;  %v9621_v58 = vld [vmem:[#allocation3 + $0x81] sm:$0xff] }
 0x698   : > { %3954 = vst.msk [vmem:[#allocation3 + $0x98] sm:$0xff] %vm788_vm2, %v3930_v25  ;;  %v3929_v46 = vmul.f32 %v9223_v28, %v3905_v15  ;;  %6169 = vmatprep.mubr.msk.f32.mxu1 %vm788_vm2, %v9619_v54  ;;  %6987 = vrot.lane.b32.xlu0 %v6986_v26, %s7273_s12  ;;  %v9628_v61 = vld [vmem:[#allocation3 + $0x80] sm:$0xff]  ;;  %v7168_v25 = vld [vmem:[%s10093_s0 + $0xb8] sm:$0xff] }
 0x699   : > { %v6142_v9 = vpop.f32.mrf.mxu1  ;;  %v9630_v20 = vld [vmem:[#allocation3 + $0x7f] sm:$0xff]  ;;  %6170 = vmatmul.mubr.msk.f32.gmra.mxu1 %vm788_vm2, %v9621_v58  ;;  %v6996_v19 = vpack.i.bf16 %v9589_v44, %v9628_v61  ;;  %v9637_v43 = vld [vmem:[#allocation3 + $0x87] sm:$0xff] }
 0x69a   : > { %v3874_v17 = vadd.f32 %v6142_v9, %v9178_v42  ;;  %3953 = vst.msk [vmem:[#allocation3 + $0x90] sm:$0xff] %vm788_vm2, %v3929_v46  ;;  %v6991_v0 = vpack.i.bf16 %v9544_v34, %v9630_v20  ;;  %v7006_v51 = vpack.i.bf16 %v9579_v47, %v9637_v43  ;;  %v7001_v34 = vpack.i.bf16 %v9538_v29, %v9619_v54 }
 0x69b   : > { %v3868_v28 = vpop.f32.mrf.mxu1  ;;  %6997 = vrot.lane.b32.xlu1 %v6996_v19, %s7273_s12  ;;  %v7169_v19 = vld [vmem:[%s10093_s0 + $0xb0] sm:$0xff] }
 0x69c   : > { %v3908_v31 = vmax.f32 %v3874_v17, 0.0  ;;  %v3869_v52 = vadd.f32 %v9178_v42, %v3868_v28  ;;  %6992 = vrot.lane.b32.xlu0 %v6991_v0, %s7275_s29 }
 0x69d   : > { %v6145_v56 = vpop.f32.mrf.mxu1 }
 0x69e   : > { %v3932_v53 = vmul.f32 %v7167_v37, %v3908_v31  ;;  %v3907_v40 = vmax.f32 %v3869_v52, 0.0  ;;  %v3884_v50 = vadd.f32 %v6145_v56, %v9178_v42 }
 0x69f   : > { %v3878_v11 = vpop.f32.mrf.mxu1  ;;  %7007 = vrot.lane.b32.xlu1 %v7006_v51, %s7275_s29  ;;  %v9657_v47 = vld [vmem:[#allocation3 + $0x98] sm:$0xff] }
 0x6a0   : > { %3956 = vst.msk [vmem:[#allocation3 + $0xa8] sm:$0xff] %vm788_vm2, %v3932_v53  ;;  %v3931_v5 = vmul.f32 %v9243_v8, %v3907_v40  ;;  %v3910_v36 = vmax.f32 %v3884_v50, 0.0  ;;  %v3879_v2 = vadd.f32 %v9178_v42, %v3878_v11  ;;  %7002 = vrot.lane.b32.xlu0 %v7001_v34, %s7274_s21  ;;  %v7011_v8 = vpack.i.bf16 %v9587_v7, %v9621_v58 }
 0x6a1   : > { %v4011_v46 = vld [vmem:[#allocation3 + $0x89] sm:$0xff]  ;;  %v4012_v9 = vld [vmem:[#allocation3 + $0x91] sm:$0xff]  ;;  %v7016_v42 = vpack.i.bf16 %v9637_v43, %v9657_v47 }
 0x6a2   : > { %3955 = vst.msk [vmem:[#allocation3 + $0xa0] sm:$0xff] %vm788_vm2, %v3931_v5  ;;  %v3934_v15 = vmul.f32 %v7168_v25, %v3910_v36  ;;  %v3909_v26 = vmax.f32 %v3879_v2, 0.0  ;;  %6172 = vmatprep.mubr.msk.f32.mxu1 %vm788_vm2, %v4011_v46  ;;  %v9669_v17 = vld [vmem:[#allocation3 + $0x90] sm:$0xff]  ;;  %v7031_v40 = vpack.i.bf16 %v9573_v30, %v4011_v46  ;;  %v7041_v11 = vpack.i.bf16 %v9628_v61, %v4012_v9 }
 0x6a3   : > { %7012 = vrot.lane.b32.xlu1 %v7011_v8, %s7274_s21  ;;  %6173 = vmatmul.mubr.msk.f32.gmra.mxu1 %vm788_vm2, %v4012_v9  ;;  %v9677_v0 = vld [vmem:[#allocation3 + $0x8f] sm:$0xff]  ;;  %v7026_v31 = vpack.i.bf16 %v9630_v20, %v9669_v17  ;;  %v4013_v52 = vld [vmem:[#allocation3 + $0x97] sm:$0xff] }
 0x6a4   : > { %3958 = vst.msk [vmem:[#allocation3 + $0xb8] sm:$0xff] %vm788_vm2, %v3934_v15  ;;  %v3933_v28 = vmul.f32 %v7169_v19, %v3909_v26  ;;  %7017 = vrot.lane.b32.xlu0 %v7016_v42, %s7273_s12  ;;  %v7021_v56 = vpack.i.bf16 %v9581_v24, %v9677_v0  ;;  %v7036_v37 = vpack.i.bf16 %v9619_v54, %v4013_v52 }
 0x6a6   : > { %3957 = vst.msk [vmem:[#allocation3 + $0xb0] sm:$0xff] %vm788_vm2, %v3933_v28 }
 0x6a7   : > { %7027 = vrot.lane.b32.xlu1 %v7026_v31, %s7273_s12  ;;  %v4021_v15 = vld [vmem:[#allocation3 + $0xa8] sm:$0xff] }
 0x6a8   : > { %7022 = vrot.lane.b32.xlu0 %v7021_v56, %s7275_s29  ;;  %v7061_v26 = vpack.i.bf16 %v4013_v52, %v4021_v15 }
 0x6a9   : > { %v4017_v51 = vld [vmem:[#allocation3 + $0x99] sm:$0xff]  ;;  %v4018_v53 = vld [vmem:[#allocation3 + $0xa1] sm:$0xff] }
 0x6aa   : > { %6175 = vmatprep.mubr.msk.f32.mxu1 %vm788_vm2, %v4017_v51  ;;  %v4014_v50 = vld [vmem:[#allocation3 + $0x9f] sm:$0xff]  ;;  %v4019_v2 = vld [vmem:[#allocation3 + $0xa7] sm:$0xff]  ;;  %v7056_v25 = vpack.i.bf16 %v9613_v60, %v4017_v51  ;;  %v7071_v42 = vpack.i.bf16 %v9669_v17, %v4018_v53 }
 0x6ab   : > { %6176 = vmatmul.mubr.msk.f32.gmra.mxu1 %vm788_vm2, %v4018_v53  ;;  %7037 = vrot.lane.b32.xlu1 %v7036_v37, %s7275_s29  ;;  %v7046_v54 = vpack.i.bf16 %v9621_v58, %v4014_v50  ;;  %v9696_v5 = vld [vmem:[#allocation3 + $0xa0] sm:$0xff]  ;;  %v7066_v58 = vpack.i.bf16 %v4011_v46, %v4019_v2 }
 0x6ac   : > { %7032 = vrot.lane.b32.xlu0 %v7031_v40, %s7274_s21  ;;  %v7051_v36 = vpack.i.bf16 %v9677_v0, %v9696_v5 }
 0x6ad   : > { %v4023_v24 = vld [vmem:[#allocation3 + $0xa9] sm:$0xff]  ;;  %v4024_v34 = vld [vmem:[#allocation3 + $0xb1] sm:$0xff] }
 0x6ae   : > { %6178 = vmatprep.mubr.msk.f32.mxu1 %vm788_vm2, %v4023_v24  ;;  %v4020_v8 = vld [vmem:[#allocation3 + $0xaf] sm:$0xff] }
 0x6af   : > { %6179 = vmatmul.mubr.msk.f32.gmra.mxu1 %vm788_vm2, %v4024_v34  ;;  %7042 = vrot.lane.b32.xlu1 %v7041_v11, %s7274_s21  ;;  %v7076_v19 = vpack.i.bf16 %v4012_v9, %v4020_v8  ;;  %v4022_v28 = vld [vmem:[#allocation3 + $0xb0] sm:$0xff]  ;;  %v3959_v34 = vld [vmem:[#allocation3 + $0x7] sm:$0xff] }
 0x6b0   : > { %7047 = vrot.lane.b32.xlu0 %v7046_v54, %s7275_s29  ;;  %v7081_v31 = vpack.i.bf16 %v4014_v50, %v4022_v28 }
 0x6b3   : > { %7052 = vrot.lane.b32.xlu1 %v7051_v36, %s7273_s12 }
 0x6b4   : > { %7057 = vrot.lane.b32.xlu0 %v7056_v25, %s7274_s21 }
 0x6b7   : > { %7067 = vrot.lane.b32.xlu1 %v7066_v58, %s7275_s29 }
 0x6b8   : > { %7062 = vrot.lane.b32.xlu0 %v7061_v26, %s7273_s12 }
 0x6bb   : > { %7072 = vrot.lane.b32.xlu1 %v7071_v42, %s7274_s21 }
 0x6bc   : > { %7077 = vrot.lane.b32.xlu0 %v7076_v19, %s7275_s29  ;;  %s350_s29 = sand.u32 1, %s7262_s14  }
 0x6bd   : > { %s351_s26 = scalar_lea.vmem [#allocation4], %s350_s29 }
 0x6be   : > { %s5341_s27 = sshll.u32 %s351_s26, 4  ;;  %s5342_s27 = int_to_ptr.vmem [resolvable:$true] %s5341_s27 }
 0x6bf   : > { %7082 = vrot.lane.b32.xlu1 %v7081_v31, %s7273_s12  ;;  %v3960_v31 = vld [vmem:[#allocation3 + $0xf] sm:$0xff]  ;;  %s5329_s12 = scalar_lea.sflag [#allocation5], %s350_s29  ;;  %s7210_s21 = scalar_lea.vmem %s5342_s27, 16 }
 0x6c0   : > { %p7211_p11 = scmp.ne.s32.totalorder %s5342_s27, %s7210_s21  ;;  %p7217_p0 = scmp.lt.s32.totalorder %s5342_s27, %s7215_s20 }
 0x6c1   : > { %p7218_p1 = scmp.lt.s32.totalorder %s7216_s17, %s7210_s21 }
 0x6c2   : > { %v6818_v56 = vpop.permute.xlu0 %6817  ;;  %p7212_p12 = pnand %p7211_p11, %p7370_p5 }
 0x6c3   : > { %v6820_v11 = vunpack.i.h.bf16 %v6818_v56  ;;  %v6819_v54 = vunpack.i.l.bf16 %v6818_v56  ;;  %p7219_p2 = por %p7218_p1, %p7217_p0 }
 0x6c4   : > { %v6828_v51 = vpop.permute.xlu1 %6827  ;;  %p7213_p13 = pneg %p7212_p12 }
 0x6c5   : > { %v6830_v40 = vunpack.i.h.bf16 %v6828_v51  ;;  %v6829_v24 = vunpack.i.l.bf16 %v6828_v51 }
 0x6c6   : > { %v6823_v46 = vpop.permute.xlu0 %6822  ;;  %p7220_p3 = pnand %p7219_p2, %p7213_p13 }
 0x6c7   : > { %v6825_v52 = vunpack.i.h.bf16 %v6823_v46  ;;  %v6824_v37 = vunpack.i.l.bf16 %v6823_v46 }
 0x6c8   : > { %v6833_v15 = vpop.permute.xlu1 %6832 }
 0x6c9   : > { %v4411_v9 = vsel %vm788_vm2, %v3959_v34, %v6825_v52  ;;  %v4465_v53 = vsel %vm788_vm2, %v9467_v48, %v6824_v37  ;;  %v6835_v26 = vunpack.i.h.bf16 %v6833_v15  ;;  %v6834_v8 = vunpack.i.l.bf16 %v6833_v15 }
 0x6ca   : > { %v4483_v36 = vsel %vm1647_vm3, %v4465_v53, %v6829_v24  ;;  %v4429_v50 = vsel %vm1647_vm3, %v4411_v9, %v6830_v40 }
 0x6cb   : > { %v4501_v2 = vsel %vm1666_vm4, %v4483_v36, %v6819_v54  ;;  %v4447_v25 = vsel %vm1666_vm4, %v4429_v50, %v6820_v11  ;;  %v4466_v46 = vsel %vm788_vm2, %v9471_v23, %v6834_v8  ;;  %v4412_v52 = vsel %vm788_vm2, %v3960_v31, %v6835_v26 }
 0x6cc   : > { %4666 = vmatprep.mubr.f32.mxu0 %v4501_v2 }
 0x6cd   : > { %4667 = vmatmul.mubr.f32.vlgmr.msra.gmra.mxu0 %v4447_v25 }
 0x6ce   : > { %v6838_v58 = vpop.permute.xlu0 %6837  ;;  %6147 = vmatpush3.msra.mxu0 %v9256_v41 }
 0x6cf   : > { %6148 = vmatprep.subr.mxu0 %v9263_v4  ;;  %v6840_v23 = vunpack.i.h.bf16 %v6838_v58  ;;  %v6839_v36 = vunpack.i.l.bf16 %v6838_v58 }
 0x6d0   : > { %v6848_v42 = vpop.permute.xlu1 %6847  ;;  %6149 = vmatpush3.msra.mxu0 %v9263_v4 }
 0x6d1   : > { %6150 = vmatprep.subr.mxu0 %v9270_v16  ;;  %v6850_v56 = vunpack.i.h.bf16 %v6848_v42  ;;  %v6849_v51 = vunpack.i.l.bf16 %v6848_v42 }
 0x6d2   : > { %v6843_v48 = vpop.permute.xlu0 %6842  ;;  %6151 = vmatpush3.msra.mxu0 %v9270_v16 }
 0x6d3   : > { %v6845_v19 = vunpack.i.h.bf16 %v6843_v48  ;;  %v6844_v28 = vunpack.i.l.bf16 %v6843_v48  ;;  %6152 = vmatprep.subr.mxu0 %v9277_v63 }
 0x6d4   : > { %v6858_v41 = vpop.permute.xlu1 %6857  ;;  %6153 = vmatpush3.msra.mxu0 %v9277_v63 }
 0x6d5   : > { %v4484_v4 = vsel %vm1647_vm3, %v4466_v46, %v6844_v28  ;;  %v4430_v37 = vsel %vm1647_vm3, %v4412_v52, %v6845_v19  ;;  %v6860_v54 = vunpack.i.h.bf16 %v6858_v41  ;;  %v6859_v9 = vunpack.i.l.bf16 %v6858_v41 }
 0x6d6   : > { %v6853_v16 = vpop.permute.xlu0 %6852  ;;  %v4502_v40 = vsel %vm1666_vm4, %v4484_v4, %v6849_v51  ;;  %v4448_v24 = vsel %vm1666_vm4, %v4430_v37, %v6850_v56 }
 0x6d7   : > { %v6855_v34 = vunpack.i.h.bf16 %v6853_v16  ;;  %v6854_v11 = vunpack.i.l.bf16 %v6853_v16  ;;  %4671 = vmatprep.mubr.f32.mxu0 %v4502_v40 }
 0x6d8   : > { %v6863_v53 = vpop.permute.xlu1 %6862  ;;  %4672 = vmatmul.mubr.f32.gmra.mxu0 %v4448_v24 }
 0x6d9   : > { %v4467_v63 = vsel %vm788_vm2, %v9425_v12, %v6854_v11  ;;  %v4413_v50 = vsel %vm788_vm2, %v9423_v33, %v6855_v34  ;;  %v6865_v42 = vunpack.i.h.bf16 %v6863_v53  ;;  %v6864_v48 = vunpack.i.l.bf16 %v6863_v53 }
 0x6da   : > { %v6868_v2 = vpop.permute.xlu0 %6867  ;;  %v4485_v25 = vsel %vm1647_vm3, %v4467_v63, %v6859_v9  ;;  %v4431_v15 = vsel %vm1647_vm3, %v4413_v50, %v6860_v54 }
 0x6db   : > { %v4503_v26 = vsel %vm1666_vm4, %v4485_v25, %v6839_v36  ;;  %v4449_v8 = vsel %vm1666_vm4, %v4431_v15, %v6840_v23  ;;  %v4468_v51 = vsel %vm788_vm2, %v9450_v1, %v6864_v48  ;;  %v4414_v41 = vsel %vm788_vm2, %v9448_v45, %v6865_v42 }
 0x6dc   : > { %v6878_v19 = vpop.permute.xlu1 %6877  ;;  %4676 = vmatprep.mubr.f32.mxu0 %v4503_v26  ;;  %v6869_v1 = vunpack.i.l.bf16 %v6868_v2  ;;  %v6870_v53 = vunpack.i.h.bf16 %v6868_v2 }
 0x6dd   : > { %4677 = vmatmul.mubr.f32.gmra.mxu0 %v4449_v8  ;;  %v6880_v31 = vunpack.i.h.bf16 %v6878_v19  ;;  %v6879_v56 = vunpack.i.l.bf16 %v6878_v19 }
 0x6de   : > { %v6873_v58 = vpop.permute.xlu0 %6872 }
 0x6df   : > { %v6875_v28 = vunpack.i.h.bf16 %v6873_v58  ;;  %v6874_v12 = vunpack.i.l.bf16 %v6873_v58 }
 0x6e0   : > { %v6888_v33 = vpop.permute.xlu1 %6887 }
 0x6e1   : > { %v4486_v46 = vsel %vm1647_vm3, %v4468_v51, %v6874_v12  ;;  %v4432_v52 = vsel %vm1647_vm3, %v4414_v41, %v6875_v28  ;;  %v6890_v34 = vunpack.i.h.bf16 %v6888_v33  ;;  %v6889_v11 = vunpack.i.l.bf16 %v6888_v33 }
 0x6e2   : > { %v6883_v4 = vpop.permute.xlu0 %6882  ;;  %v4504_v37 = vsel %vm1666_vm4, %v4486_v46, %v6879_v56  ;;  %v4450_v16 = vsel %vm1666_vm4, %v4432_v52, %v6880_v31 }
 0x6e3   : > { %v6885_v40 = vunpack.i.h.bf16 %v6883_v4  ;;  %v6884_v24 = vunpack.i.l.bf16 %v6883_v4  ;;  %4681 = vmatprep.mubr.f32.mxu0 %v4504_v37 }
 0x6e4   : > { %v6893_v54 = vpop.permute.xlu1 %6892  ;;  %4682 = vmatmul.mubr.f32.gmra.mxu0 %v4450_v16 }
 0x6e5   : > { %v4415_v45 = vsel %vm788_vm2, %v9431_v10, %v6885_v40  ;;  %v4469_v9 = vsel %vm788_vm2, %v9443_v3, %v6884_v24  ;;  %v6895_v25 = vunpack.i.h.bf16 %v6893_v54  ;;  %v6894_v15 = vunpack.i.l.bf16 %v6893_v54 }
 0x6e6   : > { %v6898_v23 = vpop.permute.xlu0 %6897  ;;  %v4487_v36 = vsel %vm1647_vm3, %v4469_v9, %v6889_v11  ;;  %v4433_v63 = vsel %vm1647_vm3, %v4415_v45, %v6890_v34 }
 0x6e7   : > { %v4505_v50 = vsel %vm1666_vm4, %v4487_v36, %v6869_v1  ;;  %v4451_v8 = vsel %vm1666_vm4, %v4433_v63, %v6870_v53  ;;  %v4416_v3 = vsel %vm788_vm2, %v9452_v32, %v6895_v25  ;;  %v4470_v28 = vsel %vm788_vm2, %v9482_v22, %v6894_v15 }
 0x6e8   : > { %v6908_v26 = vpop.permute.xlu1 %6907  ;;  %4686 = vmatprep.mubr.f32.mxu0 %v4505_v50  ;;  %v6899_v37 = vunpack.i.l.bf16 %v6898_v23  ;;  %v6900_v40 = vunpack.i.h.bf16 %v6898_v23 }
 0x6e9   : > { %4687 = vmatmul.mubr.f32.gmra.mxu0 %v4451_v8  ;;  %v6910_v2 = vunpack.i.h.bf16 %v6908_v26  ;;  %v6909_v19 = vunpack.i.l.bf16 %v6908_v26 }
 0x6ea   : > { %v6903_v42 = vpop.permute.xlu0 %6902 }
 0x6eb   : > { %v6905_v10 = vunpack.i.h.bf16 %v6903_v42  ;;  %v6904_v48 = vunpack.i.l.bf16 %v6903_v42 }
 0x6ec   : > { %v6918_v58 = vpop.permute.xlu1 %6917 }
 0x6ed   : > { %v4488_v12 = vsel %vm1647_vm3, %v4470_v28, %v6904_v48  ;;  %v4434_v31 = vsel %vm1647_vm3, %v4416_v3, %v6905_v10  ;;  %v6920_v52 = vunpack.i.h.bf16 %v6918_v58  ;;  %v6919_v32 = vunpack.i.l.bf16 %v6918_v58 }
 0x6ee   : > { %v6913_v56 = vpop.permute.xlu0 %6912  ;;  %v4506_v33 = vsel %vm1666_vm4, %v4488_v12, %v6909_v19  ;;  %v4452_v51 = vsel %vm1666_vm4, %v4434_v31, %v6910_v2 }
 0x6ef   : > { %v6915_v41 = vunpack.i.h.bf16 %v6913_v56  ;;  %v6914_v46 = vunpack.i.l.bf16 %v6913_v56  ;;  %4691 = vmatprep.mubr.f32.mxu0 %v4506_v33 }
 0x6f0   : > { %v6923_v4 = vpop.permute.xlu1 %6922  ;;  %4692 = vmatmul.mubr.f32.gmra.mxu0 %v4452_v51 }
 0x6f1   : > { %v4417_v22 = vsel %vm788_vm2, %v9458_v39, %v6915_v41  ;;  %v4471_v16 = vsel %vm788_vm2, %v9476_v6, %v6914_v46  ;;  %v6925_v1 = vunpack.i.h.bf16 %v6923_v4  ;;  %v6924_v45 = vunpack.i.l.bf16 %v6923_v4 }
 0x6f2   : > { %v6928_v24 = vpop.permute.xlu0 %6927  ;;  %v4489_v34 = vsel %vm1647_vm3, %v4471_v16, %v6919_v32  ;;  %v4435_v11 = vsel %vm1647_vm3, %v4417_v22, %v6920_v52 }
 0x6f3   : > { %v4507_v54 = vsel %vm1666_vm4, %v4489_v34, %v6899_v37  ;;  %v4453_v53 = vsel %vm1666_vm4, %v4435_v11, %v6900_v40  ;;  %v4418_v6 = vsel %vm788_vm2, %v9484_v18, %v6925_v1  ;;  %v4472_v15 = vsel %vm788_vm2, %v9510_v14, %v6924_v45 }
 0x6f4   : > { %4696 = vmatprep.mubr.f32.mxu0 %v4507_v54  ;;  %v6929_v28 = vunpack.i.l.bf16 %v6928_v24  ;;  %v6930_v31 = vunpack.i.h.bf16 %v6928_v24 }
 0x6f5   : > { %v6938_v9 = vpop.permute.xlu1 %6937  ;;  %4697 = vmatmul.mubr.f32.gmra.mxu0 %v4453_v53 }
 0x6f6   : > { %v6933_v36 = vpop.permute.xlu0 %6932  ;;  %v6940_v23 = vunpack.i.h.bf16 %v6938_v9  ;;  %v6939_v50 = vunpack.i.l.bf16 %v6938_v9 }
 0x6f7   : > { %v6935_v39 = vunpack.i.h.bf16 %v6933_v36  ;;  %v6934_v63 = vunpack.i.l.bf16 %v6933_v36 }
 0x6f9   : > { %v6948_v25 = vpop.permute.xlu1 %6947  ;;  %v4490_v26 = vsel %vm1647_vm3, %v4472_v15, %v6934_v63  ;;  %v4436_v8 = vsel %vm1647_vm3, %v4418_v6, %v6935_v39 }
 0x6fa   : > { %v6943_v42 = vpop.permute.xlu0 %6942  ;;  %v4508_v10 = vsel %vm1666_vm4, %v4490_v26, %v6939_v50  ;;  %v4454_v48 = vsel %vm1666_vm4, %v4436_v8, %v6940_v23  ;;  %v6950_v19 = vunpack.i.h.bf16 %v6948_v25  ;;  %v6949_v18 = vunpack.i.l.bf16 %v6948_v25 }
 0x6fb   : > { %v6945_v3 = vunpack.i.h.bf16 %v6943_v42  ;;  %v6944_v2 = vunpack.i.l.bf16 %v6943_v42  ;;  %4701 = vmatprep.mubr.f32.mxu0 %v4508_v10 }
 0x6fc   : > { %4702 = vmatmul.mubr.f32.gmra.mxu0 %v4454_v48 }
 0x6fd   : > { %v6953_v58 = vpop.permute.xlu1 %6952  ;;  %v4419_v14 = vsel %vm788_vm2, %v9490_v35, %v6945_v3  ;;  %v4473_v12 = vsel %vm788_vm2, %v9504_v62, %v6944_v2 }
 0x6fe   : > { %v6958_v56 = vpop.permute.xlu0 %6957  ;;  %v4491_v33 = vsel %vm1647_vm3, %v4473_v12, %v6949_v18  ;;  %v4437_v51 = vsel %vm1647_vm3, %v4419_v14, %v6950_v19  ;;  %v6955_v46 = vunpack.i.h.bf16 %v6953_v58  ;;  %v6954_v52 = vunpack.i.l.bf16 %v6953_v58 }
 0x6ff   : > { %v4509_v41 = vsel %vm1666_vm4, %v4491_v33, %v6929_v28  ;;  %v4455_v32 = vsel %vm1666_vm4, %v4437_v51, %v6930_v31  ;;  %v6960_v63 = vunpack.i.h.bf16 %v6958_v56  ;;  %v6959_v6 = vunpack.i.l.bf16 %v6958_v56 }
 0x700   : > { %4706 = vmatprep.mubr.f32.mxu0 %v4509_v41  ;;  %v4420_v62 = vsel %vm788_vm2, %v9512_v27, %v6955_v46  ;;  %v4474_v24 = vsel %vm788_vm2, %v9546_v59, %v6954_v52 }
 0x701   : > { %v6968_v4 = vpop.permute.xlu1 %6967  ;;  %4707 = vmatmul.mubr.f32.gmra.mxu0 %v4455_v32 }
 0x702   : > { %v6963_v37 = vpop.permute.xlu0 %6962  ;;  %v6970_v16 = vunpack.i.h.bf16 %v6968_v4  ;;  %v6969_v40 = vunpack.i.l.bf16 %v6968_v4 }
 0x703   : > { %v6965_v35 = vunpack.i.h.bf16 %v6963_v37  ;;  %v6964_v22 = vunpack.i.l.bf16 %v6963_v37 }
 0x705   : > { %v6978_v34 = vpop.permute.xlu1 %6977  ;;  %v4492_v11 = vsel %vm1647_vm3, %v4474_v24, %v6964_v22  ;;  %v4438_v54 = vsel %vm1647_vm3, %v4420_v62, %v6965_v35 }
 0x706   : > { %v6973_v1 = vpop.permute.xlu0 %6972  ;;  %v4510_v45 = vsel %vm1666_vm4, %v4492_v11, %v6969_v40  ;;  %v4456_v9 = vsel %vm1666_vm4, %v4438_v54, %v6970_v16  ;;  %v6980_v39 = vunpack.i.h.bf16 %v6978_v34  ;;  %v6979_v27 = vunpack.i.l.bf16 %v6978_v34 }
 0x707   : > { %v6975_v53 = vunpack.i.h.bf16 %v6973_v1  ;;  %v6974_v36 = vunpack.i.l.bf16 %v6973_v1  ;;  %4711 = vmatprep.mubr.f32.mxu0 %v4510_v45 }
 0x708   : > { %4712 = vmatmul.mubr.f32.gmra.mxu0 %v4456_v9 }
 0x709   : > { %v4421_v59 = vsel %vm788_vm2, %v9518_v55, %v6975_v53  ;;  %v6983_v23 = vpop.permute.xlu1 %6982  ;;  %v4475_v50 = vsel %vm788_vm2, %v9538_v29, %v6974_v36 }
 0x70a   : > { %v6988_v25 = vpop.permute.xlu0 %6987  ;;  %v4493_v15 = vsel %vm1647_vm3, %v4475_v50, %v6979_v27  ;;  %v4439_v26 = vsel %vm1647_vm3, %v4421_v59, %v6980_v39  ;;  %v6985_v10 = vunpack.i.h.bf16 %v6983_v23  ;;  %v6984_v48 = vunpack.i.l.bf16 %v6983_v23 }
 0x70b   : > { %v4511_v8 = vsel %vm1666_vm4, %v4493_v15, %v6959_v6  ;;  %v4457_v42 = vsel %vm1666_vm4, %v4439_v26, %v6960_v63  ;;  %v6990_v32 = vunpack.i.h.bf16 %v6988_v25  ;;  %v6989_v4 = vunpack.i.l.bf16 %v6988_v25 }
 0x70c   : > { %4716 = vmatprep.mubr.f32.mxu0 %v4511_v8  ;;  %v4422_v29 = vsel %vm788_vm2, %v9553_v13, %v6985_v10  ;;  %v4476_v28 = vsel %vm788_vm2, %v9587_v7, %v6984_v48 }
 0x70d   : > { %v6998_v3 = vpop.permute.xlu1 %6997  ;;  %4717 = vmatmul.mubr.f32.gmra.mxu0 %v4457_v42 }
 0x70e   : > { %v6993_v2 = vpop.permute.xlu0 %6992  ;;  %v7000_v18 = vunpack.i.h.bf16 %v6998_v3  ;;  %v6999_v58 = vunpack.i.l.bf16 %v6998_v3 }
 0x70f   : > { %v6995_v55 = vunpack.i.h.bf16 %v6993_v2  ;;  %v6994_v19 = vunpack.i.l.bf16 %v6993_v2 }
 0x711   : > { %v7008_v14 = vpop.permute.xlu1 %7007  ;;  %v4494_v12 = vsel %vm1647_vm3, %v4476_v28, %v6994_v19  ;;  %v4440_v31 = vsel %vm1647_vm3, %v4422_v29, %v6995_v55 }
 0x712   : > { %v7003_v56 = vpop.permute.xlu0 %7002  ;;  %v4512_v33 = vsel %vm1666_vm4, %v4494_v12, %v6999_v58  ;;  %v4458_v51 = vsel %vm1666_vm4, %v4440_v31, %v7000_v18  ;;  %v7010_v52 = vunpack.i.h.bf16 %v7008_v14  ;;  %v7009_v13 = vunpack.i.l.bf16 %v7008_v14 }
 0x713   : > { %v7005_v41 = vunpack.i.h.bf16 %v7003_v56  ;;  %v7004_v46 = vunpack.i.l.bf16 %v7003_v56  ;;  %4721 = vmatprep.mubr.f32.mxu0 %v4512_v33 }
 0x714   : > { %4722 = vmatmul.mubr.f32.gmra.mxu0 %v4458_v51 }
 0x715   : > { %v4423_v7 = vsel %vm788_vm2, %v9557_v57, %v7005_v41  ;;  %v7013_v37 = vpop.permute.xlu1 %7012  ;;  %v4477_v35 = vsel %vm788_vm2, %v9573_v30, %v7004_v46 }
 0x716   : > { %v7018_v22 = vpop.permute.xlu0 %7017  ;;  %v4495_v62 = vsel %vm1647_vm3, %v4477_v35, %v7009_v13  ;;  %v4441_v16 = vsel %vm1647_vm3, %v4423_v7, %v7010_v52  ;;  %v7015_v34 = vunpack.i.h.bf16 %v7013_v37  ;;  %v7014_v11 = vunpack.i.l.bf16 %v7013_v37 }
 0x717   : > { %v4513_v40 = vsel %vm1666_vm4, %v4495_v62, %v6989_v4  ;;  %v4459_v24 = vsel %vm1666_vm4, %v4441_v16, %v6990_v32  ;;  %v7020_v26 = vunpack.i.h.bf16 %v7018_v22  ;;  %v7019_v8 = vunpack.i.l.bf16 %v7018_v22 }
 0x718   : > { %4726 = vmatprep.mubr.f32.mxu0 %v4513_v40  ;;  %v4424_v30 = vsel %vm788_vm2, %v9589_v44, %v7015_v34  ;;  %v4478_v36 = vsel %vm788_vm2, %v9628_v61, %v7014_v11 }
 0x719   : > { %v7028_v54 = vpop.permute.xlu1 %7027  ;;  %4727 = vmatmul.mubr.f32.gmra.mxu0 %v4459_v24 }
 0x71a   : > { %v7023_v1 = vpop.permute.xlu0 %7022  ;;  %v7030_v9 = vunpack.i.h.bf16 %v7028_v54  ;;  %v7029_v53 = vunpack.i.l.bf16 %v7028_v54 }
 0x71b   : > { %v7025_v57 = vunpack.i.h.bf16 %v7023_v1  ;;  %v7024_v45 = vunpack.i.l.bf16 %v7023_v1 }
 0x71d   : > { %v7038_v39 = vpop.permute.xlu1 %7037  ;;  %v4496_v27 = vsel %vm1647_vm3, %v4478_v36, %v7024_v45  ;;  %v4442_v63 = vsel %vm1647_vm3, %v4424_v30, %v7025_v57 }
 0x71e   : > { %v7033_v6 = vpop.permute.xlu0 %7032  ;;  %v4514_v59 = vsel %vm1666_vm4, %v4496_v27, %v7029_v53  ;;  %v4460_v23 = vsel %vm1666_vm4, %v4442_v63, %v7030_v9  ;;  %v7040_v15 = vunpack.i.h.bf16 %v7038_v39  ;;  %v7039_v44 = vunpack.i.l.bf16 %v7038_v39 }
 0x71f   : > { %v7035_v50 = vunpack.i.h.bf16 %v7033_v6  ;;  %v7034_v25 = vunpack.i.l.bf16 %v7033_v6  ;;  %4731 = vmatprep.mubr.f32.mxu0 %v4514_v59  ;;  %v7170_v6 = vld [vmem:[#allocation3 + $0x29] sm:$0xff]  ;;  %v7173_v59 = vld [vmem:[#allocation3 + $0x41] sm:$0xff] }
 0x720   : > { %4732 = vmatmul.mubr.f32.gmra.mxu0 %v4460_v23  ;;  %v5011_v23 = vld [vmem:[%s10087_s8 + $0x18] sm:$0xff] }
 0x721   : > { %v4425_v61 = vsel %vm788_vm2, %v9595_v49, %v7035_v50  ;;  %v7043_v42 = vpop.permute.xlu1 %7042  ;;  %v4479_v10 = vsel %vm788_vm2, %v9613_v60, %v7034_v25  ;;  %6181 = vmatprep.subr.mxu1 %v5011_v23  ;;  %v5010_v50 = vld [vmem:[%s10087_s8 + $0x10] sm:$0xff]  ;;  %v5009_v25 = vld [vmem:[%s10087_s8 + $0x8] sm:$0xff] }
 0x722   : > { %v7045_v48 = vunpack.i.h.bf16 %v7043_v42  ;;  %v7044_v3 = vunpack.i.l.bf16 %v7043_v42  ;;  %v7048_v2 = vpop.permute.xlu0 %7047  ;;  %v4497_v55 = vsel %vm1647_vm3, %v4479_v10, %v7039_v44  ;;  %v4443_v19 = vsel %vm1647_vm3, %v4425_v61, %v7040_v15  ;;  %6182 = vmatpush3.msra.mxu1 %v5011_v23  ;;  %v4985_v15 = vld [vmem:[#allocation2 + $0x8] sm:$0xff]  ;;  %v4986_v44 = vld [vmem:[#allocation2 + $0x10] sm:$0xff]  ;;  %v7181_v23 = vld [vmem:[#allocation2 + $0x60] sm:$0xff] }
 0x723   : > { %v7050_v29 = vunpack.i.h.bf16 %v7048_v2  ;;  %v7049_v18 = vunpack.i.l.bf16 %v7048_v2  ;;  %v4515_v58 = vsel %vm1666_vm4, %v4497_v55, %v7019_v8  ;;  %v4461_v28 = vsel %vm1666_vm4, %v4443_v19, %v7020_v26  ;;  %6183 = vmatprep.subr.mxu1 %v5010_v50 }
 0x724   : > { %v4426_v49 = vsel %vm788_vm2, %v9630_v20, %v7045_v48  ;;  %4736 = vmatprep.mubr.f32.mxu0 %v4515_v58  ;;  %v4480_v60 = vsel %vm788_vm2, %v9669_v17, %v7044_v3  ;;  %6184 = vmatpush3.msra.mxu1 %v5010_v50 }
 0x725   : > { %v7053_v14 = vpop.permute.xlu1 %7052  ;;  %4737 = vmatmul.mubr.f32.gmra.mxu0 %v4461_v28  ;;  %v4498_v12 = vsel %vm1647_vm3, %v4480_v60, %v7049_v18  ;;  %v4444_v31 = vsel %vm1647_vm3, %v4426_v49, %v7050_v29  ;;  %6185 = vmatprep.subr.mxu1 %v5009_v25  ;;  %v9899_v28 = vld [vmem:[%s10086_s7 + $0x2] ss:$0 sm:$0xff] }
 0x726   : > { %v7055_v56 = vunpack.i.h.bf16 %v7053_v14  ;;  %v7054_v33 = vunpack.i.l.bf16 %v7053_v14  ;;  %v7058_v51 = vpop.permute.xlu0 %7057  ;;  %6186 = vmatpush3.msra.mxu1 %v5009_v25 }
 0x727   : > { %v7060_v41 = vunpack.i.h.bf16 %v7058_v51  ;;  %v7059_v46 = vunpack.i.l.bf16 %v7058_v51 }
 0x728   : > { %v4516_v52 = vsel %vm1666_vm4, %v4498_v12, %v7054_v33  ;;  %v4462_v13 = vsel %vm1666_vm4, %v4444_v31, %v7055_v56  ;;  %v7174_v33 = vld [vmem:[%s10093_s0 + $0x48] sm:$0xff] }
 0x729   : > { %v4427_v20 = vsel %vm788_vm2, %v9637_v43, %v7060_v41  ;;  %v7068_v32 = vpop.permute.xlu1 %7067  ;;  %4741 = vmatprep.mubr.f32.mxu0 %v4516_v52  ;;  %v4481_v17 = vsel %vm788_vm2, %v9657_v47, %v7059_v46  ;;  %v7175_v52 = vld [vmem:[#allocation2 + $0x48] sm:$0xff] }
 0x72a   : > { %v7070_v4 = vunpack.i.h.bf16 %v7068_v32  ;;  %v7069_v7 = vunpack.i.l.bf16 %v7068_v32  ;;  %4742 = vmatmul.mubr.f32.gmra.mxu0 %v4462_v13  ;;  %v7063_v37 = vpop.permute.xlu0 %7062 }
 0x72b   : > { %v7065_v35 = vunpack.i.h.bf16 %v7063_v37  ;;  %v7064_v22 = vunpack.i.l.bf16 %v7063_v37 }
 0x72c   : > { %v4499_v62 = vsel %vm1647_vm3, %v4481_v17, %v7069_v7  ;;  %v4445_v16 = vsel %vm1647_vm3, %v4427_v20, %v7070_v4 }
 0x72d   : > { %v7073_v40 = vpop.permute.xlu1 %7072  ;;  %v4517_v24 = vsel %vm1666_vm4, %v4499_v62, %v7064_v22  ;;  %v4463_v43 = vsel %vm1666_vm4, %v4445_v16, %v7065_v35  ;;  %v7176_v22 = vld [vmem:[%s10093_s0 + $0x50] sm:$0xff] }
 0x72e   : > { %v7075_v34 = vunpack.i.h.bf16 %v7073_v40  ;;  %v7074_v11 = vunpack.i.l.bf16 %v7073_v40  ;;  %v7078_v54 = vpop.permute.xlu0 %7077  ;;  %4746 = vmatprep.mubr.f32.mxu0 %v4517_v24  ;;  %v7177_v24 = vld [vmem:[#allocation2 + $0x50] sm:$0xff] }
 0x72f   : > { %v7080_v47 = vunpack.i.h.bf16 %v7078_v54  ;;  %v7079_v1 = vunpack.i.l.bf16 %v7078_v54  ;;  %4747 = vmatmul.mubr.f32.gmra.mxu0 %v4463_v43 }
 0x730   : > { %v4428_v57 = vsel %vm788_vm2, %v9677_v0, %v7075_v34  ;;  %v4482_v45 = vsel %vm788_vm2, %v9696_v5, %v7074_v11  ;;  %v7171_v0 = vld [vmem:[#allocation3 + $0x31] sm:$0xff]  ;;  %v7172_v5 = vld [vmem:[#allocation3 + $0x39] sm:$0xff] }
 0x731   : > { %v4446_v30 = vsel %vm1647_vm3, %v4428_v57, %v7080_v47  ;;  %v7083_v9 = vpop.permute.xlu1 %7082  ;;  %v4500_v53 = vsel %vm1647_vm3, %v4482_v45, %v7079_v1  ;;  %v7178_v11 = vld [vmem:[%s10093_s0 + $0x58] sm:$0xff] }
 0x732   : > { %v7085_v36 = vunpack.i.h.bf16 %v7083_v9  ;;  %v7084_v39 = vunpack.i.l.bf16 %v7083_v9  ;;  %v7179_v57 = vld [vmem:[#allocation2 + $0x58] sm:$0xff] }
 0x734   : > { %v4518_v27 = vsel %vm1666_vm4, %v4500_v53, %v7084_v39  ;;  %v4464_v63 = vsel %vm1666_vm4, %v4446_v30, %v7085_v36 }
 0x735   : > { %4751 = vmatprep.mubr.f32.mxu0 %v4518_v27 }
 0x736   : > { %4752 = vmatmul.mubr.f32.gmra.mxu0 %v4464_v63 }
 0x737   : > { %6154 = vmatprep.mubr.msk.f32.mxu0 %vm788_vm2, %v7170_v6  ;;  %v7180_v6 = vld [vmem:[%s10093_s0 + $0x60] sm:$0xff] }
 0x73a   : > { %6155 = vmatmul.mubr.msk.f32.vlgmr.msra.gmra.mxu0 %vm788_vm2, %v7171_v0 }
 0x73b   : > { %6157 = vmatprep.mubr.msk.f32.mxu0 %vm788_vm2, %v7172_v5 }
 0x73e   : > { %6158 = vmatmul.mubr.msk.f32.gmra.mxu0 %vm788_vm2, %v7173_v59 }
 0x73f   : > { %6160 = vmatprep.mubr.msk.f32.mxu0 %vm788_vm2, %v9524_v38  ;;  %v5008_v38 = vld [vmem:[%s10087_s8] sm:$0xff] }
 0x740   : > { %6187 = vmatprep.subr.mxu1 %v5008_v38 }
 0x741   : > { %6188 = vmatpush3.msra.mxu1 %v5008_v38  ;;  %v6165_v58 = vpop.f32.mrf.mxu1  ;;  %v7182_v38 = vld [vmem:[%s10093_s0 + $0x68] sm:$0xff] }
 0x742   : > { %6161 = vmatmul.mubr.msk.f32.gmra.mxu0 %vm788_vm2, %v9529_v21  ;;  %v4984_v21 = vld [vmem:[#allocation2] sm:$0xff] }
 0x743   : > { %6189 = vmatprep.mubr.msk.f32.mxu1 %vm788_vm2, %v4984_v21  ;;  %v4853_v14 = vpop.f32.mrf.mxu1 }
 0x744   : > { %6190 = vmatmul.mubr.msk.f32.vlgmr.msra.gmra.mxu1 %vm788_vm2, %v4985_v15 }
 0x745   : > { %6192 = vmatprep.mubr.msk.f32.mxu1 %vm788_vm2, %v4986_v44 }
 0x74d   : > { %v6168_v32 = vpop.f32.mrf.mxu1 }
 0x74f   : > { %v4863_v35 = vpop.f32.mrf.mxu1 }
 0x759   : > { %v6171_v9 = vpop.f32.mrf.mxu1 }
 0x75b   : > { %v4873_v63 = vpop.f32.mrf.mxu1 }
 0x78d   : > { %v9883_v26 = vpop.f32.mrf.mxu0 }
 0x78f   : > { %v4670_v8 = vpop.f32.mrf.mxu0 }
 0x790   : > { %v7183_v8 = vld [vmem:[#allocation2 + $0x68] sm:$0xff] }
 0x798   : > { %v9886_v61 = vpop.f32.mrf.mxu0 }
 0x79a   : > { %v4675_v42 = vpop.f32.mrf.mxu0 }
 0x79d   : > { %v9888_v10 = vpop.f32.mrf.mxu0 }
 0x79f   : > { %v4680_v48 = vpop.f32.mrf.mxu0 }
 0x7a4   : > { %v9890_v3 = vpop.f32.mrf.mxu0 }
 0x7a6   : > { %v4685_v2 = vpop.f32.mrf.mxu0 }
 0x7a7   : > { %v6174_v2 = vpop.f32.mrf.mxu1 }
 0x7a9   : > { %v9892_v55 = vpop.f32.mrf.mxu0 }
 0x7ab   : > { %v4690_v19 = vpop.f32.mrf.mxu0 }
 0x7b0   : > { %v9894_v29 = vpop.f32.mrf.mxu0 }
 0x7b2   : > { %v4695_v18 = vpop.f32.mrf.mxu0 }
 0x7b5   : > { %v4698_v49 = vpop.f32.mrf.mxu0 }
 0x7b6   : > { %v4699_v60 = vadd.f32 %v9899_v28, %v4698_v49 }
 0x7b7   : > { %v4700_v12 = vpop.f32.mrf.mxu0 }
 0x7b8   : > { %v4854_v31 = vadd.f32 %v4853_v14, %v4699_v60  ;;  %v4883_v60 = vpop.f32.mrf.mxu1  ;;  %v7184_v14 = vld [vmem:[%s10093_s0 + $0x70] sm:$0xff] }
 0x7ba   : > { %v4918_v56 = vmax.f32 %v4854_v31, 0.0 }
 0x7bc   : > { %v4936_v51 = vmul.f32 %v7174_v33, %v4918_v56  ;;  %v4703_v41 = vpop.f32.mrf.mxu0  ;;  %v7185_v33 = vld [vmem:[#allocation2 + $0x70] sm:$0xff] }
 0x7bd   : > { %v4704_v46 = vadd.f32 %v9899_v28, %v4703_v41 }
 0x7be   : > { %v4954_v13 = vadd.f32 %v7175_v52, %v4936_v51  ;;  %v4705_v20 = vpop.f32.mrf.mxu0 }
 0x7bf   : > { %v4859_v17 = vadd.f32 %v6165_v58, %v4704_v46  ;;  %v7186_v46 = vld [vmem:[%s10093_s0 + $0x78] sm:$0xff] }
 0x7c0   : > { %4972 = vst.msk [vmem:[#allocation2 + $0x48] sm:$0xff] %vm788_vm2, %v4954_v13 }
 0x7c1   : > { %v4919_v4 = vmax.f32 %v4859_v17, 0.0  ;;  %v4708_v7 = vpop.f32.mrf.mxu0 }
 0x7c2   : > { %v4709_v37 = vadd.f32 %v9899_v28, %v4708_v7  ;;  %v6177_v7 = vpop.f32.mrf.mxu1 }
 0x7c3   : > { %v4937_v62 = vmul.f32 %v7176_v22, %v4919_v4  ;;  %v4710_v16 = vpop.f32.mrf.mxu0 }
 0x7c4   : > { %v4864_v40 = vadd.f32 %v4863_v35, %v4709_v37  ;;  %v4893_v16 = vpop.f32.mrf.mxu1 }
 0x7c5   : > { %v4955_v43 = vadd.f32 %v7177_v24, %v4937_v62 }
 0x7c6   : > { %v4920_v34 = vmax.f32 %v4864_v40, 0.0  ;;  %v7188_v40 = vld [vmem:[%s10093_s0 + $0x80] sm:$0xff] }
 0x7c7   : > { %4973 = vst.msk [vmem:[#allocation2 + $0x50] sm:$0xff] %vm788_vm2, %v4955_v43 }
 0x7c8   : > { %v4938_v54 = vmul.f32 %v7178_v11, %v4920_v34  ;;  %v4713_v47 = vpop.f32.mrf.mxu0  ;;  %v7189_v11 = vld [vmem:[#allocation2 + $0x80] sm:$0xff] }
 0x7c9   : > { %v4714_v1 = vadd.f32 %v9899_v28, %v4713_v47 }
 0x7ca   : > { %v4956_v45 = vadd.f32 %v7179_v57, %v4938_v54  ;;  %v4715_v30 = vpop.f32.mrf.mxu0 }
 0x7cb   : > { %v4869_v53 = vadd.f32 %v6168_v32, %v4714_v1  ;;  %v7187_v32 = vld [vmem:[#allocation2 + $0x78] sm:$0xff] }
 0x7cc   : > { %4974 = vst.msk [vmem:[#allocation2 + $0x58] sm:$0xff] %vm788_vm2, %v4956_v45  ;;  %v7190_v45 = vld [vmem:[%s10093_s0 + $0x88] sm:$0xff] }
 0x7cd   : > { %v4921_v36 = vmax.f32 %v4869_v53, 0.0  ;;  %v4718_v39 = vpop.f32.mrf.mxu0  ;;  %v6180_v53 = vpop.f32.mrf.mxu1 }
 0x7ce   : > { %v4719_v27 = vadd.f32 %v9899_v28, %v4718_v39  ;;  %v7191_v39 = vld [vmem:[#allocation2 + $0x88] sm:$0xff] }
 0x7cf   : > { %v4939_v0 = vmul.f32 %v7180_v6, %v4921_v36  ;;  %v4720_v5 = vpop.f32.mrf.mxu0 }
 0x7d0   : > { %v4874_v59 = vadd.f32 %v4873_v63, %v4719_v27  ;;  %v4903_v5 = vpop.f32.mrf.mxu1 }
 0x7d1   : > { %v4957_v50 = vadd.f32 %v7181_v23, %v4939_v0 }
 0x7d2   : > { %v4922_v25 = vmax.f32 %v4874_v59, 0.0  ;;  %v7192_v59 = vld [vmem:[%s10093_s0 + $0x90] sm:$0xff] }
 0x7d3   : > { %4975 = vst.msk [vmem:[#allocation2 + $0x60] sm:$0xff] %vm788_vm2, %v4957_v50 }
 0x7d4   : > { %v4940_v21 = vmul.f32 %v7182_v38, %v4922_v25  ;;  %v4723_v15 = vpop.f32.mrf.mxu0  ;;  %v7193_v38 = vld [vmem:[#allocation2 + $0x90] sm:$0xff] }
 0x7d5   : > { %v4724_v44 = vadd.f32 %v9899_v28, %v4723_v15 }
 0x7d6   : > { %v4958_v42 = vadd.f32 %v7183_v8, %v4940_v21  ;;  %v4725_v48 = vpop.f32.mrf.mxu0 }
 0x7d7   : > { %v4879_v19 = vadd.f32 %v6171_v9, %v4724_v44  ;;  %v7194_v44 = vld [vmem:[%s10093_s0 + $0x98] sm:$0xff] }
 0x7d8   : > { %4976 = vst.msk [vmem:[#allocation2 + $0x68] sm:$0xff] %vm788_vm2, %v4958_v42 }
 0x7d9   : > { %v4923_v18 = vmax.f32 %v4879_v19, 0.0  ;;  %v4728_v58 = vpop.f32.mrf.mxu0 }
 0x7da   : > { %v4729_v49 = vadd.f32 %v9899_v28, %v4728_v58  ;;  %v4674_v58 = vadd.f32 %v9899_v28, %v9886_v61 }
 0x7db   : > { %v4941_v12 = vmul.f32 %v7184_v14, %v4923_v18  ;;  %v4730_v31 = vpop.f32.mrf.mxu0  ;;  %v4669_v14 = vadd.f32 %v9899_v28, %v9883_v26  ;;  %v7198_v26 = vld [vmem:[%s10093_s0 + $0x20] sm:$0xff] }
 0x7dc   : > { %v4884_v56 = vadd.f32 %v4883_v60, %v4729_v49 }
 0x7dd   : > { %v4959_v51 = vadd.f32 %v7185_v33, %v4941_v12  ;;  %v4684_v33 = vadd.f32 %v9899_v28, %v9890_v3 }
 0x7de   : > { %v4924_v41 = vmax.f32 %v4884_v56, 0.0 }
 0x7df   : > { %4977 = vst.msk [vmem:[#allocation2 + $0x70] sm:$0xff] %vm788_vm2, %v4959_v51  ;;  %v7196_v51 = vld [vmem:[%s10093_s0 + $0xa0] sm:$0xff] }
 0x7e0   : > { %v4942_v52 = vmul.f32 %v7186_v46, %v4924_v41  ;;  %v4733_v13 = vpop.f32.mrf.mxu0 }
 0x7e1   : > { %v4734_v20 = vadd.f32 %v9899_v28, %v4733_v13 }
 0x7e2   : > { %v4960_v17 = vadd.f32 %v7187_v32, %v4942_v52  ;;  %v4735_v4 = vpop.f32.mrf.mxu0  ;;  %v4679_v52 = vadd.f32 %v9899_v28, %v9888_v10  ;;  %v7200_v10 = vld [vmem:[%s10093_s0 + $0x18] sm:$0xff] }
 0x7e3   : > { %v4889_v37 = vadd.f32 %v6174_v2, %v4734_v20  ;;  %v7195_v2 = vld [vmem:[#allocation2 + $0x98] sm:$0xff]  ;;  %v7197_v20 = vld [vmem:[#allocation2 + $0xa0] sm:$0xff] }
 0x7e4   : > { %4978 = vst.msk [vmem:[#allocation2 + $0x78] sm:$0xff] %vm788_vm2, %v4960_v17 }
 0x7e5   : > { %v4925_v35 = vmax.f32 %v4889_v37, 0.0  ;;  %v4738_v22 = vpop.f32.mrf.mxu0 }
 0x7e6   : > { %v4739_v62 = vadd.f32 %v9899_v28, %v4738_v22 }
 0x7e7   : > { %v4943_v24 = vmul.f32 %v7188_v40, %v4925_v35  ;;  %v4740_v43 = vpop.f32.mrf.mxu0  ;;  %v7199_v35 = vld [vmem:[#allocation2 + $0x20] sm:$0xff] }
 0x7e8   : > { %v4894_v34 = vadd.f32 %v4893_v16, %v4739_v62 }
 0x7e9   : > { %v4961_v54 = vadd.f32 %v7189_v11, %v4943_v24  ;;  %v4689_v24 = vadd.f32 %v9899_v28, %v9892_v55  ;;  %v7202_v11 = vld [vmem:[%s10093_s0 + $0x30] sm:$0xff]  ;;  %v7204_v55 = vld [vmem:[%s10093_s0 + $0x28] sm:$0xff] }
 0x7ea   : > { %v4926_v47 = vmax.f32 %v4894_v34, 0.0  ;;  %v4743_v1 = vpop.f32.mrf.mxu0  ;;  %v7201_v34 = vld [vmem:[#allocation2 + $0x18] sm:$0xff] }
 0x7eb   : > { %4979 = vst.msk [vmem:[#allocation2 + $0x80] sm:$0xff] %vm788_vm2, %v4961_v54  ;;  %v4744_v57 = vadd.f32 %v9899_v28, %v4743_v1 }
 0x7ec   : > { %v4944_v30 = vmul.f32 %v7190_v45, %v4926_v47  ;;  %v4745_v9 = vpop.f32.mrf.mxu0  ;;  %v7203_v45 = vld [vmem:[#allocation2 + $0x30] sm:$0xff] }
 0x7ed   : > { %v4899_v36 = vadd.f32 %v6177_v7, %v4744_v57  ;;  %v4694_v7 = vadd.f32 %v9899_v28, %v9894_v29 }
 0x7ee   : > { %v4962_v27 = vadd.f32 %v7191_v39, %v4944_v30 }
 0x7ef   : > { %v4927_v63 = vmax.f32 %v4899_v36, 0.0  ;;  %v4748_v6 = vpop.f32.mrf.mxu0  ;;  %v7205_v36 = vld [vmem:[#allocation2 + $0x28] sm:$0xff] }
 0x7f0   : > { %4980 = vst.msk [vmem:[#allocation2 + $0x88] sm:$0xff] %vm788_vm2, %v4962_v27  ;;  %v4749_v0 = vadd.f32 %v9899_v28, %v4748_v6  ;;  %v7206_v27 = vld [vmem:[%s10093_s0 + $0x40] sm:$0xff] }
 0x7f1   : > { %v4945_v23 = vmul.f32 %v7192_v59, %v4927_v63  ;;  %v4750_v50 = vpop.f32.mrf.mxu0  ;;  %v7208_v59 = vld [vmem:[%s10093_s0 + $0x38] sm:$0xff] }
 0x7f2   : > { %v4904_v25 = vadd.f32 %v4903_v5, %v4749_v0  ;;  %v7207_v0 = vld [vmem:[#allocation2 + $0x40] sm:$0xff]  ;;  %v7209_v50 = vld [vmem:[#allocation2 + $0x38] sm:$0xff] }
 0x7f3   : > { %v4963_v21 = vadd.f32 %v7193_v38, %v4945_v23 }
 0x7f4   : > { %v4928_v15 = vmax.f32 %v4904_v25, 0.0 }
 0x7f5   : > { %4981 = vst.msk [vmem:[#allocation2 + $0x90] sm:$0xff] %vm788_vm2, %v4963_v21 }
 0x7f6   : > { %v4946_v8 = vmul.f32 %v7194_v44, %v4928_v15  ;;  %v4753_v42 = vpop.f32.mrf.mxu0 }
 0x7f7   : > { %v4754_v48 = vadd.f32 %v9899_v28, %v4753_v42 }
 0x7f8   : > { %v4964_v19 = vadd.f32 %v7195_v2, %v4946_v8  ;;  %v4755_v18 = vpop.f32.mrf.mxu0  ;;  %v4994_v2 = vld [vmem:[#allocation2 + $0x50] sm:$0xff] }
 0x7f9   : > { %v4909_v49 = vadd.f32 %v6180_v53, %v4754_v48  ;;  %v4993_v48 = vld [vmem:[#allocation2 + $0x48] sm:$0xff]  ;;  %v4996_v18 = vld [vmem:[#allocation2 + $0x60] sm:$0xff] }
 0x7fa   : > { %4982 = vst.msk [vmem:[#allocation2 + $0x98] sm:$0xff] %vm788_vm2, %v4964_v19  ;;  %v6156_v60 = vpop.f32.mrf.mxu0  ;;  %v4995_v19 = vld [vmem:[#allocation2 + $0x58] sm:$0xff] }
 0x7fb   : > { %v4929_v12 = vmax.f32 %v4909_v49, 0.0  ;;  %v4829_v31 = vadd.f32 %v6156_v60, %v4674_v58  ;;  %v4997_v58 = vld [vmem:[#allocation2 + $0x68] sm:$0xff]  ;;  %v4998_v49 = vld [vmem:[#allocation2 + $0x70] sm:$0xff]  ;;  %v4999_v60 = vld [vmem:[#allocation2 + $0x78] sm:$0xff] }
 0x7fc   : > { %v4823_v56 = vpop.f32.mrf.mxu0 }
 0x7fd   : > { %v4947_v41 = vmul.f32 %v7196_v51, %v4929_v12  ;;  %v4913_v46 = vmax.f32 %v4829_v31, 0.0  ;;  %v4824_v61 = vadd.f32 %v4823_v56, %v4669_v14  ;;  %v5000_v14 = vld [vmem:[#allocation2 + $0x80] sm:$0xff]  ;;  %v5001_v12 = vld [vmem:[#allocation2 + $0x88] sm:$0xff]  ;;  %v5002_v31 = vld [vmem:[#allocation2 + $0x90] sm:$0xff] }
 0x7fe   : > { %v6159_v13 = vpop.f32.mrf.mxu0  ;;  %v5005_v51 = vld [vmem:[#allocation2 + $0xa8] sm:$0xff] }
 0x7ff   : > { %v4965_v32 = vadd.f32 %v7197_v20, %v4947_v41  ;;  %v4931_v17 = vmul.f32 %v7198_v26, %v4913_v46  ;;  %v4912_v4 = vmax.f32 %v4824_v61, 0.0  ;;  %v4839_v3 = vadd.f32 %v6159_v13, %v4684_v33  ;;  %v5006_v41 = vld [vmem:[#allocation2 + $0xb0] sm:$0xff]  ;;  %v5007_v46 = vld [vmem:[#allocation2 + $0xb8] sm:$0xff] }
 0x800   : > { %v4833_v37 = vpop.f32.mrf.mxu0 }
 0x801   : > { %4983 = vst.msk [vmem:[#allocation2 + $0xa0] sm:$0xff] %vm788_vm2, %v4965_v32  ;;  %v4949_v22 = vadd.f32 %v7199_v35, %v4931_v17  ;;  %v4930_v62 = vmul.f32 %v7200_v10, %v4912_v4  ;;  %v4915_v16 = vmax.f32 %v4839_v3, 0.0  ;;  %v4834_v40 = vadd.f32 %v4833_v37, %v4679_v52  ;;  %v5003_v56 = vld [vmem:[#allocation2 + $0x98] sm:$0xff] }
 0x802   : > { %v6162_v43 = vpop.f32.mrf.mxu0 }
 0x803   : > { %4967 = vst.msk [vmem:[#allocation2 + $0x20] sm:$0xff] %vm788_vm2, %v4949_v22  ;;  %v4948_v29 = vadd.f32 %v7201_v34, %v4930_v62  ;;  %v4933_v54 = vmul.f32 %v7202_v11, %v4915_v16  ;;  %v4914_v47 = vmax.f32 %v4834_v40, 0.0  ;;  %v4849_v1 = vadd.f32 %v6162_v43, %v4694_v7 }
 0x804   : > { %v4843_v57 = vpop.f32.mrf.mxu0  ;;  %v6191_v61 = vpop.f32.mrf.mxu1 }
 0x805   : > { %4966 = vst.msk [vmem:[#allocation2 + $0x18] sm:$0xff] %vm788_vm2, %v4948_v29  ;;  %v4951_v30 = vadd.f32 %v7203_v45, %v4933_v54  ;;  %v4932_v28 = vmul.f32 %v7204_v55, %v4914_v47  ;;  %v4917_v9 = vmax.f32 %v4849_v1, 0.0  ;;  %v4844_v53 = vadd.f32 %v4843_v57, %v4689_v24 }
 0x806   : > { %v5150_v52 = vpop.f32.mrf.mxu1  ;;  %v5271_v13 = vsel %vm5269_vm5, %v6191_v61, 0.0 }
 0x807   : > { %4969 = vst.msk [vmem:[#allocation2 + $0x30] sm:$0xff] %vm788_vm2, %v4951_v30  ;;  %v4950_v39 = vadd.f32 %v7205_v36, %v4932_v28  ;;  %v4935_v63 = vmul.f32 %v7206_v27, %v4917_v9  ;;  %v4916_v6 = vmax.f32 %v4844_v53, 0.0  ;;  %v5270_v20 = vsel %vm5269_vm5, %v5150_v52, 0.0 }
 0x808   : > { %v5004_v33 = vld [vmem:[#allocation2 + $0xa0] sm:$0xff]  ;;  %v5272_v26 = vadd.f32 %v5271_v13, %v5270_v20 }
 0x809   : > { %4968 = vst.msk [vmem:[#allocation2 + $0x28] sm:$0xff] %vm788_vm2, %v4950_v39  ;;  %v4953_v5 = vadd.f32 %v7207_v0, %v4935_v63  ;;  %v4934_v23 = vmul.f32 %v7208_v59, %v4916_v6 }
 0x80a   : > { %v4988_v21 = vld [vmem:[#allocation2 + $0x20] sm:$0xff] }
 0x80b   : > { %4971 = vst.msk [vmem:[#allocation2 + $0x40] sm:$0xff] %vm788_vm2, %v4953_v5  ;;  %v4952_v25 = vadd.f32 %v7209_v50, %v4934_v23 }
 0x80c   : > { %v4987_v38 = vld [vmem:[#allocation2 + $0x18] sm:$0xff] }
 0x80d   : > { %4970 = vst.msk [vmem:[#allocation2 + $0x38] sm:$0xff] %vm788_vm2, %v4952_v25  ;;  %6193 = vmatmul.mubr.msk.f32.gmra.mxu1 %vm788_vm2, %v4987_v38 }
 0x80e   : > { %6195 = vmatprep.mubr.msk.f32.mxu1 %vm788_vm2, %v4988_v21  ;;  %v4990_v44 = vld [vmem:[#allocation2 + $0x30] sm:$0xff] }
 0x810   : > { %v4989_v15 = vld [vmem:[#allocation2 + $0x28] sm:$0xff] }
 0x811   : > { %6196 = vmatmul.mubr.msk.f32.gmra.mxu1 %vm788_vm2, %v4989_v15 }
 0x812   : > { %6198 = vmatprep.mubr.msk.f32.mxu1 %vm788_vm2, %v4990_v44  ;;  %v4992_v42 = vld [vmem:[#allocation2 + $0x40] sm:$0xff] }
 0x814   : > { %v4991_v8 = vld [vmem:[#allocation2 + $0x38] sm:$0xff] }
 0x815   : > { %6199 = vmatmul.mubr.msk.f32.gmra.mxu1 %vm788_vm2, %v4991_v8 }
 0x816   : > { %6201 = vmatprep.mubr.msk.f32.mxu1 %vm788_vm2, %v4992_v42 }
 0x819   : > { %6202 = vmatmul.mubr.msk.f32.gmra.mxu1 %vm788_vm2, %v4993_v48 }
 0x81a   : > { %6204 = vmatprep.mubr.msk.f32.mxu1 %vm788_vm2, %v4994_v2 }
 0x81d   : > { %6205 = vmatmul.mubr.msk.f32.gmra.mxu1 %vm788_vm2, %v4995_v19 }
 0x81e   : > { %6207 = vmatprep.mubr.msk.f32.mxu1 %vm788_vm2, %v4996_v18 }
 0x821   : > { %6208 = vmatmul.mubr.msk.f32.gmra.mxu1 %vm788_vm2, %v4997_v58 }
 0x822   : > { %6210 = vmatprep.mubr.msk.f32.mxu1 %vm788_vm2, %v4998_v49 }
 0x825   : > { %6211 = vmatmul.mubr.msk.f32.gmra.mxu1 %vm788_vm2, %v4999_v60 }
 0x826   : > { %6213 = vmatprep.mubr.msk.f32.mxu1 %vm788_vm2, %v5000_v14 }
 0x829   : > { %6214 = vmatmul.mubr.msk.f32.gmra.mxu1 %vm788_vm2, %v5001_v12 }
 0x82a   : > { %6216 = vmatprep.mubr.msk.f32.mxu1 %vm788_vm2, %v5002_v31 }
 0x82d   : > { %6217 = vmatmul.mubr.msk.f32.gmra.mxu1 %vm788_vm2, %v5003_v56 }
 0x82e   : > { %6219 = vmatprep.mubr.msk.f32.mxu1 %vm788_vm2, %v5004_v33 }
 0x831   : > { %6220 = vmatmul.mubr.msk.f32.gmra.mxu1 %vm788_vm2, %v5005_v51 }
 0x832   : > { %6222 = vmatprep.mubr.msk.f32.mxu1 %vm788_vm2, %v5006_v41 }
 0x835   : > { %6223 = vmatmul.mubr.msk.f32.gmra.mxu1 %vm788_vm2, %v5007_v46 }
 0x8cd   : > { %v6194_v32 = vpop.f32.mrf.mxu1 }
 0x8ce   : > { %v5275_v37 = vsel %vm5269_vm5, %v6194_v32, 0.0 }
 0x8cf   : > { %v5160_v17 = vpop.f32.mrf.mxu1 }
 0x8d0   : > { %v5273_v4 = vsel %vm5269_vm5, %v5160_v17, 0.0 }
 0x8d1   : > { %v5274_v3 = vadd.f32 %v5273_v4, %v5272_v26  ;;  %v6197_v7 = vpop.f32.mrf.mxu1 }
 0x8d2   : > { %v5279_v40 = vsel %vm5269_vm5, %v6197_v7, 0.0 }
 0x8d3   : > { %v5170_v35 = vpop.f32.mrf.mxu1  ;;  %v5276_v22 = vadd.f32 %v5275_v37, %v5274_v3 }
 0x8d4   : > { %v5277_v10 = vsel %vm5269_vm5, %v5170_v35, 0.0 }
 0x8d5   : > { %v5278_v62 = vadd.f32 %v5277_v10, %v5276_v22  ;;  %v6200_v16 = vpop.f32.mrf.mxu1  ;;  %v5324_v10 = vld [vmem:[%s10088_s9] sm:$0x1] }
 0x8d6   : > { %v5283_v54 = vsel %vm5269_vm5, %v6200_v16, 0.0 }
 0x8d7   : > { %v5180_v24 = vpop.f32.mrf.mxu1  ;;  %v5280_v43 = vadd.f32 %v5279_v40, %v5278_v62 }
 0x8d8   : > { %v5281_v34 = vsel %vm5269_vm5, %v5180_v24, 0.0 }
 0x8d9   : > { %v5282_v29 = vadd.f32 %v5281_v34, %v5280_v43  ;;  %v6203_v11 = vpop.f32.mrf.mxu1 }
 0x8da   : > { %v5287_v55 = vsel %vm5269_vm5, %v6203_v11, 0.0 }
 0x8db   : > { %v5190_v47 = vpop.f32.mrf.mxu1  ;;  %v5284_v1 = vadd.f32 %v5283_v54, %v5282_v29 }
 0x8dc   : > { %v5285_v57 = vsel %vm5269_vm5, %v5190_v47, 0.0 }
 0x8dd   : > { %v5286_v45 = vadd.f32 %v5285_v57, %v5284_v1  ;;  %v6206_v30 = vpop.f32.mrf.mxu1 }
 0x8de   : > { %v5291_v27 = vsel %vm5269_vm5, %v6206_v30, 0.0 }
 0x8df   : > { %v5200_v28 = vpop.f32.mrf.mxu1  ;;  %v5288_v9 = vadd.f32 %v5287_v55, %v5286_v45 }
 0x8e0   : > { %v5289_v53 = vsel %vm5269_vm5, %v5200_v28, 0.0 }
 0x8e1   : > { %v5290_v36 = vadd.f32 %v5289_v53, %v5288_v9  ;;  %v6209_v39 = vpop.f32.mrf.mxu1 }
 0x8e2   : > { %v5295_v23 = vsel %vm5269_vm5, %v6209_v39, 0.0 }
 0x8e3   : > { %v5210_v63 = vpop.f32.mrf.mxu1  ;;  %v5292_v6 = vadd.f32 %v5291_v27, %v5290_v36 }
 0x8e4   : > { %v5293_v0 = vsel %vm5269_vm5, %v5210_v63, 0.0 }
 0x8e5   : > { %v5294_v5 = vadd.f32 %v5293_v0, %v5292_v6  ;;  %v6212_v59 = vpop.f32.mrf.mxu1 }
 0x8e6   : > { %v5299_v44 = vsel %vm5269_vm5, %v6212_v59, 0.0 }
 0x8e7   : > { %v5220_v50 = vpop.f32.mrf.mxu1  ;;  %v5296_v25 = vadd.f32 %v5295_v23, %v5294_v5 }
 0x8e8   : > { %v5297_v38 = vsel %vm5269_vm5, %v5220_v50, 0.0 }
 0x8e9   : > { %v5298_v21 = vadd.f32 %v5297_v38, %v5296_v25  ;;  %v6215_v15 = vpop.f32.mrf.mxu1 }
 0x8ea   : > { %v5303_v18 = vsel %vm5269_vm5, %v6215_v15, 0.0 }
 0x8eb   : > { %v5230_v8 = vpop.f32.mrf.mxu1  ;;  %v5300_v42 = vadd.f32 %v5299_v44, %v5298_v21 }
 0x8ec   : > { %v5301_v48 = vsel %vm5269_vm5, %v5230_v8, 0.0 }
 0x8ed   : > { %v5302_v2 = vadd.f32 %v5301_v48, %v5300_v42  ;;  %v6218_v19 = vpop.f32.mrf.mxu1 }
 0x8ee   : > { %v5307_v31 = vsel %vm5269_vm5, %v6218_v19, 0.0 }
 0x8ef   : > { %v5240_v58 = vpop.f32.mrf.mxu1  ;;  %v5304_v49 = vadd.f32 %v5303_v18, %v5302_v2 }
 0x8f0   : > { %v5305_v60 = vsel %vm5269_vm5, %v5240_v58, 0.0 }
 0x8f1   : > { %v5306_v14 = vadd.f32 %v5305_v60, %v5304_v49  ;;  %v6221_v12 = vpop.f32.mrf.mxu1 }
 0x8f2   : > { %v5311_v61 = vsel %vm5269_vm5, %v6221_v12, 0.0 }
 0x8f3   : > { %v5250_v56 = vpop.f32.mrf.mxu1  ;;  %v5308_v33 = vadd.f32 %v5307_v31, %v5306_v14 }
 0x8f4   : > { %v5309_v51 = vsel %vm5269_vm5, %v5250_v56, 0.0 }
 0x8f5   : > { %v5310_v41 = vadd.f32 %v5309_v51, %v5308_v33  ;;  %v6224_v46 = vpop.f32.mrf.mxu1 }
 0x8f6   : > { %v5315_v26 = vsel %vm5269_vm5, %v6224_v46, 0.0 }
 0x8f7   : > { %v5260_v52 = vpop.f32.mrf.mxu1  ;;  %v5312_v13 = vadd.f32 %v5311_v61, %v5310_v41 }
 0x8f8   : > { %v5313_v20 = vsel %vm5269_vm5, %v5260_v52, 0.0 }
 0x8f9   : > { %v5314_v32 = vadd.f32 %v5313_v20, %v5312_v13 }
 0x8fb   : > { %v5316_v17 = vadd.f32 %v5315_v26, %v5314_v32 }
 0x8fd   : > { %v5317_v4 = vrot.slane %v5316_v17, 4 }
 0x8ff   : > { %v5318_v3 = vadd.f32 %v5317_v4, %v5316_v17 }
 0x901   : > { %v5319_v7 = vrot.slane %v5318_v3, 2 }
 0x903   : > { %v5320_v37 = vadd.f32 %v5319_v7, %v5318_v3 }
 0x905   : > { %v5321_v35 = vrot.slane %v5320_v37, 1 }
 0x907   : > { %v5322_v22 = vadd.f32 %v5321_v35, %v5320_v37 }
 0x909   : > { %v5323_v62 = vmul.f32 0.015625, %v5322_v22 }
 0x90b   : > { %v5325_v16 = vadd.f32 %v5324_v10, %v5323_v62 }
 0x90d   : > { %5327 = vst.msk [vmem:[%s351_s26] sm:$0x1] %vm5326_vm6, %v5325_v16 }
 0x90e   : > { %7223 = shalt.err (!%p7220_p3)
}
 0x90f   : > { %s7224_s0 = scalar_lea.hbm %s5339_s11, 16  ;;  %s7228_s26 = scalar_lea.hbm %s10089_s10, 32 }
 0x910   : > { %p7225_p4 = scmp.ne.s32.totalorder %s5339_s11, %s7224_s0  ;;  %p7229_p9 = scmp.lt.s32.totalorder %s5339_s11, %s10089_s10 }
 0x911   : > { %p7230_p10 = scmp.lt.s32.totalorder %s7228_s26, %s7224_s0 }
 0x912   : > { %p7226_p7 = pnand %p7225_p4, %p7370_p5 }
 0x913   : > { %p7231_p11 = por %p7230_p10, %p7229_p9 }
 0x914   : > { %p7227_p8 = pneg %p7226_p7 }
 0x916   : > { %p7232_p12 = pnand %p7231_p11, %p7227_p8 }
 0x918   : > { %7235 = shalt.err (!%p7232_p12)
}
 0x919   : > { %6233 = dma.vmem_to_hbm [thread:$0]  (%p7370_p5), %s5342_s27, 16, %s5339_s11, %s5329_s12  }
 0x91a PF: > { %p6239_p13 = scmp.ge.s32.totalorder %s7270_s16, 2  ;;  %s5353_s21 = sand.u32 1, %s7258_s13  }
 0x91b   : > { %s5354_s18 = scalar_lea.sflag [#allocation5], %s5353_s21 }
 0x91c   : > { %p6236_p0 = pnand %p6239_p13, %p7374_p6 }
 0x91e   : > { %p6237_p1 = pneg %p6236_p0 }
 0x920   : > { %7253 = dma.done.wait (%p6237_p1), %s5354_s18, 16  }
 0x921   : > { %7255 = vsyncadd (%p6237_p1), %s5354_s18, 4294967280  ;;  %p20_p2 = scmp.ge.s32.totalorder %s7357_s19, 4   ;;  %s10094_s13 = smov %s7262_s14 }
 0x922   : > { %s10095_s14 = smov %s7266_s15  ;;  %s10096_s15 = smov %s7368_s22 }
 0x923   : > { %s10097_s16 = smov %s7357_s19  ;;  %22 = sbr.rel (!%p20_p2) target bundleno = 5 (0x5), region = 103 }
 0x928   :  { %5358 = vsyncpa [#allocation5], 1 }
 0x929   :  { %5360 = vsyncpa [#allocation5 + $0x1], 1 }

</bundles_post_ra>
